<compile_context>
chip_gen: v6e
topology: v6e:2x2x1
jax: 0.10.0
libtpu: 0.0.40
codegen_flags: <defaults>
</compile_context>

<pallas_src>
import functools

import jax
import jax.numpy as jnp
from jax.experimental import pallas as pl
from jax.experimental.pallas import tpu as pltpu

LANE = 128


def _round_up(x, m):
    return (x + m - 1) // m * m


# --------------------------------------------------------------------------
# Fused kernel: the whole TCN stack on one (M, C) row block (M = tile_b * L).
# --------------------------------------------------------------------------
def _tcn_fused_kernel(x_ref, *refs, seq_len, layer_meta, need_pad):
    """refs = (<per-layer weight refs...>, o_ref[, xpad_scratch]).

    Per layer the weight refs are: w1a, w1b, b1, w2a, w2b, b2 [, wd, bd]
      w1a/w2a : past tap   (multiplies shift_d(x) / shift_d(h1)), bf16
      w1b/w2b : current tap (multiplies x / h1),                  bf16
      biases  : (1, cout_pad) f32
      wd/bd   : 1x1 downsample conv (only when cin != cout)
    """
    if need_pad:
        o_ref, xpad_ref = refs[-2], refs[-1]
        w_refs = refs[:-2]
    else:
        o_ref = refs[-1]
        w_refs = refs[:-1]

    m, cin = x_ref.shape

    if need_pad:
        # Lane zero-pad of the raw (M, C_in) input done once, in VMEM
        # (replaces a full wrapper-side XLA pad pass over the padded tensor).
        xpad_ref[...] = jnp.zeros(xpad_ref.shape, xpad_ref.dtype)
        xpad_ref[:, :cin] = x_ref[...]
        x = xpad_ref[...]
    else:
        x = x_ref[...]

    # Row position within its own sequence (batch boundaries every seq_len rows).
    t_in_seq = jax.lax.broadcasted_iota(jnp.int32, (m, 1), 0) % seq_len

    ri = 0
    for (d, has_ds) in layer_meta:
        w1a, w1b, b1 = w_refs[ri], w_refs[ri + 1], w_refs[ri + 2]
        w2a, w2b, b2 = w_refs[ri + 3], w_refs[ri + 4], w_refs[ri + 5]
        ri += 6
        if has_ds:
            wd, bd = w_refs[ri], w_refs[ri + 1]
            ri += 2

        in_w = x.shape[1]
        cout_pad = w1b.shape[1]
        x_bf = x.astype(jnp.bfloat16)          # one cast reused by 2-3 matmuls

        shift_on = d < seq_len                 # else the past tap is all-zero padding
        if shift_on:
            # Hoisted mask broadcasts (JAX does not CSE broadcast_in_dim);
            # reused for both convs when their widths match.
            keep_in = jnp.broadcast_to(t_in_seq >= d, (m, in_w))
            keep_mid = (keep_in if cout_pad == in_w
                        else jnp.broadcast_to(t_in_seq >= d, (m, cout_pad)))

        # ---- conv1 (dilated causal, K=2): two accumulated MXU matmuls ----
        h1 = jnp.dot(x_bf, w1b[...], preferred_element_type=jnp.float32)
        if shift_on:
            xs = jnp.where(keep_in, pltpu.roll(x, shift=d, axis=0), 0.0)
            h1 = h1 + jnp.dot(xs.astype(jnp.bfloat16), w1a[...],
                              preferred_element_type=jnp.float32)
        h1 = jnp.maximum(h1 + b1[...], 0.0)
        # TODO(synk): dropout == identity (inference semantics).

        # ---- conv2 (dilated causal) ----
        h1_bf = h1.astype(jnp.bfloat16)
        h2 = jnp.dot(h1_bf, w2b[...], preferred_element_type=jnp.float32)
        if shift_on:
            hs = jnp.where(keep_mid, pltpu.roll(h1, shift=d, axis=0), 0.0)
            h2 = h2 + jnp.dot(hs.astype(jnp.bfloat16), w2a[...],
                              preferred_element_type=jnp.float32)
        h2 = jnp.maximum(h2 + b2[...], 0.0)

        # ---- residual branch ----
        if has_ds:
            res = jnp.dot(x_bf, wd[...], preferred_element_type=jnp.float32) + bd[...]
        else:
            res = x                            # cin == cout  ->  same padded width

        x = jnp.maximum(h2 + res, 0.0)

    # Final output written at the REAL channel width (no wrapper-side slice).
    o_ref[...] = x[:, :o_ref.shape[1]]


# --------------------------------------------------------------------------
# Tiling helpers
# --------------------------------------------------------------------------
def _pick_tile_b(batch, seq_len, widest, max_block_bytes):
    """How many batch elements each grid step processes."""
    def ok(tb):
        return (batch % tb == 0 and (tb * seq_len) % 8 == 0
                and tb * seq_len * widest * 4 <= max_block_bytes)

    cands = [tb for tb in range(1, batch + 1) if ok(tb)]
    if not cands:
        return batch                      # single full-array block (exempt from (8,128) rule)
    even = [tb for tb in cands if (batch // tb) % 2 == 0]   # both v7x TCs busy
    multi = [tb for tb in cands if batch // tb >= 2]
    pool = even or multi or cands
    return max(pool)


# --------------------------------------------------------------------------
# Parameter construction (synthetic init mirroring the PyTorch module)
# --------------------------------------------------------------------------
def init_tcn_params(key, num_inputs, num_channels, kernel_size=2):
    assert kernel_size == 2, "TCN reference uses kernel_size=2"

    layers, raw, dilations = [], [], []
    for i, cout in enumerate(num_channels):
        cin = num_inputs if i == 0 else num_channels[i - 1]
        d = 2 ** i
        cin_pad = _round_up(cin, LANE)
        cout_pad = _round_up(cout, LANE)

        key, k1, k2, k3, k4, k5, k6 = jax.random.split(key, 7)
        w1 = 0.01 * jax.random.normal(k1, (cout, cin, 2), jnp.float32)
        w2 = 0.01 * jax.random.normal(k2, (cout, cout, 2), jnp.float32)
        b1 = 0.01 * jax.random.normal(k3, (cout,), jnp.float32)
        b2 = 0.01 * jax.random.normal(k4, (cout,), jnp.float32)

        def pack(w_t, rows, rows_pad, cols, cols_pad):
            p = jnp.zeros((rows_pad, cols_pad), jnp.float32)
            return p.at[:rows, :cols].set(w_t).astype(jnp.bfloat16)

        w1a = pack(w1[:, :, 0].T, cin, cin_pad, cout, cout_pad)     # past tap
        w1b = pack(w1[:, :, 1].T, cin, cin_pad, cout, cout_pad)     # current tap
        w2a = pack(w2[:, :, 0].T, cout, cout_pad, cout, cout_pad)
        w2b = pack(w2[:, :, 1].T, cout, cout_pad, cout, cout_pad)
        b1p = jnp.zeros((1, cout_pad), jnp.float32).at[0, :cout].set(b1)
        b2p = jnp.zeros((1, cout_pad), jnp.float32).at[0, :cout].set(b2)

        if cin != cout:
            wd = 0.01 * jax.random.normal(k5, (cout, cin), jnp.float32)
            bd = 0.01 * jax.random.normal(k6, (cout,), jnp.float32)
            wdp = pack(wd.T, cin, cin_pad, cout, cout_pad)
            bdp = jnp.zeros((1, cout_pad), jnp.float32).at[0, :cout].set(bd)
        else:
            wd = bd = wdp = bdp = None

        layers.append(dict(cin=cin, cout=cout, cin_pad=cin_pad, cout_pad=cout_pad,
                           dilation=d, w1a=w1a, w1b=w1b, b1=b1p,
                           w2a=w2a, w2b=w2b, b2=b2p, wd=wdp, bd=bdp))
        raw.append(dict(w1=w1, b1=b1, w2=w2, b2=b2, wd=wd, bd=bd))
        dilations.append(d)

    return dict(num_inputs=num_inputs, num_channels=tuple(num_channels),
                dilations=tuple(dilations), layers=layers, raw=raw)


# --------------------------------------------------------------------------
# Wrapper
# --------------------------------------------------------------------------
def temporal_conv_net(x_ncl, params):
    """x_ncl: (N, C_in, L) like the PyTorch module; returns (N, C_last, L)."""
    batch, cin, seq_len = x_ncl.shape
    assert cin == params["num_inputs"]
    c_out = params["num_channels"][-1]
    layers = params["layers"]
    cin_pad0 = layers[0]["cin_pad"]
    need_pad = (cin % LANE) != 0

    # (N, C, L) -> (N*L, C_in): unpadded; the lane zero-pad happens in-kernel.
    x = jnp.transpose(x_ncl, (0, 2, 1)).reshape(batch * seq_len, cin)

    # ---- generation-aware VMEM budget / block sizing ----
    try:
        vmem_cap = int(pltpu.get_tpu_info().vmem_capacity_bytes)
    except Exception:
        vmem_cap = 128 << 20
    vmem_budget = (vmem_cap * 4) // 5                 # headroom for Mosaic scratch
    max_block_bytes = (1 << 20) if vmem_cap <= (64 << 20) else (2 << 20)

    widest = max([cin_pad0] + [l["cout_pad"] for l in layers])
    tile_b = _pick_tile_b(batch, seq_len, widest, max_block_bytes)
    m = tile_b * seq_len
    grid = (batch // tile_b,)

    # ---- flatten per-layer weights (per-layer padded shapes differ) ----
    flat_w, layer_meta = [], []
    for lyr in layers:
        flat_w += [lyr["w1a"], lyr["w1b"], lyr["b1"],
                   lyr["w2a"], lyr["w2b"], lyr["b2"]]
        has_ds = lyr["wd"] is not None
        if has_ds:
            flat_w += [lyr["wd"], lyr["bd"]]
        layer_meta.append((lyr["dilation"], has_ds))

    kernel = functools.partial(_tcn_fused_kernel, seq_len=seq_len,
                               layer_meta=tuple(layer_meta), need_pad=need_pad)

    weight_bytes = sum(int(a.size) * a.dtype.itemsize for a in flat_w)
    vmem_limit = int(min(vmem_budget,
                         max(16 << 20, 2 * weight_bytes + 24 * m * widest * 4)))

    def build(weight_mode):
        def const_spec(arr):
            nd = arr.ndim
            idx = lambda i, _nd=nd: (0,) * _nd      # resident: DMA'd once
            if weight_mode is None:
                return pl.BlockSpec(arr.shape, idx)
            return pl.BlockSpec(arr.shape, idx, pipeline_mode=weight_mode)

        scratch = [pltpu.VMEM((m, cin_pad0), jnp.float32)] if need_pad else []
        return pl.pallas_call(
            kernel,
            out_shape=jax.ShapeDtypeStruct((batch * seq_len, c_out), jnp.float32),
            grid=grid,
            in_specs=[pl.BlockSpec((m, cin), lambda i: (i, 0))]
                     + [const_spec(a) for a in flat_w],
            out_specs=pl.BlockSpec((m, c_out), lambda i: (i, 0)),
            scratch_shapes=scratch,
            compiler_params=pltpu.CompilerParams(
                dimension_semantics=("parallel",),
                vmem_limit_bytes=vmem_limit,
            ),
        )

    try:
        # Single-buffer the resident weights (revisited every step -> the
        # default second pipeline buffer is pure VMEM waste).
        out = build(pl.Buffered(1))(x, *flat_w)
        out = jax.block_until_ready(out)
    except Exception:
        out = build(None)(x, *flat_w)

    out = out.reshape(batch, seq_len, c_out)
    return jnp.transpose(out, (0, 2, 1))


# --------------------------------------------------------------------------
# Pure-JAX reference built from the raw (unpacked) conv weights
# --------------------------------------------------------------------------
def _ref_tcn(x_ncl, params, emulate_bf16=True):
    def c(a):
        return a.astype(jnp.bfloat16).astype(jnp.float32) if emulate_bf16 else a

    x = jnp.transpose(x_ncl, (0, 2, 1))  # (B, L, C)
    seq_len = x.shape[1]
    for p, d in zip(params["raw"], params["dilations"]):
        def shift(v, _d=d):
            return jnp.pad(v, ((0, 0), (_d, 0), (0, 0)))[:, :seq_len, :]

        def causal(v, w, b):
            return (jnp.einsum("blc,oc->blo", c(shift(v)), c(w[:, :, 0]))
                    + jnp.einsum("blc,oc->blo", c(v), c(w[:, :, 1])) + b)

        h1 = jnp.maximum(causal(x, p["w1"], p["b1"]), 0.0)
        h2 = jnp.maximum(causal(h1, p["w2"], p["b2"]), 0.0)
        if p["wd"] is None:
            res = x
        else:
            res = jnp.einsum("blc,oc->blo", c(x), c(p["wd"])) + p["bd"]
        x = jnp.maximum(h2 + res, 0.0)
    return jnp.transpose(x, (0, 2, 1))


if __name__ == "__main__":
    # Small config consistent with the module's structure:
    # num_inputs=8, num_channels=[16, 16, 8], kernel_size=2, batch=2, seq=16.
    B, C_in, L = 2, 8, 16
    num_channels = [16, 16, 8]

    key = jax.random.PRNGKey(0)
    key, kx = jax.random.split(key)
    x = jax.random.normal(kx, (B, C_in, L), jnp.float32)   # PyTorch (N, C, L) input

    params = init_tcn_params(key, C_in, num_channels, kernel_size=2)

    out = jax.block_until_ready(temporal_conv_net(x, params))

    ref_bf16 = _ref_tcn(x, params, emulate_bf16=True)    # matches kernel arithmetic
    ref_f32 = _ref_tcn(x, params, emulate_bf16=False)    # original f32 semantics

    assert out.shape == (B, num_channels[-1], L), out.shape
    assert jnp.allclose(out, ref_bf16, atol=2e-3, rtol=2e-2), \
        float(jnp.max(jnp.abs(out - ref_bf16)))
    assert jnp.allclose(out, ref_f32, atol=2e-2, rtol=2e-1), \
        float(jnp.max(jnp.abs(out - ref_f32)))

    print("KERNEL_OK")
</pallas_src>

<mosaic_0001>
module attributes {stable_mosaic.version = 11 : i64} {
  func.func @_tcn_fused_kernel(%arg0: i32, %arg1: memref<16x8xf32, #tpu.memory_space<vmem>>, %arg2: memref<128x128xbf16, #tpu.memory_space<vmem>>, %arg3: memref<128x128xbf16, #tpu.memory_space<vmem>>, %arg4: memref<1x128xf32, #tpu.memory_space<vmem>>, %arg5: memref<128x128xbf16, #tpu.memory_space<vmem>>, %arg6: memref<128x128xbf16, #tpu.memory_space<vmem>>, %arg7: memref<1x128xf32, #tpu.memory_space<vmem>>, %arg8: memref<128x128xbf16, #tpu.memory_space<vmem>>, %arg9: memref<1x128xf32, #tpu.memory_space<vmem>>, %arg10: memref<128x128xbf16, #tpu.memory_space<vmem>>, %arg11: memref<128x128xbf16, #tpu.memory_space<vmem>>, %arg12: memref<1x128xf32, #tpu.memory_space<vmem>>, %arg13: memref<128x128xbf16, #tpu.memory_space<vmem>>, %arg14: memref<128x128xbf16, #tpu.memory_space<vmem>>, %arg15: memref<1x128xf32, #tpu.memory_space<vmem>>, %arg16: memref<128x128xbf16, #tpu.memory_space<vmem>>, %arg17: memref<128x128xbf16, #tpu.memory_space<vmem>>, %arg18: memref<1x128xf32, #tpu.memory_space<vmem>>, %arg19: memref<128x128xbf16, #tpu.memory_space<vmem>>, %arg20: memref<128x128xbf16, #tpu.memory_space<vmem>>, %arg21: memref<1x128xf32, #tpu.memory_space<vmem>>, %arg22: memref<128x128xbf16, #tpu.memory_space<vmem>>, %arg23: memref<1x128xf32, #tpu.memory_space<vmem>>, %arg24: memref<16x8xf32, #tpu.memory_space<vmem>>, %arg25: memref<16x128xf32, #tpu.memory_space<vmem>>) attributes {dimension_semantics = [#tpu.dimension_semantics<parallel>], iteration_bounds = array<i64: 2>, scalar_prefetch = 0 : i64, scratch_operands = 1 : i64, tpu.core_type = #tpu.core_type<tc>, window_params = [{transform_indices = @transform_0, window_bounds = array<i64: 16, 8>}, {pipeline_mode = #tpu.pipeline_mode<synchronous>, transform_indices = @transform_1, window_bounds = array<i64: 128, 128>}, {pipeline_mode = #tpu.pipeline_mode<synchronous>, transform_indices = @transform_2, window_bounds = array<i64: 128, 128>}, {pipeline_mode = #tpu.pipeline_mode<synchronous>, transform_indices = @transform_3, window_bounds = array<i64: 1, 128>}, {pipeline_mode = #tpu.pipeline_mode<synchronous>, transform_indices = @transform_4, window_bounds = array<i64: 128, 128>}, {pipeline_mode = #tpu.pipeline_mode<synchronous>, transform_indices = @transform_5, window_bounds = array<i64: 128, 128>}, {pipeline_mode = #tpu.pipeline_mode<synchronous>, transform_indices = @transform_6, window_bounds = array<i64: 1, 128>}, {pipeline_mode = #tpu.pipeline_mode<synchronous>, transform_indices = @transform_7, window_bounds = array<i64: 128, 128>}, {pipeline_mode = #tpu.pipeline_mode<synchronous>, transform_indices = @transform_8, window_bounds = array<i64: 1, 128>}, {pipeline_mode = #tpu.pipeline_mode<synchronous>, transform_indices = @transform_9, window_bounds = array<i64: 128, 128>}, {pipeline_mode = #tpu.pipeline_mode<synchronous>, transform_indices = @transform_10, window_bounds = array<i64: 128, 128>}, {pipeline_mode = #tpu.pipeline_mode<synchronous>, transform_indices = @transform_11, window_bounds = array<i64: 1, 128>}, {pipeline_mode = #tpu.pipeline_mode<synchronous>, transform_indices = @transform_12, window_bounds = array<i64: 128, 128>}, {pipeline_mode = #tpu.pipeline_mode<synchronous>, transform_indices = @transform_13, window_bounds = array<i64: 128, 128>}, {pipeline_mode = #tpu.pipeline_mode<synchronous>, transform_indices = @transform_14, window_bounds = array<i64: 1, 128>}, {pipeline_mode = #tpu.pipeline_mode<synchronous>, transform_indices = @transform_15, window_bounds = array<i64: 128, 128>}, {pipeline_mode = #tpu.pipeline_mode<synchronous>, transform_indices = @transform_16, window_bounds = array<i64: 128, 128>}, {pipeline_mode = #tpu.pipeline_mode<synchronous>, transform_indices = @transform_17, window_bounds = array<i64: 1, 128>}, {pipeline_mode = #tpu.pipeline_mode<synchronous>, transform_indices = @transform_18, window_bounds = array<i64: 128, 128>}, {pipeline_mode = #tpu.pipeline_mode<synchronous>, transform_indices = @transform_19, window_bounds = array<i64: 128, 128>}, {pipeline_mode = #tpu.pipeline_mode<synchronous>, transform_indices = @transform_20, window_bounds = array<i64: 1, 128>}, {pipeline_mode = #tpu.pipeline_mode<synchronous>, transform_indices = @transform_21, window_bounds = array<i64: 128, 128>}, {pipeline_mode = #tpu.pipeline_mode<synchronous>, transform_indices = @transform_22, window_bounds = array<i64: 1, 128>}, {transform_indices = @transform_23, window_bounds = array<i64: 16, 8>}]} {
    %cst = arith.constant 0.000000e+00 : f32
    %0 = vector.broadcast %cst : f32 to vector<16x128xf32>
    %c0 = arith.constant 0 : index
    %c0_0 = arith.constant 0 : index
    %1 = vector.load %arg25[%c0, %c0_0] : memref<16x128xf32, #tpu.memory_space<vmem>>, vector<16x128xf32>
    tpu.vector_store %arg25[%c0, %c0_0], %0 {strides = array<i32>} : memref<16x128xf32, #tpu.memory_space<vmem>>, vector<16x128xf32>,
    %c0_1 = arith.constant 0 : index
    %c0_2 = arith.constant 0 : index
    %2 = vector.load %arg1[%c0_1, %c0_2] : memref<16x8xf32, #tpu.memory_space<vmem>>, vector<16x8xf32>
    %c0_3 = arith.constant 0 : index
    %c0_4 = arith.constant 0 : index
    %3 = vector.load %arg25[%c0_3, %c0_4] : memref<16x128xf32, #tpu.memory_space<vmem>>, vector<16x8xf32>
    tpu.vector_store %arg25[%c0_3, %c0_4], %2 {strides = array<i32>} : memref<16x128xf32, #tpu.memory_space<vmem>>, vector<16x8xf32>,
    %c0_5 = arith.constant 0 : index
    %c0_6 = arith.constant 0 : index
    %4 = vector.load %arg25[%c0_5, %c0_6] : memref<16x128xf32, #tpu.memory_space<vmem>>, vector<16x128xf32>
    %5 = tpu.iota {dimensions = array<i32: 0>} : vector<16x1xi32>
    %c16_i32 = arith.constant 16 : i32
    %c0_i32 = arith.constant 0 : i32
    %6 = arith.cmpi eq, %c16_i32, %c0_i32 : i32
    %c1_i32 = arith.constant 1 : i32
    %7 = arith.select %6, %c1_i32, %c16_i32 : i32
    %8 = vector.broadcast %7 : i32 to vector<16x1xi32>
    %9 = arith.remsi %5, %8 : vector<16x1xi32>
    %c0_i32_7 = arith.constant 0 : i32
    %10 = vector.broadcast %c0_i32_7 : i32 to vector<16x1xi32>
    %11 = arith.cmpi ne, %9, %10 : vector<16x1xi32>
    %c0_i32_8 = arith.constant 0 : i32
    %12 = vector.broadcast %c0_i32_8 : i32 to vector<16x1xi32>
    %13 = arith.cmpi slt, %9, %12 : vector<16x1xi32>
    %c0_i32_9 = arith.constant 0 : i32
    %14 = arith.cmpi slt, %7, %c0_i32_9 : i32
    %15 = vector.broadcast %14 : i1 to vector<16x1xi1>
    %16 = vector.broadcast %15 : vector<16x1xi1> to vector<16x1xi1>
    %17 = arith.xori %13, %16 : vector<16x1xi1>
    %18 = arith.andi %17, %11 : vector<16x1xi1>
    %19 = vector.broadcast %7 : i32 to vector<16x1xi32>
    %20 = arith.addi %9, %19 : vector<16x1xi32>
    %21 = arith.select %18, %20, %9 : vector<16x1xi1>, vector<16x1xi32>
    %22 = arith.truncf %4 : vector<16x128xf32> to vector<16x128xbf16>
    %c1_i32_10 = arith.constant 1 : i32
    %23 = vector.broadcast %c1_i32_10 : i32 to vector<16x1xi32>
    %24 = arith.cmpi sge, %21, %23 : vector<16x1xi32>
    %25 = vector.shape_cast %24 : vector<16x1xi1> to vector<16x1xi1>
    %26 = vector.broadcast %25 : vector<16x1xi1> to vector<16x128xi1>
    %c0_11 = arith.constant 0 : index
    %c0_12 = arith.constant 0 : index
    %27 = vector.load %arg3[%c0_11, %c0_12] : memref<128x128xbf16, #tpu.memory_space<vmem>>, vector<128x128xbf16>
    %cst_13 = arith.constant dense<0.000000e+00> : vector<16x128xf32>
    %28 = tpu.matmul %22, %27, %cst_13 {dimension_numbers = #tpu.dot_dimension_numbers<[1], [0], [0], [1], [0, 0, 1, 1], [], []>} : vector<16x128xbf16>, vector<128x128xbf16>, vector<16x128xf32> -> vector<16x128xf32>
    %c1_i32_14 = arith.constant 1 : i32
    %29 = tpu.dynamic_rotate %4 by %c1_i32_14 dim 0 : vector<16x128xf32>, i32 -> vector<16x128xf32>
    %cst_15 = arith.constant 0.000000e+00 : f32
    %30 = vector.broadcast %cst_15 : f32 to vector<16x128xf32>
    %31 = arith.select %26, %29, %30 : vector<16x128xi1>, vector<16x128xf32>
    %32 = arith.truncf %31 : vector<16x128xf32> to vector<16x128xbf16>
    %c0_16 = arith.constant 0 : index
    %c0_17 = arith.constant 0 : index
    %33 = vector.load %arg2[%c0_16, %c0_17] : memref<128x128xbf16, #tpu.memory_space<vmem>>, vector<128x128xbf16>
    %cst_18 = arith.constant dense<0.000000e+00> : vector<16x128xf32>
    %34 = tpu.matmul %32, %33, %cst_18 {dimension_numbers = #tpu.dot_dimension_numbers<[1], [0], [0], [1], [0, 0, 1, 1], [], []>} : vector<16x128xbf16>, vector<128x128xbf16>, vector<16x128xf32> -> vector<16x128xf32>
    %35 = arith.addf %28, %34 : vector<16x128xf32>
    %c0_19 = arith.constant 0 : index
    %c0_20 = arith.constant 0 : index
    %36 = vector.load %arg4[%c0_19, %c0_20] : memref<1x128xf32, #tpu.memory_space<vmem>>, vector<1x128xf32>
    %37 = vector.broadcast %36 : vector<1x128xf32> to vector<16x128xf32>
    %38 = arith.addf %35, %37 : vector<16x128xf32>
    %cst_21 = arith.constant 0.000000e+00 : f32
    %39 = vector.broadcast %cst_21 : f32 to vector<16x128xf32>
    %40 = arith.maximumf %38, %39 : vector<16x128xf32>
    %41 = arith.truncf %40 : vector<16x128xf32> to vector<16x128xbf16>
    %c0_22 = arith.constant 0 : index
    %c0_23 = arith.constant 0 : index
    %42 = vector.load %arg6[%c0_22, %c0_23] : memref<128x128xbf16, #tpu.memory_space<vmem>>, vector<128x128xbf16>
    %cst_24 = arith.constant dense<0.000000e+00> : vector<16x128xf32>
    %43 = tpu.matmul %41, %42, %cst_24 {dimension_numbers = #tpu.dot_dimension_numbers<[1], [0], [0], [1], [0, 0, 1, 1], [], []>} : vector<16x128xbf16>, vector<128x128xbf16>, vector<16x128xf32> -> vector<16x128xf32>
    %c1_i32_25 = arith.constant 1 : i32
    %44 = tpu.dynamic_rotate %40 by %c1_i32_25 dim 0 : vector<16x128xf32>, i32 -> vector<16x128xf32>
    %cst_26 = arith.constant 0.000000e+00 : f32
    %45 = vector.broadcast %cst_26 : f32 to vector<16x128xf32>
    %46 = arith.select %26, %44, %45 : vector<16x128xi1>, vector<16x128xf32>
    %47 = arith.truncf %46 : vector<16x128xf32> to vector<16x128xbf16>
    %c0_27 = arith.constant 0 : index
    %c0_28 = arith.constant 0 : index
    %48 = vector.load %arg5[%c0_27, %c0_28] : memref<128x128xbf16, #tpu.memory_space<vmem>>, vector<128x128xbf16>
    %cst_29 = arith.constant dense<0.000000e+00> : vector<16x128xf32>
    %49 = tpu.matmul %47, %48, %cst_29 {dimension_numbers = #tpu.dot_dimension_numbers<[1], [0], [0], [1], [0, 0, 1, 1], [], []>} : vector<16x128xbf16>, vector<128x128xbf16>, vector<16x128xf32> -> vector<16x128xf32>
    %50 = arith.addf %43, %49 : vector<16x128xf32>
    %c0_30 = arith.constant 0 : index
    %c0_31 = arith.constant 0 : index
    %51 = vector.load %arg7[%c0_30, %c0_31] : memref<1x128xf32, #tpu.memory_space<vmem>>, vector<1x128xf32>
    %52 = vector.broadcast %51 : vector<1x128xf32> to vector<16x128xf32>
    %53 = arith.addf %50, %52 : vector<16x128xf32>
    %cst_32 = arith.constant 0.000000e+00 : f32
    %54 = vector.broadcast %cst_32 : f32 to vector<16x128xf32>
    %55 = arith.maximumf %53, %54 : vector<16x128xf32>
    %c0_33 = arith.constant 0 : index
    %c0_34 = arith.constant 0 : index
    %56 = vector.load %arg8[%c0_33, %c0_34] : memref<128x128xbf16, #tpu.memory_space<vmem>>, vector<128x128xbf16>
    %cst_35 = arith.constant dense<0.000000e+00> : vector<16x128xf32>
    %57 = tpu.matmul %22, %56, %cst_35 {dimension_numbers = #tpu.dot_dimension_numbers<[1], [0], [0], [1], [0, 0, 1, 1], [], []>} : vector<16x128xbf16>, vector<128x128xbf16>, vector<16x128xf32> -> vector<16x128xf32>
    %c0_36 = arith.constant 0 : index
    %c0_37 = arith.constant 0 : index
    %58 = vector.load %arg9[%c0_36, %c0_37] : memref<1x128xf32, #tpu.memory_space<vmem>>, vector<1x128xf32>
    %59 = vector.broadcast %58 : vector<1x128xf32> to vector<16x128xf32>
    %60 = arith.addf %57, %59 : vector<16x128xf32>
    %61 = arith.addf %55, %60 : vector<16x128xf32>
    %cst_38 = arith.constant 0.000000e+00 : f32
    %62 = vector.broadcast %cst_38 : f32 to vector<16x128xf32>
    %63 = arith.maximumf %61, %62 : vector<16x128xf32>
    %64 = arith.truncf %63 : vector<16x128xf32> to vector<16x128xbf16>
    %c2_i32 = arith.constant 2 : i32
    %65 = vector.broadcast %c2_i32 : i32 to vector<16x1xi32>
    %66 = arith.cmpi sge, %21, %65 : vector<16x1xi32>
    %67 = vector.shape_cast %66 : vector<16x1xi1> to vector<16x1xi1>
    %68 = vector.broadcast %67 : vector<16x1xi1> to vector<16x128xi1>
    %c0_39 = arith.constant 0 : index
    %c0_40 = arith.constant 0 : index
    %69 = vector.load %arg11[%c0_39, %c0_40] : memref<128x128xbf16, #tpu.memory_space<vmem>>, vector<128x128xbf16>
    %cst_41 = arith.constant dense<0.000000e+00> : vector<16x128xf32>
    %70 = tpu.matmul %64, %69, %cst_41 {dimension_numbers = #tpu.dot_dimension_numbers<[1], [0], [0], [1], [0, 0, 1, 1], [], []>} : vector<16x128xbf16>, vector<128x128xbf16>, vector<16x128xf32> -> vector<16x128xf32>
    %c2_i32_42 = arith.constant 2 : i32
    %71 = tpu.dynamic_rotate %63 by %c2_i32_42 dim 0 : vector<16x128xf32>, i32 -> vector<16x128xf32>
    %cst_43 = arith.constant 0.000000e+00 : f32
    %72 = vector.broadcast %cst_43 : f32 to vector<16x128xf32>
    %73 = arith.select %68, %71, %72 : vector<16x128xi1>, vector<16x128xf32>
    %74 = arith.truncf %73 : vector<16x128xf32> to vector<16x128xbf16>
    %c0_44 = arith.constant 0 : index
    %c0_45 = arith.constant 0 : index
    %75 = vector.load %arg10[%c0_44, %c0_45] : memref<128x128xbf16, #tpu.memory_space<vmem>>, vector<128x128xbf16>
    %cst_46 = arith.constant dense<0.000000e+00> : vector<16x128xf32>
    %76 = tpu.matmul %74, %75, %cst_46 {dimension_numbers = #tpu.dot_dimension_numbers<[1], [0], [0], [1], [0, 0, 1, 1], [], []>} : vector<16x128xbf16>, vector<128x128xbf16>, vector<16x128xf32> -> vector<16x128xf32>
    %77 = arith.addf %70, %76 : vector<16x128xf32>
    %c0_47 = arith.constant 0 : index
    %c0_48 = arith.constant 0 : index
    %78 = vector.load %arg12[%c0_47, %c0_48] : memref<1x128xf32, #tpu.memory_space<vmem>>, vector<1x128xf32>
    %79 = vector.broadcast %78 : vector<1x128xf32> to vector<16x128xf32>
    %80 = arith.addf %77, %79 : vector<16x128xf32>
    %cst_49 = arith.constant 0.000000e+00 : f32
    %81 = vector.broadcast %cst_49 : f32 to vector<16x128xf32>
    %82 = arith.maximumf %80, %81 : vector<16x128xf32>
    %83 = arith.truncf %82 : vector<16x128xf32> to vector<16x128xbf16>
    %c0_50 = arith.constant 0 : index
    %c0_51 = arith.constant 0 : index
    %84 = vector.load %arg14[%c0_50, %c0_51] : memref<128x128xbf16, #tpu.memory_space<vmem>>, vector<128x128xbf16>
    %cst_52 = arith.constant dense<0.000000e+00> : vector<16x128xf32>
    %85 = tpu.matmul %83, %84, %cst_52 {dimension_numbers = #tpu.dot_dimension_numbers<[1], [0], [0], [1], [0, 0, 1, 1], [], []>} : vector<16x128xbf16>, vector<128x128xbf16>, vector<16x128xf32> -> vector<16x128xf32>
    %c2_i32_53 = arith.constant 2 : i32
    %86 = tpu.dynamic_rotate %82 by %c2_i32_53 dim 0 : vector<16x128xf32>, i32 -> vector<16x128xf32>
    %cst_54 = arith.constant 0.000000e+00 : f32
    %87 = vector.broadcast %cst_54 : f32 to vector<16x128xf32>
    %88 = arith.select %68, %86, %87 : vector<16x128xi1>, vector<16x128xf32>
    %89 = arith.truncf %88 : vector<16x128xf32> to vector<16x128xbf16>
    %c0_55 = arith.constant 0 : index
    %c0_56 = arith.constant 0 : index
    %90 = vector.load %arg13[%c0_55, %c0_56] : memref<128x128xbf16, #tpu.memory_space<vmem>>, vector<128x128xbf16>
    %cst_57 = arith.constant dense<0.000000e+00> : vector<16x128xf32>
    %91 = tpu.matmul %89, %90, %cst_57 {dimension_numbers = #tpu.dot_dimension_numbers<[1], [0], [0], [1], [0, 0, 1, 1], [], []>} : vector<16x128xbf16>, vector<128x128xbf16>, vector<16x128xf32> -> vector<16x128xf32>
    %92 = arith.addf %85, %91 : vector<16x128xf32>
    %c0_58 = arith.constant 0 : index
    %c0_59 = arith.constant 0 : index
    %93 = vector.load %arg15[%c0_58, %c0_59] : memref<1x128xf32, #tpu.memory_space<vmem>>, vector<1x128xf32>
    %94 = vector.broadcast %93 : vector<1x128xf32> to vector<16x128xf32>
    %95 = arith.addf %92, %94 : vector<16x128xf32>
    %cst_60 = arith.constant 0.000000e+00 : f32
    %96 = vector.broadcast %cst_60 : f32 to vector<16x128xf32>
    %97 = arith.maximumf %95, %96 : vector<16x128xf32>
    %98 = arith.addf %97, %63 : vector<16x128xf32>
    %cst_61 = arith.constant 0.000000e+00 : f32
    %99 = vector.broadcast %cst_61 : f32 to vector<16x128xf32>
    %100 = arith.maximumf %98, %99 : vector<16x128xf32>
    %101 = arith.truncf %100 : vector<16x128xf32> to vector<16x128xbf16>
    %c4_i32 = arith.constant 4 : i32
    %102 = vector.broadcast %c4_i32 : i32 to vector<16x1xi32>
    %103 = arith.cmpi sge, %21, %102 : vector<16x1xi32>
    %104 = vector.shape_cast %103 : vector<16x1xi1> to vector<16x1xi1>
    %105 = vector.broadcast %104 : vector<16x1xi1> to vector<16x128xi1>
    %c0_62 = arith.constant 0 : index
    %c0_63 = arith.constant 0 : index
    %106 = vector.load %arg17[%c0_62, %c0_63] : memref<128x128xbf16, #tpu.memory_space<vmem>>, vector<128x128xbf16>
    %cst_64 = arith.constant dense<0.000000e+00> : vector<16x128xf32>
    %107 = tpu.matmul %101, %106, %cst_64 {dimension_numbers = #tpu.dot_dimension_numbers<[1], [0], [0], [1], [0, 0, 1, 1], [], []>} : vector<16x128xbf16>, vector<128x128xbf16>, vector<16x128xf32> -> vector<16x128xf32>
    %c4_i32_65 = arith.constant 4 : i32
    %108 = tpu.dynamic_rotate %100 by %c4_i32_65 dim 0 : vector<16x128xf32>, i32 -> vector<16x128xf32>
    %cst_66 = arith.constant 0.000000e+00 : f32
    %109 = vector.broadcast %cst_66 : f32 to vector<16x128xf32>
    %110 = arith.select %105, %108, %109 : vector<16x128xi1>, vector<16x128xf32>
    %111 = arith.truncf %110 : vector<16x128xf32> to vector<16x128xbf16>
    %c0_67 = arith.constant 0 : index
    %c0_68 = arith.constant 0 : index
    %112 = vector.load %arg16[%c0_67, %c0_68] : memref<128x128xbf16, #tpu.memory_space<vmem>>, vector<128x128xbf16>
    %cst_69 = arith.constant dense<0.000000e+00> : vector<16x128xf32>
    %113 = tpu.matmul %111, %112, %cst_69 {dimension_numbers = #tpu.dot_dimension_numbers<[1], [0], [0], [1], [0, 0, 1, 1], [], []>} : vector<16x128xbf16>, vector<128x128xbf16>, vector<16x128xf32> -> vector<16x128xf32>
    %114 = arith.addf %107, %113 : vector<16x128xf32>
    %c0_70 = arith.constant 0 : index
    %c0_71 = arith.constant 0 : index
    %115 = vector.load %arg18[%c0_70, %c0_71] : memref<1x128xf32, #tpu.memory_space<vmem>>, vector<1x128xf32>
    %116 = vector.broadcast %115 : vector<1x128xf32> to vector<16x128xf32>
    %117 = arith.addf %114, %116 : vector<16x128xf32>
    %cst_72 = arith.constant 0.000000e+00 : f32
    %118 = vector.broadcast %cst_72 : f32 to vector<16x128xf32>
    %119 = arith.maximumf %117, %118 : vector<16x128xf32>
    %120 = arith.truncf %119 : vector<16x128xf32> to vector<16x128xbf16>
    %c0_73 = arith.constant 0 : index
    %c0_74 = arith.constant 0 : index
    %121 = vector.load %arg20[%c0_73, %c0_74] : memref<128x128xbf16, #tpu.memory_space<vmem>>, vector<128x128xbf16>
    %cst_75 = arith.constant dense<0.000000e+00> : vector<16x128xf32>
    %122 = tpu.matmul %120, %121, %cst_75 {dimension_numbers = #tpu.dot_dimension_numbers<[1], [0], [0], [1], [0, 0, 1, 1], [], []>} : vector<16x128xbf16>, vector<128x128xbf16>, vector<16x128xf32> -> vector<16x128xf32>
    %c4_i32_76 = arith.constant 4 : i32
    %123 = tpu.dynamic_rotate %119 by %c4_i32_76 dim 0 : vector<16x128xf32>, i32 -> vector<16x128xf32>
    %cst_77 = arith.constant 0.000000e+00 : f32
    %124 = vector.broadcast %cst_77 : f32 to vector<16x128xf32>
    %125 = arith.select %105, %123, %124 : vector<16x128xi1>, vector<16x128xf32>
    %126 = arith.truncf %125 : vector<16x128xf32> to vector<16x128xbf16>
    %c0_78 = arith.constant 0 : index
    %c0_79 = arith.constant 0 : index
    %127 = vector.load %arg19[%c0_78, %c0_79] : memref<128x128xbf16, #tpu.memory_space<vmem>>, vector<128x128xbf16>
    %cst_80 = arith.constant dense<0.000000e+00> : vector<16x128xf32>
    %128 = tpu.matmul %126, %127, %cst_80 {dimension_numbers = #tpu.dot_dimension_numbers<[1], [0], [0], [1], [0, 0, 1, 1], [], []>} : vector<16x128xbf16>, vector<128x128xbf16>, vector<16x128xf32> -> vector<16x128xf32>
    %129 = arith.addf %122, %128 : vector<16x128xf32>
    %c0_81 = arith.constant 0 : index
    %c0_82 = arith.constant 0 : index
    %130 = vector.load %arg21[%c0_81, %c0_82] : memref<1x128xf32, #tpu.memory_space<vmem>>, vector<1x128xf32>
    %131 = vector.broadcast %130 : vector<1x128xf32> to vector<16x128xf32>
    %132 = arith.addf %129, %131 : vector<16x128xf32>
    %cst_83 = arith.constant 0.000000e+00 : f32
    %133 = vector.broadcast %cst_83 : f32 to vector<16x128xf32>
    %134 = arith.maximumf %132, %133 : vector<16x128xf32>
    %c0_84 = arith.constant 0 : index
    %c0_85 = arith.constant 0 : index
    %135 = vector.load %arg22[%c0_84, %c0_85] : memref<128x128xbf16, #tpu.memory_space<vmem>>, vector<128x128xbf16>
    %cst_86 = arith.constant dense<0.000000e+00> : vector<16x128xf32>
    %136 = tpu.matmul %101, %135, %cst_86 {dimension_numbers = #tpu.dot_dimension_numbers<[1], [0], [0], [1], [0, 0, 1, 1], [], []>} : vector<16x128xbf16>, vector<128x128xbf16>, vector<16x128xf32> -> vector<16x128xf32>
    %c0_87 = arith.constant 0 : index
    %c0_88 = arith.constant 0 : index
    %137 = vector.load %arg23[%c0_87, %c0_88] : memref<1x128xf32, #tpu.memory_space<vmem>>, vector<1x128xf32>
    %138 = vector.broadcast %137 : vector<1x128xf32> to vector<16x128xf32>
    %139 = arith.addf %136, %138 : vector<16x128xf32>
    %140 = arith.addf %134, %139 : vector<16x128xf32>
    %cst_89 = arith.constant 0.000000e+00 : f32
    %141 = vector.broadcast %cst_89 : f32 to vector<16x128xf32>
    %142 = arith.maximumf %140, %141 : vector<16x128xf32>
    %143 = vector.extract_strided_slice %142 {offsets = [0, 0], sizes = [16, 8], strides = [1, 1]} : vector<16x128xf32> to vector<16x8xf32>
    %c0_90 = arith.constant 0 : index
    %c0_91 = arith.constant 0 : index
    %144 = vector.load %arg24[%c0_90, %c0_91] : memref<16x8xf32, #tpu.memory_space<vmem>>, vector<16x8xf32>
    tpu.vector_store %arg24[%c0_90, %c0_91], %143 {strides = array<i32>} : memref<16x8xf32, #tpu.memory_space<vmem>>, vector<16x8xf32>,
    return
  }
  func.func @transform_0(%arg0: i32) -> (i32, i32) {
    %c0_i32 = arith.constant 0 : i32
    %c0_i32_0 = arith.constant 0 : i32
    return %arg0, %c0_i32 : i32, i32
  }
  func.func @transform_1(%arg0: i32) -> (i32, i32) {
    %c0_i32 = arith.constant 0 : i32
    %c0_i32_0 = arith.constant 0 : i32
    %c0_i32_1 = arith.constant 0 : i32
    return %c0_i32, %c0_i32_0 : i32, i32
  }
  func.func @transform_2(%arg0: i32) -> (i32, i32) {
    %c0_i32 = arith.constant 0 : i32
    %c0_i32_0 = arith.constant 0 : i32
    %c0_i32_1 = arith.constant 0 : i32
    return %c0_i32, %c0_i32_0 : i32, i32
  }
  func.func @transform_3(%arg0: i32) -> (i32, i32) {
    %c0_i32 = arith.constant 0 : i32
    %c0_i32_0 = arith.constant 0 : i32
    %c0_i32_1 = arith.constant 0 : i32
    return %c0_i32, %c0_i32_0 : i32, i32
  }
  func.func @transform_4(%arg0: i32) -> (i32, i32) {
    %c0_i32 = arith.constant 0 : i32
    %c0_i32_0 = arith.constant 0 : i32
    %c0_i32_1 = arith.constant 0 : i32
    return %c0_i32, %c0_i32_0 : i32, i32
  }
  func.func @transform_5(%arg0: i32) -> (i32, i32) {
    %c0_i32 = arith.constant 0 : i32
    %c0_i32_0 = arith.constant 0 : i32
    %c0_i32_1 = arith.constant 0 : i32
    return %c0_i32, %c0_i32_0 : i32, i32
  }
  func.func @transform_6(%arg0: i32) -> (i32, i32) {
    %c0_i32 = arith.constant 0 : i32
    %c0_i32_0 = arith.constant 0 : i32
    %c0_i32_1 = arith.constant 0 : i32
    return %c0_i32, %c0_i32_0 : i32, i32
  }
  func.func @transform_7(%arg0: i32) -> (i32, i32) {
    %c0_i32 = arith.constant 0 : i32
    %c0_i32_0 = arith.constant 0 : i32
    %c0_i32_1 = arith.constant 0 : i32
    return %c0_i32, %c0_i32_0 : i32, i32
  }
  func.func @transform_8(%arg0: i32) -> (i32, i32) {
    %c0_i32 = arith.constant 0 : i32
    %c0_i32_0 = arith.constant 0 : i32
    %c0_i32_1 = arith.constant 0 : i32
    return %c0_i32, %c0_i32_0 : i32, i32
  }
  func.func @transform_9(%arg0: i32) -> (i32, i32) {
    %c0_i32 = arith.constant 0 : i32
    %c0_i32_0 = arith.constant 0 : i32
    %c0_i32_1 = arith.constant 0 : i32
    return %c0_i32, %c0_i32_0 : i32, i32
  }
  func.func @transform_10(%arg0: i32) -> (i32, i32) {
    %c0_i32 = arith.constant 0 : i32
    %c0_i32_0 = arith.constant 0 : i32
    %c0_i32_1 = arith.constant 0 : i32
    return %c0_i32, %c0_i32_0 : i32, i32
  }
  func.func @transform_11(%arg0: i32) -> (i32, i32) {
    %c0_i32 = arith.constant 0 : i32
    %c0_i32_0 = arith.constant 0 : i32
    %c0_i32_1 = arith.constant 0 : i32
    return %c0_i32, %c0_i32_0 : i32, i32
  }
  func.func @transform_12(%arg0: i32) -> (i32, i32) {
    %c0_i32 = arith.constant 0 : i32
    %c0_i32_0 = arith.constant 0 : i32
    %c0_i32_1 = arith.constant 0 : i32
    return %c0_i32, %c0_i32_0 : i32, i32
  }
  func.func @transform_13(%arg0: i32) -> (i32, i32) {
    %c0_i32 = arith.constant 0 : i32
    %c0_i32_0 = arith.constant 0 : i32
    %c0_i32_1 = arith.constant 0 : i32
    return %c0_i32, %c0_i32_0 : i32, i32
  }
  func.func @transform_14(%arg0: i32) -> (i32, i32) {
    %c0_i32 = arith.constant 0 : i32
    %c0_i32_0 = arith.constant 0 : i32
    %c0_i32_1 = arith.constant 0 : i32
    return %c0_i32, %c0_i32_0 : i32, i32
  }
  func.func @transform_15(%arg0: i32) -> (i32, i32) {
    %c0_i32 = arith.constant 0 : i32
    %c0_i32_0 = arith.constant 0 : i32
    %c0_i32_1 = arith.constant 0 : i32
    return %c0_i32, %c0_i32_0 : i32, i32
  }
  func.func @transform_16(%arg0: i32) -> (i32, i32) {
    %c0_i32 = arith.constant 0 : i32
    %c0_i32_0 = arith.constant 0 : i32
    %c0_i32_1 = arith.constant 0 : i32
    return %c0_i32, %c0_i32_0 : i32, i32
  }
  func.func @transform_17(%arg0: i32) -> (i32, i32) {
    %c0_i32 = arith.constant 0 : i32
    %c0_i32_0 = arith.constant 0 : i32
    %c0_i32_1 = arith.constant 0 : i32
    return %c0_i32, %c0_i32_0 : i32, i32
  }
  func.func @transform_18(%arg0: i32) -> (i32, i32) {
    %c0_i32 = arith.constant 0 : i32
    %c0_i32_0 = arith.constant 0 : i32
    %c0_i32_1 = arith.constant 0 : i32
    return %c0_i32, %c0_i32_0 : i32, i32
  }
  func.func @transform_19(%arg0: i32) -> (i32, i32) {
    %c0_i32 = arith.constant 0 : i32
    %c0_i32_0 = arith.constant 0 : i32
    %c0_i32_1 = arith.constant 0 : i32
    return %c0_i32, %c0_i32_0 : i32, i32
  }
  func.func @transform_20(%arg0: i32) -> (i32, i32) {
    %c0_i32 = arith.constant 0 : i32
    %c0_i32_0 = arith.constant 0 : i32
    %c0_i32_1 = arith.constant 0 : i32
    return %c0_i32, %c0_i32_0 : i32, i32
  }
  func.func @transform_21(%arg0: i32) -> (i32, i32) {
    %c0_i32 = arith.constant 0 : i32
    %c0_i32_0 = arith.constant 0 : i32
    %c0_i32_1 = arith.constant 0 : i32
    return %c0_i32, %c0_i32_0 : i32, i32
  }
  func.func @transform_22(%arg0: i32) -> (i32, i32) {
    %c0_i32 = arith.constant 0 : i32
    %c0_i32_0 = arith.constant 0 : i32
    %c0_i32_1 = arith.constant 0 : i32
    return %c0_i32, %c0_i32_0 : i32, i32
  }
  func.func @transform_23(%arg0: i32) -> (i32, i32) {
    %c0_i32 = arith.constant 0 : i32
    %c0_i32_0 = arith.constant 0 : i32
    return %arg0, %c0_i32 : i32, i32
  }
}

module attributes {stable_mosaic.version = 11 : i64} {
  func.func @_tcn_fused_kernel(%arg0: i32, %arg1: memref<16x8xf32, #tpu.memory_space<vmem>>, %arg2: memref<128x128xbf16, #tpu.memory_space<vmem>>, %arg3: memref<128x128xbf16, #tpu.memory_space<vmem>>, %arg4: memref<1x128xf32, #tpu.memory_space<vmem>>, %arg5: memref<128x128xbf16, #tpu.memory_space<vmem>>, %arg6: memref<128x128xbf16, #tpu.memory_space<vmem>>, %arg7: memref<1x128xf32, #tpu.memory_space<vmem>>, %arg8: memref<128x128xbf16, #tpu.memory_space<vmem>>, %arg9: memref<1x128xf32, #tpu.memory_space<vmem>>, %arg10: memref<128x128xbf16, #tpu.memory_space<vmem>>, %arg11: memref<128x128xbf16, #tpu.memory_space<vmem>>, %arg12: memref<1x128xf32, #tpu.memory_space<vmem>>, %arg13: memref<128x128xbf16, #tpu.memory_space<vmem>>, %arg14: memref<128x128xbf16, #tpu.memory_space<vmem>>, %arg15: memref<1x128xf32, #tpu.memory_space<vmem>>, %arg16: memref<128x128xbf16, #tpu.memory_space<vmem>>, %arg17: memref<128x128xbf16, #tpu.memory_space<vmem>>, %arg18: memref<1x128xf32, #tpu.memory_space<vmem>>, %arg19: memref<128x128xbf16, #tpu.memory_space<vmem>>, %arg20: memref<128x128xbf16, #tpu.memory_space<vmem>>, %arg21: memref<1x128xf32, #tpu.memory_space<vmem>>, %arg22: memref<128x128xbf16, #tpu.memory_space<vmem>>, %arg23: memref<1x128xf32, #tpu.memory_space<vmem>>, %arg24: memref<16x8xf32, #tpu.memory_space<vmem>>, %arg25: memref<16x128xf32, #tpu.memory_space<vmem>>) attributes {dimension_semantics = [#tpu.dimension_semantics<parallel>], iteration_bounds = array<i64: 2>, scalar_prefetch = 0 : i64, scratch_operands = 1 : i64, tpu.core_type = #tpu.core_type<tc>, window_params = [{transform_indices = @transform_0, window_bounds = array<i64: 16, 8>}, {pipeline_mode = #tpu.pipeline_mode<synchronous>, transform_indices = @transform_1, window_bounds = array<i64: 128, 128>}, {pipeline_mode = #tpu.pipeline_mode<synchronous>, transform_indices = @transform_2, window_bounds = array<i64: 128, 128>}, {pipeline_mode = #tpu.pipeline_mode<synchronous>, transform_indices = @transform_3, window_bounds = array<i64: 1, 128>}, {pipeline_mode = #tpu.pipeline_mode<synchronous>, transform_indices = @transform_4, window_bounds = array<i64: 128, 128>}, {pipeline_mode = #tpu.pipeline_mode<synchronous>, transform_indices = @transform_5, window_bounds = array<i64: 128, 128>}, {pipeline_mode = #tpu.pipeline_mode<synchronous>, transform_indices = @transform_6, window_bounds = array<i64: 1, 128>}, {pipeline_mode = #tpu.pipeline_mode<synchronous>, transform_indices = @transform_7, window_bounds = array<i64: 128, 128>}, {pipeline_mode = #tpu.pipeline_mode<synchronous>, transform_indices = @transform_8, window_bounds = array<i64: 1, 128>}, {pipeline_mode = #tpu.pipeline_mode<synchronous>, transform_indices = @transform_9, window_bounds = array<i64: 128, 128>}, {pipeline_mode = #tpu.pipeline_mode<synchronous>, transform_indices = @transform_10, window_bounds = array<i64: 128, 128>}, {pipeline_mode = #tpu.pipeline_mode<synchronous>, transform_indices = @transform_11, window_bounds = array<i64: 1, 128>}, {pipeline_mode = #tpu.pipeline_mode<synchronous>, transform_indices = @transform_12, window_bounds = array<i64: 128, 128>}, {pipeline_mode = #tpu.pipeline_mode<synchronous>, transform_indices = @transform_13, window_bounds = array<i64: 128, 128>}, {pipeline_mode = #tpu.pipeline_mode<synchronous>, transform_indices = @transform_14, window_bounds = array<i64: 1, 128>}, {pipeline_mode = #tpu.pipeline_mode<synchronous>, transform_indices = @transform_15, window_bounds = array<i64: 128, 128>}, {pipeline_mode = #tpu.pipeline_mode<synchronous>, transform_indices = @transform_16, window_bounds = array<i64: 128, 128>}, {pipeline_mode = #tpu.pipeline_mode<synchronous>, transform_indices = @transform_17, window_bounds = array<i64: 1, 128>}, {pipeline_mode = #tpu.pipeline_mode<synchronous>, transform_indices = @transform_18, window_bounds = array<i64: 128, 128>}, {pipeline_mode = #tpu.pipeline_mode<synchronous>, transform_indices = @transform_19, window_bounds = array<i64: 128, 128>}, {pipeline_mode = #tpu.pipeline_mode<synchronous>, transform_indices = @transform_20, window_bounds = array<i64: 1, 128>}, {pipeline_mode = #tpu.pipeline_mode<synchronous>, transform_indices = @transform_21, window_bounds = array<i64: 128, 128>}, {pipeline_mode = #tpu.pipeline_mode<synchronous>, transform_indices = @transform_22, window_bounds = array<i64: 1, 128>}, {transform_indices = @transform_23, window_bounds = array<i64: 16, 8>}]} {
    %cst = arith.constant 0.000000e+00 : f32
    %0 = vector.broadcast %cst : f32 to vector<16x128xf32>
    %c0 = arith.constant 0 : index
    %c0_0 = arith.constant 0 : index
    %1 = vector.load %arg25[%c0, %c0_0] : memref<16x128xf32, #tpu.memory_space<vmem>>, vector<16x128xf32>
    tpu.vector_store %arg25[%c0, %c0_0], %0 {strides = array<i32>} : memref<16x128xf32, #tpu.memory_space<vmem>>, vector<16x128xf32>,
    %c0_1 = arith.constant 0 : index
    %c0_2 = arith.constant 0 : index
    %2 = vector.load %arg1[%c0_1, %c0_2] : memref<16x8xf32, #tpu.memory_space<vmem>>, vector<16x8xf32>
    %c0_3 = arith.constant 0 : index
    %c0_4 = arith.constant 0 : index
    %3 = vector.load %arg25[%c0_3, %c0_4] : memref<16x128xf32, #tpu.memory_space<vmem>>, vector<16x8xf32>
    tpu.vector_store %arg25[%c0_3, %c0_4], %2 {strides = array<i32>} : memref<16x128xf32, #tpu.memory_space<vmem>>, vector<16x8xf32>,
    %c0_5 = arith.constant 0 : index
    %c0_6 = arith.constant 0 : index
    %4 = vector.load %arg25[%c0_5, %c0_6] : memref<16x128xf32, #tpu.memory_space<vmem>>, vector<16x128xf32>
    %5 = tpu.iota {dimensions = array<i32: 0>} : vector<16x1xi32>
    %c16_i32 = arith.constant 16 : i32
    %c0_i32 = arith.constant 0 : i32
    %6 = arith.cmpi eq, %c16_i32, %c0_i32 : i32
    %c1_i32 = arith.constant 1 : i32
    %7 = arith.select %6, %c1_i32, %c16_i32 : i32
    %8 = vector.broadcast %7 : i32 to vector<16x1xi32>
    %9 = arith.remsi %5, %8 : vector<16x1xi32>
    %c0_i32_7 = arith.constant 0 : i32
    %10 = vector.broadcast %c0_i32_7 : i32 to vector<16x1xi32>
    %11 = arith.cmpi ne, %9, %10 : vector<16x1xi32>
    %c0_i32_8 = arith.constant 0 : i32
    %12 = vector.broadcast %c0_i32_8 : i32 to vector<16x1xi32>
    %13 = arith.cmpi slt, %9, %12 : vector<16x1xi32>
    %c0_i32_9 = arith.constant 0 : i32
    %14 = arith.cmpi slt, %7, %c0_i32_9 : i32
    %15 = vector.broadcast %14 : i1 to vector<16x1xi1>
    %16 = vector.broadcast %15 : vector<16x1xi1> to vector<16x1xi1>
    %17 = arith.xori %13, %16 : vector<16x1xi1>
    %18 = arith.andi %17, %11 : vector<16x1xi1>
    %19 = vector.broadcast %7 : i32 to vector<16x1xi32>
    %20 = arith.addi %9, %19 : vector<16x1xi32>
    %21 = arith.select %18, %20, %9 : vector<16x1xi1>, vector<16x1xi32>
    %22 = arith.truncf %4 : vector<16x128xf32> to vector<16x128xbf16>
    %c1_i32_10 = arith.constant 1 : i32
    %23 = vector.broadcast %c1_i32_10 : i32 to vector<16x1xi32>
    %24 = arith.cmpi sge, %21, %23 : vector<16x1xi32>
    %25 = vector.shape_cast %24 : vector<16x1xi1> to vector<16x1xi1>
    %26 = vector.broadcast %25 : vector<16x1xi1> to vector<16x128xi1>
    %c0_11 = arith.constant 0 : index
    %c0_12 = arith.constant 0 : index
    %27 = vector.load %arg3[%c0_11, %c0_12] : memref<128x128xbf16, #tpu.memory_space<vmem>>, vector<128x128xbf16>
    %cst_13 = arith.constant dense<0.000000e+00> : vector<16x128xf32>
    %28 = tpu.matmul %22, %27, %cst_13 {dimension_numbers = #tpu.dot_dimension_numbers<[1], [0], [0], [1], [0, 0, 1, 1], [], []>} : vector<16x128xbf16>, vector<128x128xbf16>, vector<16x128xf32> -> vector<16x128xf32>
    %c1_i32_14 = arith.constant 1 : i32
    %29 = tpu.dynamic_rotate %4 by %c1_i32_14 dim 0 : vector<16x128xf32>, i32 -> vector<16x128xf32>
    %cst_15 = arith.constant 0.000000e+00 : f32
    %30 = vector.broadcast %cst_15 : f32 to vector<16x128xf32>
    %31 = arith.select %26, %29, %30 : vector<16x128xi1>, vector<16x128xf32>
    %32 = arith.truncf %31 : vector<16x128xf32> to vector<16x128xbf16>
    %c0_16 = arith.constant 0 : index
    %c0_17 = arith.constant 0 : index
    %33 = vector.load %arg2[%c0_16, %c0_17] : memref<128x128xbf16, #tpu.memory_space<vmem>>, vector<128x128xbf16>
    %cst_18 = arith.constant dense<0.000000e+00> : vector<16x128xf32>
    %34 = tpu.matmul %32, %33, %cst_18 {dimension_numbers = #tpu.dot_dimension_numbers<[1], [0], [0], [1], [0, 0, 1, 1], [], []>} : vector<16x128xbf16>, vector<128x128xbf16>, vector<16x128xf32> -> vector<16x128xf32>
    %35 = arith.addf %28, %34 : vector<16x128xf32>
    %c0_19 = arith.constant 0 : index
    %c0_20 = arith.constant 0 : index
    %36 = vector.load %arg4[%c0_19, %c0_20] : memref<1x128xf32, #tpu.memory_space<vmem>>, vector<1x128xf32>
    %37 = vector.broadcast %36 : vector<1x128xf32> to vector<16x128xf32>
    %38 = arith.addf %35, %37 : vector<16x128xf32>
    %cst_21 = arith.constant 0.000000e+00 : f32
    %39 = vector.broadcast %cst_21 : f32 to vector<16x128xf32>
    %40 = arith.maximumf %38, %39 : vector<16x128xf32>
    %41 = arith.truncf %40 : vector<16x128xf32> to vector<16x128xbf16>
    %c0_22 = arith.constant 0 : index
    %c0_23 = arith.constant 0 : index
    %42 = vector.load %arg6[%c0_22, %c0_23] : memref<128x128xbf16, #tpu.memory_space<vmem>>, vector<128x128xbf16>
    %cst_24 = arith.constant dense<0.000000e+00> : vector<16x128xf32>
    %43 = tpu.matmul %41, %42, %cst_24 {dimension_numbers = #tpu.dot_dimension_numbers<[1], [0], [0], [1], [0, 0, 1, 1], [], []>} : vector<16x128xbf16>, vector<128x128xbf16>, vector<16x128xf32> -> vector<16x128xf32>
    %c1_i32_25 = arith.constant 1 : i32
    %44 = tpu.dynamic_rotate %40 by %c1_i32_25 dim 0 : vector<16x128xf32>, i32 -> vector<16x128xf32>
    %cst_26 = arith.constant 0.000000e+00 : f32
    %45 = vector.broadcast %cst_26 : f32 to vector<16x128xf32>
    %46 = arith.select %26, %44, %45 : vector<16x128xi1>, vector<16x128xf32>
    %47 = arith.truncf %46 : vector<16x128xf32> to vector<16x128xbf16>
    %c0_27 = arith.constant 0 : index
    %c0_28 = arith.constant 0 : index
    %48 = vector.load %arg5[%c0_27, %c0_28] : memref<128x128xbf16, #tpu.memory_space<vmem>>, vector<128x128xbf16>
    %cst_29 = arith.constant dense<0.000000e+00> : vector<16x128xf32>
    %49 = tpu.matmul %47, %48, %cst_29 {dimension_numbers = #tpu.dot_dimension_numbers<[1], [0], [0], [1], [0, 0, 1, 1], [], []>} : vector<16x128xbf16>, vector<128x128xbf16>, vector<16x128xf32> -> vector<16x128xf32>
    %50 = arith.addf %43, %49 : vector<16x128xf32>
    %c0_30 = arith.constant 0 : index
    %c0_31 = arith.constant 0 : index
    %51 = vector.load %arg7[%c0_30, %c0_31] : memref<1x128xf32, #tpu.memory_space<vmem>>, vector<1x128xf32>
    %52 = vector.broadcast %51 : vector<1x128xf32> to vector<16x128xf32>
    %53 = arith.addf %50, %52 : vector<16x128xf32>
    %cst_32 = arith.constant 0.000000e+00 : f32
    %54 = vector.broadcast %cst_32 : f32 to vector<16x128xf32>
    %55 = arith.maximumf %53, %54 : vector<16x128xf32>
    %c0_33 = arith.constant 0 : index
    %c0_34 = arith.constant 0 : index
    %56 = vector.load %arg8[%c0_33, %c0_34] : memref<128x128xbf16, #tpu.memory_space<vmem>>, vector<128x128xbf16>
    %cst_35 = arith.constant dense<0.000000e+00> : vector<16x128xf32>
    %57 = tpu.matmul %22, %56, %cst_35 {dimension_numbers = #tpu.dot_dimension_numbers<[1], [0], [0], [1], [0, 0, 1, 1], [], []>} : vector<16x128xbf16>, vector<128x128xbf16>, vector<16x128xf32> -> vector<16x128xf32>
    %c0_36 = arith.constant 0 : index
    %c0_37 = arith.constant 0 : index
    %58 = vector.load %arg9[%c0_36, %c0_37] : memref<1x128xf32, #tpu.memory_space<vmem>>, vector<1x128xf32>
    %59 = vector.broadcast %58 : vector<1x128xf32> to vector<16x128xf32>
    %60 = arith.addf %57, %59 : vector<16x128xf32>
    %61 = arith.addf %55, %60 : vector<16x128xf32>
    %cst_38 = arith.constant 0.000000e+00 : f32
    %62 = vector.broadcast %cst_38 : f32 to vector<16x128xf32>
    %63 = arith.maximumf %61, %62 : vector<16x128xf32>
    %64 = arith.truncf %63 : vector<16x128xf32> to vector<16x128xbf16>
    %c2_i32 = arith.constant 2 : i32
    %65 = vector.broadcast %c2_i32 : i32 to vector<16x1xi32>
    %66 = arith.cmpi sge, %21, %65 : vector<16x1xi32>
    %67 = vector.shape_cast %66 : vector<16x1xi1> to vector<16x1xi1>
    %68 = vector.broadcast %67 : vector<16x1xi1> to vector<16x128xi1>
    %c0_39 = arith.constant 0 : index
    %c0_40 = arith.constant 0 : index
    %69 = vector.load %arg11[%c0_39, %c0_40] : memref<128x128xbf16, #tpu.memory_space<vmem>>, vector<128x128xbf16>
    %cst_41 = arith.constant dense<0.000000e+00> : vector<16x128xf32>
    %70 = tpu.matmul %64, %69, %cst_41 {dimension_numbers = #tpu.dot_dimension_numbers<[1], [0], [0], [1], [0, 0, 1, 1], [], []>} : vector<16x128xbf16>, vector<128x128xbf16>, vector<16x128xf32> -> vector<16x128xf32>
    %c2_i32_42 = arith.constant 2 : i32
    %71 = tpu.dynamic_rotate %63 by %c2_i32_42 dim 0 : vector<16x128xf32>, i32 -> vector<16x128xf32>
    %cst_43 = arith.constant 0.000000e+00 : f32
    %72 = vector.broadcast %cst_43 : f32 to vector<16x128xf32>
    %73 = arith.select %68, %71, %72 : vector<16x128xi1>, vector<16x128xf32>
    %74 = arith.truncf %73 : vector<16x128xf32> to vector<16x128xbf16>
    %c0_44 = arith.constant 0 : index
    %c0_45 = arith.constant 0 : index
    %75 = vector.load %arg10[%c0_44, %c0_45] : memref<128x128xbf16, #tpu.memory_space<vmem>>, vector<128x128xbf16>
    %cst_46 = arith.constant dense<0.000000e+00> : vector<16x128xf32>
    %76 = tpu.matmul %74, %75, %cst_46 {dimension_numbers = #tpu.dot_dimension_numbers<[1], [0], [0], [1], [0, 0, 1, 1], [], []>} : vector<16x128xbf16>, vector<128x128xbf16>, vector<16x128xf32> -> vector<16x128xf32>
    %77 = arith.addf %70, %76 : vector<16x128xf32>
    %c0_47 = arith.constant 0 : index
    %c0_48 = arith.constant 0 : index
    %78 = vector.load %arg12[%c0_47, %c0_48] : memref<1x128xf32, #tpu.memory_space<vmem>>, vector<1x128xf32>
    %79 = vector.broadcast %78 : vector<1x128xf32> to vector<16x128xf32>
    %80 = arith.addf %77, %79 : vector<16x128xf32>
    %cst_49 = arith.constant 0.000000e+00 : f32
    %81 = vector.broadcast %cst_49 : f32 to vector<16x128xf32>
    %82 = arith.maximumf %80, %81 : vector<16x128xf32>
    %83 = arith.truncf %82 : vector<16x128xf32> to vector<16x128xbf16>
    %c0_50 = arith.constant 0 : index
    %c0_51 = arith.constant 0 : index
    %84 = vector.load %arg14[%c0_50, %c0_51] : memref<128x128xbf16, #tpu.memory_space<vmem>>, vector<128x128xbf16>
    %cst_52 = arith.constant dense<0.000000e+00> : vector<16x128xf32>
    %85 = tpu.matmul %83, %84, %cst_52 {dimension_numbers = #tpu.dot_dimension_numbers<[1], [0], [0], [1], [0, 0, 1, 1], [], []>} : vector<16x128xbf16>, vector<128x128xbf16>, vector<16x128xf32> -> vector<16x128xf32>
    %c2_i32_53 = arith.constant 2 : i32
    %86 = tpu.dynamic_rotate %82 by %c2_i32_53 dim 0 : vector<16x128xf32>, i32 -> vector<16x128xf32>
    %cst_54 = arith.constant 0.000000e+00 : f32
    %87 = vector.broadcast %cst_54 : f32 to vector<16x128xf32>
    %88 = arith.select %68, %86, %87 : vector<16x128xi1>, vector<16x128xf32>
    %89 = arith.truncf %88 : vector<16x128xf32> to vector<16x128xbf16>
    %c0_55 = arith.constant 0 : index
    %c0_56 = arith.constant 0 : index
    %90 = vector.load %arg13[%c0_55, %c0_56] : memref<128x128xbf16, #tpu.memory_space<vmem>>, vector<128x128xbf16>
    %cst_57 = arith.constant dense<0.000000e+00> : vector<16x128xf32>
    %91 = tpu.matmul %89, %90, %cst_57 {dimension_numbers = #tpu.dot_dimension_numbers<[1], [0], [0], [1], [0, 0, 1, 1], [], []>} : vector<16x128xbf16>, vector<128x128xbf16>, vector<16x128xf32> -> vector<16x128xf32>
    %92 = arith.addf %85, %91 : vector<16x128xf32>
    %c0_58 = arith.constant 0 : index
    %c0_59 = arith.constant 0 : index
    %93 = vector.load %arg15[%c0_58, %c0_59] : memref<1x128xf32, #tpu.memory_space<vmem>>, vector<1x128xf32>
    %94 = vector.broadcast %93 : vector<1x128xf32> to vector<16x128xf32>
    %95 = arith.addf %92, %94 : vector<16x128xf32>
    %cst_60 = arith.constant 0.000000e+00 : f32
    %96 = vector.broadcast %cst_60 : f32 to vector<16x128xf32>
    %97 = arith.maximumf %95, %96 : vector<16x128xf32>
    %98 = arith.addf %97, %63 : vector<16x128xf32>
    %cst_61 = arith.constant 0.000000e+00 : f32
    %99 = vector.broadcast %cst_61 : f32 to vector<16x128xf32>
    %100 = arith.maximumf %98, %99 : vector<16x128xf32>
    %101 = arith.truncf %100 : vector<16x128xf32> to vector<16x128xbf16>
    %c4_i32 = arith.constant 4 : i32
    %102 = vector.broadcast %c4_i32 : i32 to vector<16x1xi32>
    %103 = arith.cmpi sge, %21, %102 : vector<16x1xi32>
    %104 = vector.shape_cast %103 : vector<16x1xi1> to vector<16x1xi1>
    %105 = vector.broadcast %104 : vector<16x1xi1> to vector<16x128xi1>
    %c0_62 = arith.constant 0 : index
    %c0_63 = arith.constant 0 : index
    %106 = vector.load %arg17[%c0_62, %c0_63] : memref<128x128xbf16, #tpu.memory_space<vmem>>, vector<128x128xbf16>
    %cst_64 = arith.constant dense<0.000000e+00> : vector<16x128xf32>
    %107 = tpu.matmul %101, %106, %cst_64 {dimension_numbers = #tpu.dot_dimension_numbers<[1], [0], [0], [1], [0, 0, 1, 1], [], []>} : vector<16x128xbf16>, vector<128x128xbf16>, vector<16x128xf32> -> vector<16x128xf32>
    %c4_i32_65 = arith.constant 4 : i32
    %108 = tpu.dynamic_rotate %100 by %c4_i32_65 dim 0 : vector<16x128xf32>, i32 -> vector<16x128xf32>
    %cst_66 = arith.constant 0.000000e+00 : f32
    %109 = vector.broadcast %cst_66 : f32 to vector<16x128xf32>
    %110 = arith.select %105, %108, %109 : vector<16x128xi1>, vector<16x128xf32>
    %111 = arith.truncf %110 : vector<16x128xf32> to vector<16x128xbf16>
    %c0_67 = arith.constant 0 : index
    %c0_68 = arith.constant 0 : index
    %112 = vector.load %arg16[%c0_67, %c0_68] : memref<128x128xbf16, #tpu.memory_space<vmem>>, vector<128x128xbf16>
    %cst_69 = arith.constant dense<0.000000e+00> : vector<16x128xf32>
    %113 = tpu.matmul %111, %112, %cst_69 {dimension_numbers = #tpu.dot_dimension_numbers<[1], [0], [0], [1], [0, 0, 1, 1], [], []>} : vector<16x128xbf16>, vector<128x128xbf16>, vector<16x128xf32> -> vector<16x128xf32>
    %114 = arith.addf %107, %113 : vector<16x128xf32>
    %c0_70 = arith.constant 0 : index
    %c0_71 = arith.constant 0 : index
    %115 = vector.load %arg18[%c0_70, %c0_71] : memref<1x128xf32, #tpu.memory_space<vmem>>, vector<1x128xf32>
    %116 = vector.broadcast %115 : vector<1x128xf32> to vector<16x128xf32>
    %117 = arith.addf %114, %116 : vector<16x128xf32>
    %cst_72 = arith.constant 0.000000e+00 : f32
    %118 = vector.broadcast %cst_72 : f32 to vector<16x128xf32>
    %119 = arith.maximumf %117, %118 : vector<16x128xf32>
    %120 = arith.truncf %119 : vector<16x128xf32> to vector<16x128xbf16>
    %c0_73 = arith.constant 0 : index
    %c0_74 = arith.constant 0 : index
    %121 = vector.load %arg20[%c0_73, %c0_74] : memref<128x128xbf16, #tpu.memory_space<vmem>>, vector<128x128xbf16>
    %cst_75 = arith.constant dense<0.000000e+00> : vector<16x128xf32>
    %122 = tpu.matmul %120, %121, %cst_75 {dimension_numbers = #tpu.dot_dimension_numbers<[1], [0], [0], [1], [0, 0, 1, 1], [], []>} : vector<16x128xbf16>, vector<128x128xbf16>, vector<16x128xf32> -> vector<16x128xf32>
    %c4_i32_76 = arith.constant 4 : i32
    %123 = tpu.dynamic_rotate %119 by %c4_i32_76 dim 0 : vector<16x128xf32>, i32 -> vector<16x128xf32>
    %cst_77 = arith.constant 0.000000e+00 : f32
    %124 = vector.broadcast %cst_77 : f32 to vector<16x128xf32>
    %125 = arith.select %105, %123, %124 : vector<16x128xi1>, vector<16x128xf32>
    %126 = arith.truncf %125 : vector<16x128xf32> to vector<16x128xbf16>
    %c0_78 = arith.constant 0 : index
    %c0_79 = arith.constant 0 : index
    %127 = vector.load %arg19[%c0_78, %c0_79] : memref<128x128xbf16, #tpu.memory_space<vmem>>, vector<128x128xbf16>
    %cst_80 = arith.constant dense<0.000000e+00> : vector<16x128xf32>
    %128 = tpu.matmul %126, %127, %cst_80 {dimension_numbers = #tpu.dot_dimension_numbers<[1], [0], [0], [1], [0, 0, 1, 1], [], []>} : vector<16x128xbf16>, vector<128x128xbf16>, vector<16x128xf32> -> vector<16x128xf32>
    %129 = arith.addf %122, %128 : vector<16x128xf32>
    %c0_81 = arith.constant 0 : index
    %c0_82 = arith.constant 0 : index
    %130 = vector.load %arg21[%c0_81, %c0_82] : memref<1x128xf32, #tpu.memory_space<vmem>>, vector<1x128xf32>
    %131 = vector.broadcast %130 : vector<1x128xf32> to vector<16x128xf32>
    %132 = arith.addf %129, %131 : vector<16x128xf32>
    %cst_83 = arith.constant 0.000000e+00 : f32
    %133 = vector.broadcast %cst_83 : f32 to vector<16x128xf32>
    %134 = arith.maximumf %132, %133 : vector<16x128xf32>
    %c0_84 = arith.constant 0 : index
    %c0_85 = arith.constant 0 : index
    %135 = vector.load %arg22[%c0_84, %c0_85] : memref<128x128xbf16, #tpu.memory_space<vmem>>, vector<128x128xbf16>
    %cst_86 = arith.constant dense<0.000000e+00> : vector<16x128xf32>
    %136 = tpu.matmul %101, %135, %cst_86 {dimension_numbers = #tpu.dot_dimension_numbers<[1], [0], [0], [1], [0, 0, 1, 1], [], []>} : vector<16x128xbf16>, vector<128x128xbf16>, vector<16x128xf32> -> vector<16x128xf32>
    %c0_87 = arith.constant 0 : index
    %c0_88 = arith.constant 0 : index
    %137 = vector.load %arg23[%c0_87, %c0_88] : memref<1x128xf32, #tpu.memory_space<vmem>>, vector<1x128xf32>
    %138 = vector.broadcast %137 : vector<1x128xf32> to vector<16x128xf32>
    %139 = arith.addf %136, %138 : vector<16x128xf32>
    %140 = arith.addf %134, %139 : vector<16x128xf32>
    %cst_89 = arith.constant 0.000000e+00 : f32
    %141 = vector.broadcast %cst_89 : f32 to vector<16x128xf32>
    %142 = arith.maximumf %140, %141 : vector<16x128xf32>
    %143 = vector.extract_strided_slice %142 {offsets = [0, 0], sizes = [16, 8], strides = [1, 1]} : vector<16x128xf32> to vector<16x8xf32>
    %c0_90 = arith.constant 0 : index
    %c0_91 = arith.constant 0 : index
    %144 = vector.load %arg24[%c0_90, %c0_91] : memref<16x8xf32, #tpu.memory_space<vmem>>, vector<16x8xf32>
    tpu.vector_store %arg24[%c0_90, %c0_91], %143 {strides = array<i32>} : memref<16x8xf32, #tpu.memory_space<vmem>>, vector<16x8xf32>,
    return
  }
  func.func @transform_0(%arg0: i32) -> (i32, i32) {
    %c0_i32 = arith.constant 0 : i32
    %c0_i32_0 = arith.constant 0 : i32
    return %arg0, %c0_i32 : i32, i32
  }
  func.func @transform_1(%arg0: i32) -> (i32, i32) {
    %c0_i32 = arith.constant 0 : i32
    %c0_i32_0 = arith.constant 0 : i32
    %c0_i32_1 = arith.constant 0 : i32
    return %c0_i32, %c0_i32_0 : i32, i32
  }
  func.func @transform_2(%arg0: i32) -> (i32, i32) {
    %c0_i32 = arith.constant 0 : i32
    %c0_i32_0 = arith.constant 0 : i32
    %c0_i32_1 = arith.constant 0 : i32
    return %c0_i32, %c0_i32_0 : i32, i32
  }
  func.func @transform_3(%arg0: i32) -> (i32, i32) {
    %c0_i32 = arith.constant 0 : i32
    %c0_i32_0 = arith.constant 0 : i32
    %c0_i32_1 = arith.constant 0 : i32
    return %c0_i32, %c0_i32_0 : i32, i32
  }
  func.func @transform_4(%arg0: i32) -> (i32, i32) {
    %c0_i32 = arith.constant 0 : i32
    %c0_i32_0 = arith.constant 0 : i32
    %c0_i32_1 = arith.constant 0 : i32
    return %c0_i32, %c0_i32_0 : i32, i32
  }
  func.func @transform_5(%arg0: i32) -> (i32, i32) {
    %c0_i32 = arith.constant 0 : i32
    %c0_i32_0 = arith.constant 0 : i32
    %c0_i32_1 = arith.constant 0 : i32
    return %c0_i32, %c0_i32_0 : i32, i32
  }
  func.func @transform_6(%arg0: i32) -> (i32, i32) {
    %c0_i32 = arith.constant 0 : i32
    %c0_i32_0 = arith.constant 0 : i32
    %c0_i32_1 = arith.constant 0 : i32
    return %c0_i32, %c0_i32_0 : i32, i32
  }
  func.func @transform_7(%arg0: i32) -> (i32, i32) {
    %c0_i32 = arith.constant 0 : i32
    %c0_i32_0 = arith.constant 0 : i32
    %c0_i32_1 = arith.constant 0 : i32
    return %c0_i32, %c0_i32_0 : i32, i32
  }
  func.func @transform_8(%arg0: i32) -> (i32, i32) {
    %c0_i32 = arith.constant 0 : i32
    %c0_i32_0 = arith.constant 0 : i32
    %c0_i32_1 = arith.constant 0 : i32
    return %c0_i32, %c0_i32_0 : i32, i32
  }
  func.func @transform_9(%arg0: i32) -> (i32, i32) {
    %c0_i32 = arith.constant 0 : i32
    %c0_i32_0 = arith.constant 0 : i32
    %c0_i32_1 = arith.constant 0 : i32
    return %c0_i32, %c0_i32_0 : i32, i32
  }
  func.func @transform_10(%arg0: i32) -> (i32, i32) {
    %c0_i32 = arith.constant 0 : i32
    %c0_i32_0 = arith.constant 0 : i32
    %c0_i32_1 = arith.constant 0 : i32
    return %c0_i32, %c0_i32_0 : i32, i32
  }
  func.func @transform_11(%arg0: i32) -> (i32, i32) {
    %c0_i32 = arith.constant 0 : i32
    %c0_i32_0 = arith.constant 0 : i32
    %c0_i32_1 = arith.constant 0 : i32
    return %c0_i32, %c0_i32_0 : i32, i32
  }
  func.func @transform_12(%arg0: i32) -> (i32, i32) {
    %c0_i32 = arith.constant 0 : i32
    %c0_i32_0 = arith.constant 0 : i32
    %c0_i32_1 = arith.constant 0 : i32
    return %c0_i32, %c0_i32_0 : i32, i32
  }
  func.func @transform_13(%arg0: i32) -> (i32, i32) {
    %c0_i32 = arith.constant 0 : i32
    %c0_i32_0 = arith.constant 0 : i32
    %c0_i32_1 = arith.constant 0 : i32
    return %c0_i32, %c0_i32_0 : i32, i32
  }
  func.func @transform_14(%arg0: i32) -> (i32, i32) {
    %c0_i32 = arith.constant 0 : i32
    %c0_i32_0 = arith.constant 0 : i32
    %c0_i32_1 = arith.constant 0 : i32
    return %c0_i32, %c0_i32_0 : i32, i32
  }
  func.func @transform_15(%arg0: i32) -> (i32, i32) {
    %c0_i32 = arith.constant 0 : i32
    %c0_i32_0 = arith.constant 0 : i32
    %c0_i32_1 = arith.constant 0 : i32
    return %c0_i32, %c0_i32_0 : i32, i32
  }
  func.func @transform_16(%arg0: i32) -> (i32, i32) {
    %c0_i32 = arith.constant 0 : i32
    %c0_i32_0 = arith.constant 0 : i32
    %c0_i32_1 = arith.constant 0 : i32
    return %c0_i32, %c0_i32_0 : i32, i32
  }
  func.func @transform_17(%arg0: i32) -> (i32, i32) {
    %c0_i32 = arith.constant 0 : i32
    %c0_i32_0 = arith.constant 0 : i32
    %c0_i32_1 = arith.constant 0 : i32
    return %c0_i32, %c0_i32_0 : i32, i32
  }
  func.func @transform_18(%arg0: i32) -> (i32, i32) {
    %c0_i32 = arith.constant 0 : i32
    %c0_i32_0 = arith.constant 0 : i32
    %c0_i32_1 = arith.constant 0 : i32
    return %c0_i32, %c0_i32_0 : i32, i32
  }
  func.func @transform_19(%arg0: i32) -> (i32, i32) {
    %c0_i32 = arith.constant 0 : i32
    %c0_i32_0 = arith.constant 0 : i32
    %c0_i32_1 = arith.constant 0 : i32
    return %c0_i32, %c0_i32_0 : i32, i32
  }
  func.func @transform_20(%arg0: i32) -> (i32, i32) {
    %c0_i32 = arith.constant 0 : i32
    %c0_i32_0 = arith.constant 0 : i32
    %c0_i32_1 = arith.constant 0 : i32
    return %c0_i32, %c0_i32_0 : i32, i32
  }
  func.func @transform_21(%arg0: i32) -> (i32, i32) {
    %c0_i32 = arith.constant 0 : i32
    %c0_i32_0 = arith.constant 0 : i32
    %c0_i32_1 = arith.constant 0 : i32
    return %c0_i32, %c0_i32_0 : i32, i32
  }
  func.func @transform_22(%arg0: i32) -> (i32, i32) {
    %c0_i32 = arith.constant 0 : i32
    %c0_i32_0 = arith.constant 0 : i32
    %c0_i32_1 = arith.constant 0 : i32
    return %c0_i32, %c0_i32_0 : i32, i32
  }
  func.func @transform_23(%arg0: i32) -> (i32, i32) {
    %c0_i32 = arith.constant 0 : i32
    %c0_i32_0 = arith.constant 0 : i32
    return %arg0, %c0_i32 : i32, i32
  }
}

</mosaic_0001>

<bundles_post_ra>
// kernel: tpu_custom_call.1
= control target key start
LH: loop header
LB: loop body
LE: loop exit
PB: predicated region body
PF: predicated region fallthrough
CT: control target
= control target key end

     0   :  { %s4743_s0 = inlined_call_operand.vmem [shape: f32[32,8], index: 0, kind: input, shape index: {}]   ;;  %s4744_s1 = inlined_call_operand.hbm [shape: bf16[128,128], index: 1, kind: input, shape index: {}]   ;;  %s4745_s2 = inlined_call_operand.hbm [shape: bf16[128,128], index: 2, kind: input, shape index: {}]   ;;  %s4746_s3 = inlined_call_operand.vmem [shape: f32[1,128], index: 3, kind: input, shape index: {}]   ;;  %s4747_s4 = inlined_call_operand.hbm [shape: bf16[128,128], index: 4, kind: input, shape index: {}]   ;;  %s4748_s5 = inlined_call_operand.hbm [shape: bf16[128,128], index: 5, kind: input, shape index: {}]   ;;  %s4749_s6 = inlined_call_operand.vmem [shape: f32[1,128], index: 6, kind: input, shape index: {}]   ;;  %s4750_s7 = inlined_call_operand.hbm [shape: bf16[128,128], index: 7, kind: input, shape index: {}]   ;;  %s4751_s8 = inlined_call_operand.vmem [shape: f32[1,128], index: 8, kind: input, shape index: {}]   ;;  %s4752_s9 = inlined_call_operand.hbm [shape: bf16[128,128], index: 9, kind: input, shape index: {}]   ;;  %s4753_s10 = inlined_call_operand.hbm [shape: bf16[128,128], index: 10, kind: input, shape index: {}]   ;;  %s4754_s11 = inlined_call_operand.hbm [shape: f32[1,128], index: 11, kind: input, shape index: {}]   ;;  %s4755_s12 = inlined_call_operand.hbm [shape: bf16[128,128], index: 12, kind: input, shape index: {}]   ;;  %s4756_s13 = inlined_call_operand.hbm [shape: bf16[128,128], index: 13, kind: input, shape index: {}]   ;;  %s4757_s14 = inlined_call_operand.hbm [shape: f32[1,128], index: 14, kind: input, shape index: {}]   ;;  %s4758_s15 = inlined_call_operand.vmem [shape: bf16[128,128], index: 15, kind: input, shape index: {}]   ;;  %s4759_s16 = inlined_call_operand.hbm [shape: bf16[128,128], index: 16, kind: input, shape index: {}]   ;;  %s4760_s17 = inlined_call_operand.vmem [shape: f32[1,128], index: 17, kind: input, shape index: {}]   ;;  %s4761_s18 = inlined_call_operand.hbm [shape: bf16[128,128], index: 18, kind: input, shape index: {}]   ;;  %s4762_s19 = inlined_call_operand.hbm [shape: bf16[128,128], index: 19, kind: input, shape index: {}]   ;;  %s4763_s20 = inlined_call_operand.vmem [shape: f32[1,128], index: 20, kind: input, shape index: {}]   ;;  %s4764_s21 = inlined_call_operand.hbm [shape: bf16[128,128], index: 21, kind: input, shape index: {}]   ;;  %s4765_s22 = inlined_call_operand.vmem [shape: f32[1,128], index: 22, kind: input, shape index: {}]   ;;  %s4766_s23 = inlined_call_operand.vmem [shape: f32[32,8], index: 23, kind: output, shape index: {}]  }
   0x1   :  { %4773 = sst [smem:[#allocation34_spill]] %s4743_s0 }
   0x2   :  { %4774 = sst [smem:[#allocation35_spill]] %s4744_s1 }
   0x3   :  { %4775 = sst [smem:[#allocation36_spill]] %s4745_s2 }
   0x4   :  { %4776 = sst [smem:[#allocation37_spill]] %s4746_s3 }
   0x5   :  { %4777 = sst [smem:[#allocation38_spill]] %s4747_s4 }
   0x6   :  { %4778 = sst [smem:[#allocation39_spill]] %s4748_s5 }
   0x7   :  { %4779 = sst [smem:[#allocation40_spill]] %s4749_s6 }
   0x8   :  { %4780 = sst [smem:[#allocation41_spill]] %s4750_s7 }
   0x9   :  { %4781 = sst [smem:[#allocation42_spill]] %s4752_s9 }
   0xa   :  { %4782 = sst [smem:[#allocation43_spill]] %s4766_s23 }
   0xb   :  { %28 = vsyncpa [#allocation4], 0 }
   0xc   :  { %29 = vsyncpa [#allocation6], 0 }
   0xd   :  { %30 = vsyncpa [#allocation9], 0 }
   0xe   :  { %31 = vsyncpa [#allocation12], 0 }
   0xf   :  { %32 = vsyncpa [#allocation15], 0 }
  0x10   :  { %33 = vsyncpa [#allocation18], 0 }
  0x11   :  { %34 = vsyncpa [#allocation21], 0 }
  0x12   :  { %35 = vsyncpa [#allocation24], 0  ;;  %s4230_s4 = smov 0  }
  0x13 LB: > { %s4767_s30 = sadd.s32 4294967295, %s4088_s4   ;;  %p2801_p0 = scmp.ge.s32.totalorder %s4088_s4, 1  ;;  %s4088_s4 = sphi %s4230_s4, %s41_s4  }
  0x14   : > { %p560_p1 = scmp.lt.s32.totalorder %s4088_s4, 3  ;;  %p4240_p2 = scmp.eq.s32.totalorder %s4767_s30, 0 }
  0x15   : > { %s4090_s5 = smov [#allocation5]   ;;  %s4091_s26 = smov [#allocation8]  }
  0x16   : > { %s4783_s24 = scalar_select %p4240_p2, 1, 0 }
  0x17   : > { %p4244_p3 = pnand %p2801_p0, %p560_p1  ;;  %s585_s1 = sshll.u32 %s4090_s5, 4  ;;  %s586_s1 = int_to_ptr.vmem [resolvable:$true] %s585_s1 }
  0x18   : > { %s614_s2 = sshll.u32 %s4091_s26, 4  ;;  %s4092_s27 = smov [#allocation11]   ;;  %s4250_s2 = int_to_ptr.vmem [resolvable:$true] %s614_s2 }
  0x19   : > { %s4784_s25 = scalar_select %p4244_p3, 1, 0 }
  0x1a   : > { %p3444_p4 = pneg %p4244_p3  ;;  %s646_s7 = sshll.u32 %s4092_s27, 4  ;;  %s4258_s7 = int_to_ptr.vmem [resolvable:$true] %s646_s7 }
  0x1b   : > { %s4093_s28 = smov [#allocation14]   ;;  %s3671_s0 = scalar_lea.vmem %s586_s1, 1024 }
  0x1c   : > { %p4254_p5 = pnand %p4240_p2, %p3444_p4  ;;  %s4260_s29 = sshll.u32 %s4093_s28, 4  ;;  %s674_s29 = int_to_ptr.vmem [resolvable:$true] %s4260_s29 }
  0x1d   : > { %p3672_p7 = scmp.ne.s32.totalorder %s586_s1, %s3671_s0  ;;  %p3679_p10 = scmp.lt.s32.totalorder %s586_s1, %s586_s1 }
  0x1e   : > { %p4264_p6 = pneg %p4254_p5  ;;  %p3680_p11 = scmp.lt.s32.totalorder %s3671_s0, %s3671_s0 }
  0x20   : > { %p3674_p8 = pnand %p3672_p7, %p4264_p6  ;;  %p3681_p12 = por %p3680_p11, %p3679_p10 }
  0x22   : > { %p3675_p9 = pneg %p3674_p8 }
  0x24   : > { %p3682_p13 = pnand %p3681_p12, %p3675_p9 }
  0x26   : > { %3685 = shalt.err (!%p3682_p13)
}
  0x27   : > { %s4768_s5 = smov 64   ;;  %s4095_s26 = smov 4  }
  0x28   : > { %s4787_s30 = sld [smem:[#allocation36_spill]]  ;;  %s3697_s23 = scalar_lea.vmem %s4250_s2, 1024 }
  0x29   : > { %p3698_p0 = scmp.ne.s32.totalorder %s4250_s2, %s3697_s23  ;;  %p3705_p7 = scmp.lt.s32.totalorder %s4250_s2, %s4250_s2 }
  0x2a   : > { %p3706_p8 = scmp.lt.s32.totalorder %s3697_s23, %s3697_s23 }
  0x2b   : > { %p3700_p1 = pnand %p3698_p0, %p4264_p6 }
  0x2c   : > { %p3707_p9 = por %p3706_p8, %p3705_p7 }
  0x2d   : > { %p3701_p4 = pneg %p3700_p1 }
  0x2e   : > { %3450 = dma.hbm_to_vmem [thread:$0]  (!%p4254_p5), %s4787_s30, 1024, %s586_s1, [#allocation6], %s4768_s5, %s4768_s5, %s4095_s26  }
  0x2f   : > { %p3708_p10 = pnand %p3707_p9, %p3701_p4 }
  0x31   : > { %3711 = shalt.err (!%p3708_p10)
}
  0x32   : > { %s4788_s30 = sld [smem:[#allocation39_spill]]  ;;  %s3723_s1 = scalar_lea.vmem %s4258_s7, 1024 }
  0x33   : > { %p3724_p11 = scmp.ne.s32.totalorder %s4258_s7, %s3723_s1  ;;  %p3731_p0 = scmp.lt.s32.totalorder %s4258_s7, %s4258_s7 }
  0x34   : > { %p3732_p1 = scmp.lt.s32.totalorder %s3723_s1, %s3723_s1 }
  0x35   : > { %p3726_p12 = pnand %p3724_p11, %p4264_p6 }
  0x36   : > { %p3733_p4 = por %p3732_p1, %p3731_p0 }
  0x37   : > { %p3727_p13 = pneg %p3726_p12 }
  0x38   : > { %3456 = dma.hbm_to_vmem [thread:$0]  (!%p4254_p5), %s4788_s30, 1024, %s4250_s2, [#allocation9], %s4768_s5, %s4768_s5, %s4095_s26  }
  0x39   : > { %p3734_p7 = pnand %p3733_p4, %p3727_p13 }
  0x3b   : > { %3737 = shalt.err (!%p3734_p7)
}
  0x3c   : > { %s4789_s9 = sld [smem:[#allocation42_spill]]  ;;  %s3749_s2 = scalar_lea.vmem %s674_s29, 16 }
  0x3d   : > { %p3750_p8 = scmp.ne.s32.totalorder %s674_s29, %s3749_s2  ;;  %s3756_s0 = scalar_lea.vmem %s674_s29, 32 }
  0x3e   : > { %p3757_p11 = scmp.lt.s32.totalorder %s674_s29, %s674_s29  ;;  %p3758_p12 = scmp.lt.s32.totalorder %s3756_s0, %s3749_s2 }
  0x3f   : > { %p3752_p9 = pnand %p3750_p8, %p4264_p6 }
  0x40   : > { %p3759_p13 = por %p3758_p12, %p3757_p11 }
  0x41   : > { %p3753_p10 = pneg %p3752_p9 }
  0x42   : > { %3462 = dma.hbm_to_vmem [thread:$0]  (!%p4254_p5), %s4789_s9, 1024, %s4258_s7, [#allocation12], %s4768_s5, %s4768_s5, %s4095_s26  }
  0x43   : > { %p3760_p0 = pnand %p3759_p13, %p3753_p10 }
  0x45   : > { %3763 = shalt.err (!%p3760_p0)
}
  0x46   : > { %3468 = dma.hbm_to_vmem [thread:$0]  (!%p4254_p5), %s4754_s11, 16, %s674_s29, [#allocation15]  }
  0x47   : > { %s4096_s7 = smov [#allocation17]   ;;  %s4097_s23 = smov [#allocation20]  }
  0x48   : > { %s696_s1 = sshll.u32 %s4096_s7, 4  ;;  %s723_s28 = sshll.u32 %s4097_s23, 4  ;;  %s697_s1 = int_to_ptr.vmem [resolvable:$true] %s696_s1  ;;  %s724_s28 = int_to_ptr.vmem [resolvable:$true] %s723_s28 }
  0x49   : > { %s3775_s5 = scalar_lea.vmem %s697_s1, 1024  ;;  %p3783_p8 = scmp.lt.s32.totalorder %s697_s1, %s697_s1 }
  0x4a   : > { %p3776_p1 = scmp.ne.s32.totalorder %s697_s1, %s3775_s5  ;;  %p3784_p9 = scmp.lt.s32.totalorder %s3775_s5, %s3775_s5 }
  0x4c   : > { %p3778_p4 = pnand %p3776_p1, %p4264_p6  ;;  %p3785_p10 = por %p3784_p9, %p3783_p8 }
  0x4e   : > { %p3779_p7 = pneg %p3778_p4 }
  0x50   : > { %p3786_p11 = pnand %p3785_p10, %p3779_p7 }
  0x52   : > { %3789 = shalt.err (!%p3786_p11)
}
  0x53   : > { %s4790_s2 = smov 64   ;;  %s3801_s27 = scalar_lea.vmem %s724_s28, 1024 }
  0x54   : > { %3474 = dma.hbm_to_vmem [thread:$0]  (!%p4254_p5), %s4756_s13, 1024, %s697_s1, [#allocation18], %s4790_s2, %s4790_s2, %s4095_s26  }
  0x55   : > { %p3802_p12 = scmp.ne.s32.totalorder %s724_s28, %s3801_s27  ;;  %p3809_p1 = scmp.lt.s32.totalorder %s724_s28, %s724_s28 }
  0x56   : > { %p3810_p4 = scmp.lt.s32.totalorder %s3801_s27, %s3801_s27 }
  0x57   : > { %p3804_p13 = pnand %p3802_p12, %p4264_p6 }
  0x58   : > { %p3811_p7 = por %p3810_p4, %p3809_p1 }
  0x59   : > { %p3805_p0 = pneg %p3804_p13 }
  0x5b   : > { %p3812_p8 = pnand %p3811_p7, %p3805_p0 }
  0x5d   : > { %3815 = shalt.err (!%p3812_p8)
}
  0x5e   : > { %3480 = dma.hbm_to_vmem [thread:$0]  (!%p4254_p5), %s4759_s16, 1024, %s724_s28, [#allocation21], %s4790_s2, %s4790_s2, %s4095_s26  }
  0x5f   : > { %s4098_s7 = smov [#allocation23]   ;;  %s4099_s23 = smov [#allocation3]  }
  0x60   : > { %s752_s1 = sshll.u32 %s4098_s7, 4  ;;  %s572_s29 = sshll.u32 %s4099_s23, 4  ;;  %s753_s1 = int_to_ptr.vmem [resolvable:$true] %s752_s1  ;;  %s573_s29 = int_to_ptr.vmem [resolvable:$true] %s572_s29 }
  0x61   : > { %s3827_s0 = scalar_lea.vmem %s753_s1, 1024  ;;  %p3835_p12 = scmp.lt.s32.totalorder %s753_s1, %s753_s1 }
  0x62   : > { %p3828_p9 = scmp.ne.s32.totalorder %s753_s1, %s3827_s0  ;;  %p3836_p13 = scmp.lt.s32.totalorder %s3827_s0, %s3827_s0 }
  0x64   : > { %p3830_p10 = pnand %p3828_p9, %p4264_p6  ;;  %p3837_p0 = por %p3836_p13, %p3835_p12 }
  0x66   : > { %p3831_p11 = pneg %p3830_p10 }
  0x68   : > { %p3838_p1 = pnand %p3837_p0, %p3831_p11 }
  0x6a   : > { %3841 = shalt.err (!%p3838_p1)
}
  0x6b   : > { %3486 = dma.hbm_to_vmem [thread:$0]  (!%p4254_p5), %s4762_s19, 1024, %s753_s1, [#allocation24], %s4790_s2, %s4790_s2, %s4095_s26  }
  0x6c   : > { %s3853_s5 = scalar_lea.vmem %s573_s29, 1024  ;;  %p3861_p9 = scmp.lt.s32.totalorder %s573_s29, %s573_s29 }
  0x6d   : > { %p3854_p4 = scmp.ne.s32.totalorder %s573_s29, %s3853_s5  ;;  %p3862_p10 = scmp.lt.s32.totalorder %s3853_s5, %s3853_s5 }
  0x6f   : > { %p3856_p7 = pnand %p3854_p4, %p4264_p6  ;;  %p3863_p11 = por %p3862_p10, %p3861_p9 }
  0x71   : > { %p3857_p8 = pneg %p3856_p7 }
  0x73   : > { %p3864_p12 = pnand %p3863_p11, %p3857_p8 }
  0x75   : > { %3867 = shalt.err (!%p3864_p12)
}
  0x76   : > { %s4791_s23 = sld [smem:[#allocation35_spill]]  ;;  %s4100_s1 = smov [#allocation7]  }
  0x77   : > { %s601_s0 = sshll.u32 %s4100_s1, 4  ;;  %s4101_s28 = smov [#allocation10]   ;;  %s602_s0 = int_to_ptr.vmem [resolvable:$true] %s601_s0 }
  0x78   : > { %s630_s27 = sshll.u32 %s4101_s28, 4  ;;  %s3879_s9 = scalar_lea.vmem %s602_s0, 1024  ;;  %s631_s27 = int_to_ptr.vmem [resolvable:$true] %s630_s27 }
  0x79   : > { %p3880_p13 = scmp.ne.s32.totalorder %s602_s0, %s3879_s9  ;;  %p3887_p4 = scmp.lt.s32.totalorder %s602_s0, %s602_s0 }
  0x7a   : > { %p3888_p7 = scmp.lt.s32.totalorder %s3879_s9, %s3879_s9 }
  0x7b   : > { %p3882_p0 = pnand %p3880_p13, %p4264_p6 }
  0x7c   : > { %3447 = dma.hbm_to_vmem [thread:$0]  (!%p4254_p5), %s4791_s23, 1024, %s573_s29, [#allocation4], %s4790_s2, %s4790_s2, %s4095_s26  }
  0x7d   : > { %p3883_p1 = pneg %p3882_p0  ;;  %p3889_p8 = por %p3888_p7, %p3887_p4 }
  0x7f   : > { %p3890_p9 = pnand %p3889_p8, %p3883_p1 }
  0x81   : > { %3893 = shalt.err (!%p3890_p9)
}
  0x82   : > { %s4792_s30 = sld [smem:[#allocation38_spill]]  ;;  %s3905_s7 = scalar_lea.vmem %s631_s27, 1024 }
  0x83   : > { %p3906_p10 = scmp.ne.s32.totalorder %s631_s27, %s3905_s7  ;;  %p3913_p13 = scmp.lt.s32.totalorder %s631_s27, %s631_s27 }
  0x84   : > { %p3914_p0 = scmp.lt.s32.totalorder %s3905_s7, %s3905_s7 }
  0x85   : > { %p3908_p11 = pnand %p3906_p10, %p4264_p6 }
  0x86   : > { %p3915_p1 = por %p3914_p0, %p3913_p13 }
  0x87   : > { %p3909_p12 = pneg %p3908_p11 }
  0x88   : > { %3453 = dma.hbm_to_vmem [thread:$0]  (!%p4254_p5), %s4792_s30, 1024, %s602_s0, [#allocation6], %s4790_s2, %s4790_s2, %s4095_s26  }
  0x89   : > { %p3916_p4 = pnand %p3915_p1, %p3909_p12 }
  0x8b   : > { %3919 = shalt.err (!%p3916_p4)
}
  0x8c   : > { %s4793_s1 = sld [smem:[#allocation41_spill]]  ;;  %s4102_s0 = smov [#allocation13]  }
  0x8d   : > { %s659_s28 = sshll.u32 %s4102_s0, 4  ;;  %s4103_s29 = smov [#allocation16]   ;;  %s660_s28 = int_to_ptr.vmem [resolvable:$true] %s659_s28 }
  0x8e   : > { %s683_s5 = sshll.u32 %s4103_s29, 4  ;;  %s3931_s30 = scalar_lea.vmem %s660_s28, 1024  ;;  %s684_s5 = int_to_ptr.vmem [resolvable:$true] %s683_s5 }
  0x8f   : > { %p3932_p7 = scmp.ne.s32.totalorder %s660_s28, %s3931_s30  ;;  %p3939_p10 = scmp.lt.s32.totalorder %s660_s28, %s660_s28 }
  0x90   : > { %p3940_p11 = scmp.lt.s32.totalorder %s3931_s30, %s3931_s30 }
  0x91   : > { %p3934_p8 = pnand %p3932_p7, %p4264_p6 }
  0x92   : > { %3459 = dma.hbm_to_vmem [thread:$0]  (!%p4254_p5), %s4793_s1, 1024, %s631_s27, [#allocation9], %s4790_s2, %s4790_s2, %s4095_s26  }
  0x93   : > { %p3935_p9 = pneg %p3934_p8  ;;  %p3941_p12 = por %p3940_p11, %p3939_p10 }
  0x95   : > { %p3942_p13 = pnand %p3941_p12, %p3935_p9 }
  0x97   : > { %3945 = shalt.err (!%p3942_p13)
}
  0x98   : > { %3465 = dma.hbm_to_vmem [thread:$0]  (!%p4254_p5), %s4753_s10, 1024, %s660_s28, [#allocation12], %s4790_s2, %s4790_s2, %s4095_s26  }
  0x99   : > { %s3957_s9 = scalar_lea.vmem %s684_s5, 1024  ;;  %p3965_p7 = scmp.lt.s32.totalorder %s684_s5, %s684_s5 }
  0x9a   : > { %p3958_p0 = scmp.ne.s32.totalorder %s684_s5, %s3957_s9  ;;  %p3966_p8 = scmp.lt.s32.totalorder %s3957_s9, %s3957_s9 }
  0x9c   : > { %p3960_p1 = pnand %p3958_p0, %p4264_p6  ;;  %p3967_p9 = por %p3966_p8, %p3965_p7 }
  0x9e   : > { %p3961_p4 = pneg %p3960_p1 }
  0xa0   : > { %p3968_p10 = pnand %p3967_p9, %p3961_p4 }
  0xa2   : > { %3971 = shalt.err (!%p3968_p10)
}
  0xa3   : > { %3471 = dma.hbm_to_vmem [thread:$0]  (!%p4254_p5), %s4755_s12, 1024, %s684_s5, [#allocation15], %s4790_s2, %s4790_s2, %s4095_s26  }
  0xa4   : > { %s4104_s0 = smov [#allocation19]   ;;  %s4105_s29 = smov [#allocation22]  }
  0xa5   : > { %s710_s28 = sshll.u32 %s4104_s0, 4  ;;  %s739_s30 = sshll.u32 %s4105_s29, 4  ;;  %s711_s28 = int_to_ptr.vmem [resolvable:$true] %s710_s28  ;;  %s740_s30 = int_to_ptr.vmem [resolvable:$true] %s739_s30 }
  0xa6   : > { %s3983_s27 = scalar_lea.vmem %s711_s28, 16  ;;  %s3990_s7 = scalar_lea.vmem %s711_s28, 32 }
  0xa7   : > { %p3984_p11 = scmp.ne.s32.totalorder %s711_s28, %s3983_s27  ;;  %p3991_p0 = scmp.lt.s32.totalorder %s711_s28, %s711_s28 }
  0xa8   : > { %p3992_p1 = scmp.lt.s32.totalorder %s3990_s7, %s3983_s27 }
  0xa9   : > { %p3986_p12 = pnand %p3984_p11, %p4264_p6 }
  0xaa   : > { %p3993_p4 = por %p3992_p1, %p3991_p0 }
  0xab   : > { %p3987_p13 = pneg %p3986_p12 }
  0xad   : > { %p3994_p7 = pnand %p3993_p4, %p3987_p13 }
  0xaf   : > { %3997 = shalt.err (!%p3994_p7)
}
  0xb0   : > { %3477 = dma.hbm_to_vmem [thread:$0]  (!%p4254_p5), %s4757_s14, 16, %s711_s28, [#allocation18]  }
  0xb1   : > { %s4009_s23 = scalar_lea.vmem %s740_s30, 1024  ;;  %p4017_p11 = scmp.lt.s32.totalorder %s740_s30, %s740_s30 }
  0xb2   : > { %p4010_p8 = scmp.ne.s32.totalorder %s740_s30, %s4009_s23  ;;  %p4018_p12 = scmp.lt.s32.totalorder %s4009_s23, %s4009_s23 }
  0xb4   : > { %p4012_p9 = pnand %p4010_p8, %p4264_p6  ;;  %p4019_p2 = por %p4018_p12, %p4017_p11 }
  0xb6   : > { %p4013_p10 = pneg %p4012_p9 }
  0xb8   : > { %p4020_p3 = pnand %p4019_p2, %p4013_p10 }
  0xba   : > { %4023 = shalt.err (!%p4020_p3)
}
  0xbb   : > { %3483 = dma.hbm_to_vmem [thread:$0]  (!%p4254_p5), %s4761_s18, 1024, %s740_s30, [#allocation21], %s4790_s2, %s4790_s2, %s4095_s26  }
  0xbc   : > { %s4106_s28 = smov [#allocation25]  }
  0xbd   : > { %s768_s29 = sshll.u32 %s4106_s28, 4  ;;  %s769_s29 = int_to_ptr.vmem [resolvable:$true] %s768_s29 }
  0xbe   : > { %s4035_s27 = scalar_lea.vmem %s769_s29, 1024  ;;  %p4043_p2 = scmp.lt.s32.totalorder %s769_s29, %s769_s29 }
  0xbf   : > { %p4036_p13 = scmp.ne.s32.totalorder %s769_s29, %s4035_s27  ;;  %p4044_p3 = scmp.lt.s32.totalorder %s4035_s27, %s4035_s27 }
  0xc1   : > { %p4038_p0 = pnand %p4036_p13, %p4264_p6  ;;  %p4045_p4 = por %p4044_p3, %p4043_p2 }
  0xc3   : > { %p4039_p1 = pneg %p4038_p0 }
  0xc5   : > { %p4046_p7 = pnand %p4045_p4, %p4039_p1 }
  0xc7   : > { %4049 = shalt.err (!%p4046_p7)
}
  0xc8   : > { %3489 = dma.hbm_to_vmem [thread:$0]  (!%p4254_p5), %s4764_s21, 1024, %s769_s29, [#allocation24], %s4790_s2, %s4790_s2, %s4095_s26  }
  0xc9   : > { %p4794_p8 = scmp.ne.s32.totalorder %s4784_s25, 0 }
  0xca   : > { %p4795_p6 = scmp.ne.s32.totalorder (!%p4794_p8), %s4783_s24, 0 }
  0xcb   : > { %796 = sbr.rel (%p4794_p8) target bundleno = 1569 (0x621), region = 112 }
  0xd0   : > { %4055 = dma.done.wait (%p4795_p6), [#allocation4], 1024  }
  0xd1   : > { %4057 = vsyncadd (%p4795_p6), [#allocation4], 4294966272 }
  0xd2   : > { %4059 = dma.done.wait (%p4795_p6), [#allocation6], 2048  }
  0xd3   : > { %4061 = vsyncadd (%p4795_p6), [#allocation6], 4294965248 }
  0xd4   : > { %4063 = dma.done.wait (%p4795_p6), [#allocation9], 2048  }
  0xd5   : > { %4065 = vsyncadd (%p4795_p6), [#allocation9], 4294965248 }
  0xd6   : > { %4067 = dma.done.wait (%p4795_p6), [#allocation12], 2048  }
  0xd7   : > { %4069 = vsyncadd (%p4795_p6), [#allocation12], 4294965248 }
  0xd8   : > { %4071 = dma.done.wait (%p4795_p6), [#allocation15], 1040  }
  0xd9   : > { %4073 = vsyncadd (%p4795_p6), [#allocation15], 4294966256 }
  0xda   : > { %4075 = dma.done.wait (%p4795_p6), [#allocation18], 1040  }
  0xdb   : > { %4077 = vsyncadd (%p4795_p6), [#allocation18], 4294966256 }
  0xdc   : > { %4079 = dma.done.wait (%p4795_p6), [#allocation21], 2048  }
  0xdd   : > { %4081 = vsyncadd (%p4795_p6), [#allocation21], 4294965248 }
  0xde   : > { %4083 = dma.done.wait (%p4795_p6), [#allocation24], 2048  }
  0xdf   : > { %4085 = vsyncadd (%p4795_p6), [#allocation24], 4294965248  ;;  %v4107_v0 = vmov 0.0   ;;  %vm4108_vm0 = vmmov 0   ;;  %s4796_s25 = sadd.s32 4294967295, %s4088_s4   ;;  %v3548_v1 = vld [vmem:[#allocation3 + $0x38] sm:$0xff]   ;;  %v938_v8 = vlaneseq }
  0xe0   : > { %3104 = vmatprep.subr.bf16.mxu0 %v4107_v0  ;;  %929 = vst [vmem:[#allocation2] sm:$0xff] %v4107_v0  ;;  %930 = vst [vmem:[#allocation2 + $0x8] sm:$0xff] %v4107_v0  ;;  %3124 = vmatprep.subr.bf16.mxu1 %v4107_v0  ;;  %s2834_s24 = sshll.u32 %s4796_s25, 1  ;;  %v3549_v2 = vld [vmem:[#allocation5 + $0x38] sm:$0xff]   ;;  %v3550_v3 = vld [vmem:[#allocation3 + $0x30] sm:$0xff]   ;;  %s4797_s2 = sld [smem:[#allocation34_spill]] }
  0xe1   : > { %3120 = vmatprep.mubr.msk.bf16.mxu0 %vm4108_vm0, %v4107_v0  ;;  %3140 = vmatprep.mubr.msk.bf16.mxu1 %vm4108_vm0, %v4107_v0  ;;  %p917_p5 = scmp.lt.s32.totalorder %s2834_s24, 3  ;;  %v3551_v4 = vld [vmem:[#allocation5 + $0x30] sm:$0xff]   ;;  %v3552_v5 = vld [vmem:[#allocation3 + $0x28] sm:$0xff]   ;;  %v3554_v7 = vld [vmem:[#allocation3 + $0x20] sm:$0xff]   ;;  %vm933_vm1 = vcmask 64512   ;;  %v4481_v11 = vshrl.u32 %v938_v8, 7 }
  0xe2   : > { %3105 = vmatpush3.bf16.msra.mxu0 %v3548_v1  ;;  %3125 = vmatpush3.bf16.msra.mxu1 %v3549_v2  ;;  %v3553_v6 = vld [vmem:[#allocation5 + $0x28] sm:$0xff]   ;;  %v3555_v9 = vld [vmem:[#allocation5 + $0x20] sm:$0xff]   ;;  %v3556_v10 = vld [vmem:[#allocation3 + $0x18] sm:$0xff]   ;;  %vm4109_vm4 = vmmov 1   ;;  %s4800_s1 = sld [smem:[#allocation37_spill]] }
  0xe3   : > { %3106 = vmatprep.subr.bf16.mxu0 %v4107_v0  ;;  %3126 = vmatprep.subr.bf16.mxu1 %v4107_v0  ;;  %s4808_s24 = smov (!%p917_p5, %s2834_s24), 3  ;;  %v3557_v12 = vld [vmem:[#allocation5 + $0x18] sm:$0xff]   ;;  %v3558_v15 = vld [vmem:[#allocation3 + $0x10] sm:$0xff]   ;;  %v4488_v16 = vand.u32 15, %v4481_v11  ;;  %v3560_v18 = vld [vmem:[#allocation3 + $0x8] sm:$0xff]   ;;  %vm990_vm3 = vcmp.lt.s32.totalorder %v4481_v11, 1 }
  0xe4   : > { %s2835_s6 = sshll.u32 %s4808_s24, 3  ;;  %v3559_v17 = vld [vmem:[#allocation5 + $0x10] sm:$0xff]   ;;  %v3561_v19 = vld [vmem:[#allocation5 + $0x8] sm:$0xff]   ;;  %v3562_v20 = vld [vmem:[#allocation3] sm:$0xff]   ;;  %s4801_s29 = sld [smem:[#allocation40_spill]]  ;;  %vm1571_vm6 = vcmp.lt.s32.totalorder %v4481_v11, 2 }
  0xe5   : > { %vm966_vm2 = vcmp.ge.s32.totalorder %v4488_v16, 1  ;;  %v3563_v23 = vld [vmem:[#allocation5] sm:$0xff]   ;;  %v3565_v29 = vld [vmem:[#allocation7 + $0x38] sm:$0xff]   ;;  %v3567_v33 = vld [vmem:[#allocation7 + $0x30] sm:$0xff]   ;;  %vm1547_vm7 = vcmp.ge.s32.totalorder %v4488_v16, 2  ;;  %vm2040_vm9 = vcmp.lt.s32.totalorder %v4481_v11, 4 }
  0xe6   : > { %3107 = vmatpush3.bf16.msra.mxu0 %v3550_v3  ;;  %3127 = vmatpush3.bf16.msra.mxu1 %v3551_v4  ;;  %s920_s9 = scalar_lea.vmem %s4797_s2, %s2835_s6  ;;  %vm4497_vm5 = vmpackc.low %vm4109_vm4, %vm966_vm2  ;;  %v3564_v31 = vld [vmem:[#allocation8 + $0x38] sm:$0xff]   ;;  %v3566_v34 = vld [vmem:[#allocation8 + $0x30] sm:$0xff]   ;;  %vm2016_vm10 = vcmp.ge.s32.totalorder %v4488_v16, 4  ;;  %s4806_s28 = sld [smem:[#allocation43_spill]] }
  0xe7   : > { %3108 = vmatprep.subr.bf16.mxu0 %v4107_v0  ;;  %3128 = vmatprep.subr.bf16.mxu1 %v4107_v0  ;;  %v931_v13 = vld [vmem:[%s920_s9] sm:$0xff]  ;;  %v932_v14 = vld [vmem:[%s920_s9 + $0x8] sm:$0xff]  ;;  %v3569_v35 = vld [vmem:[#allocation7 + $0x28] sm:$0xff]  }
  0xe8   : > { %934 = vst.msk [vmem:[#allocation2] sm:$0xff] %vm933_vm1, %v931_v13  ;;  %935 = vst.msk [vmem:[#allocation2 + $0x8] sm:$0xff] %vm933_vm1, %v932_v14  ;;  %v3568_v36 = vld [vmem:[#allocation8 + $0x28] sm:$0xff]   ;;  %v3571_v37 = vld [vmem:[#allocation7 + $0x20] sm:$0xff]  }
  0xe9   : > { %v3570_v38 = vld [vmem:[#allocation8 + $0x20] sm:$0xff]   ;;  %v3572_v39 = vld [vmem:[#allocation8 + $0x18] sm:$0xff]   ;;  %v3574_v41 = vld [vmem:[#allocation8 + $0x10] sm:$0xff]  }
  0xea   : > { %3109 = vmatpush3.bf16.msra.mxu0 %v3552_v5  ;;  %3129 = vmatpush3.bf16.msra.mxu1 %v3553_v6  ;;  %v3573_v40 = vld [vmem:[#allocation7 + $0x18] sm:$0xff]   ;;  %v3575_v42 = vld [vmem:[#allocation7 + $0x10] sm:$0xff]   ;;  %v3576_v43 = vld [vmem:[#allocation8 + $0x8] sm:$0xff]  }
  0xeb   : > { %3110 = vmatprep.subr.bf16.mxu0 %v4107_v0  ;;  %3130 = vmatprep.subr.bf16.mxu1 %v4107_v0  ;;  %v3577_v44 = vld [vmem:[#allocation7 + $0x8] sm:$0xff]   ;;  %v3578_v45 = vld [vmem:[#allocation8] sm:$0xff]   ;;  %v2857_v49 = vld [vmem:[%s4800_s1] ss:$0 sm:$0xff] }
  0xec   : > { %v3579_v46 = vld [vmem:[#allocation7] sm:$0xff]   ;;  %v3580_v4 = vld [vmem:[#allocation10 + $0x38] sm:$0xff]   ;;  %v3581_v6 = vld [vmem:[#allocation10 + $0x30] sm:$0xff]  }
  0xed   : > { %v3583_v8 = vld [vmem:[#allocation10 + $0x20] sm:$0xff]   ;;  %v3588_v14 = vld [vmem:[#allocation13 + $0x38] sm:$0xff]   ;;  %v3599_v26 = vld [vmem:[#allocation11 + $0x10] sm:$0xff]  }
  0xee   : > { %3111 = vmatpush3.bf16.msra.mxu0 %v3554_v7  ;;  %3131 = vmatpush3.bf16.msra.mxu1 %v3555_v9  ;;  %v3582_v7 = vld [vmem:[#allocation10 + $0x28] sm:$0xff]   ;;  %v3584_v9 = vld [vmem:[#allocation10 + $0x18] sm:$0xff]   ;;  %v3587_v13 = vld [vmem:[#allocation10] sm:$0xff]  }
  0xef   : > { %3112 = vmatprep.subr.bf16.mxu0 %v4107_v0  ;;  %3132 = vmatprep.subr.bf16.mxu1 %v4107_v0  ;;  %v936_v21 = vld [vmem:[#allocation2] sm:$0xff]  ;;  %v937_v22 = vld [vmem:[#allocation2 + $0x8] sm:$0xff]  ;;  %vm4595_vm8 = vmpackc.low %vm4109_vm4, %vm1547_vm7 }
  0xf0   : > { %v988_v24 = vrot.slane %v936_v21, 7  ;;  %v989_v25 = vrot.slane %v937_v22, 7  ;;  %v4507_v32 = vpack.c.bf16 %v937_v22, %v936_v21  ;;  %v3594_v21 = vld [vmem:[#allocation13 + $0x20] sm:$0xff]   ;;  %vm4683_vm11 = vmpackc.low %vm4109_vm4, %vm2016_vm10 }
  0xf1   : > { %v3595_v22 = vld [vmem:[#allocation11 + $0x20] sm:$0xff]  }
  0xf2   : > { %3113 = vmatpush3.bf16.msra.mxu0 %v3556_v10  ;;  %3133 = vmatpush3.bf16.msra.mxu1 %v3557_v12  ;;  %v991_v27 = vsel %vm990_vm3, %v988_v24, %v989_v25  ;;  %v992_v28 = vsel %vm990_vm3, %v989_v25, %v988_v24  ;;  %v3585_v10 = vld [vmem:[#allocation10 + $0x10] sm:$0xff]   ;;  %v3586_v12 = vld [vmem:[#allocation10 + $0x8] sm:$0xff]   ;;  %v3597_v24 = vld [vmem:[#allocation11 + $0x18] sm:$0xff]  }
  0xf3   : > { %3114 = vmatprep.subr.bf16.mxu0 %v4107_v0  ;;  %3134 = vmatprep.subr.bf16.mxu1 %v4107_v0  ;;  %v2847_v30 = vpack.c.bf16 %v991_v27, %v992_v28  ;;  %v3598_v25 = vld [vmem:[#allocation13 + $0x10] sm:$0xff]   ;;  %v3600_v27 = vld [vmem:[#allocation13 + $0x8] sm:$0xff]  }
  0xf4   : > { %v3601_v28 = vld [vmem:[#allocation11 + $0x8] sm:$0xff]  }
  0xf5   : > { %v3655_v11 = vld [vmem:[#allocation25 + $0x20] sm:$0xff]  }
  0xf6   : > { %3115 = vmatpush3.bf16.msra.mxu0 %v3558_v15  ;;  %3135 = vmatpush3.bf16.msra.mxu1 %v3559_v17  ;;  %v3589_v15 = vld [vmem:[#allocation11 + $0x38] sm:$0xff]   ;;  %v3590_v17 = vld [vmem:[#allocation13 + $0x30] sm:$0xff]  }
  0xf7   : > { %3116 = vmatprep.subr.bf16.mxu0 %v4107_v0  ;;  %3136 = vmatprep.subr.bf16.mxu1 %v4107_v0 }
  0xfa   : > { %3117 = vmatpush3.bf16.msra.mxu0 %v3560_v18  ;;  %3137 = vmatpush3.bf16.msra.mxu1 %v3561_v19  ;;  %v3591_v18 = vld [vmem:[#allocation11 + $0x30] sm:$0xff]   ;;  %v3592_v19 = vld [vmem:[#allocation13 + $0x28] sm:$0xff]  }
  0xfb   : > { %3118 = vmatprep.subr.bf16.mxu0 %v4107_v0  ;;  %3138 = vmatprep.subr.bf16.mxu1 %v4107_v0 }
  0xfe   : > { %3119 = vmatpush3.bf16.msra.mxu0 %v3562_v20  ;;  %3139 = vmatpush3.bf16.msra.mxu1 %v3563_v23  ;;  %v3593_v20 = vld [vmem:[#allocation11 + $0x28] sm:$0xff]   ;;  %v3596_v23 = vld [vmem:[#allocation13 + $0x18] sm:$0xff]  }
  0xff   : > { %3144 = vmatprep.subr.bf16.mxu0 %v4107_v0  ;;  %3164 = vmatprep.subr.bf16.mxu1 %v4107_v0 }
 0x101   : > { %3121 = vmatmul.mubr.msk.bf16.vlgmr.msra.gmra.mxu0 %vm4497_vm5, %v2847_v30  ;;  %3141 = vmatmul.mubr.bf16.vlgmr.msra.gmra.mxu1 %v4507_v32  ;;  %v3603_v30 = vld [vmem:[#allocation11] sm:$0xff]  }
 0x102   : > { %3145 = vmatpush3.bf16.msra.mxu0 %v3565_v29  ;;  %3165 = vmatpush3.bf16.msra.mxu1 %v3564_v31  ;;  %v3602_v29 = vld [vmem:[#allocation13] sm:$0xff]  }
 0x103   : > { %3146 = vmatprep.subr.bf16.mxu0 %v4107_v0  ;;  %3166 = vmatprep.subr.bf16.mxu1 %v4107_v0 }
 0x104   : > { %3180 = vmatprep.mubr.msk.bf16.mxu1 %vm4108_vm0, %v4107_v0  ;;  %3160 = vmatprep.mubr.msk.bf16.mxu0 %vm4108_vm0, %v4107_v0 }
 0x106   : > { %3147 = vmatpush3.bf16.msra.mxu0 %v3567_v33  ;;  %3167 = vmatpush3.bf16.msra.mxu1 %v3566_v34 }
 0x107   : > { %3148 = vmatprep.subr.bf16.mxu0 %v4107_v0  ;;  %3168 = vmatprep.subr.bf16.mxu1 %v4107_v0 }
 0x10a   : > { %3149 = vmatpush3.bf16.msra.mxu0 %v3569_v35  ;;  %3169 = vmatpush3.bf16.msra.mxu1 %v3568_v36 }
 0x10b   : > { %3150 = vmatprep.subr.bf16.mxu0 %v4107_v0  ;;  %3170 = vmatprep.subr.bf16.mxu1 %v4107_v0 }
 0x10e   : > { %3151 = vmatpush3.bf16.msra.mxu0 %v3571_v37  ;;  %3171 = vmatpush3.bf16.msra.mxu1 %v3570_v38 }
 0x10f   : > { %3152 = vmatprep.subr.bf16.mxu0 %v4107_v0  ;;  %3172 = vmatprep.subr.bf16.mxu1 %v4107_v0 }
 0x112   : > { %3173 = vmatpush3.bf16.msra.mxu1 %v3572_v39  ;;  %3153 = vmatpush3.bf16.msra.mxu0 %v3573_v40  ;;  %v2877_v40 = vld [vmem:[%s4801_s29] ss:$0 sm:$0xff]  ;;  %s926_s29 = scalar_lea.vmem %s4806_s28, %s2835_s6 }
 0x113   : > { %3174 = vmatprep.subr.bf16.mxu1 %v4107_v0  ;;  %3154 = vmatprep.subr.bf16.mxu0 %v4107_v0 }
 0x116   : > { %3175 = vmatpush3.bf16.msra.mxu1 %v3574_v41  ;;  %3155 = vmatpush3.bf16.msra.mxu0 %v3575_v42 }
 0x117   : > { %3176 = vmatprep.subr.bf16.mxu1 %v4107_v0  ;;  %3156 = vmatprep.subr.bf16.mxu0 %v4107_v0 }
 0x11a   : > { %3177 = vmatpush3.bf16.msra.mxu1 %v3576_v43  ;;  %3157 = vmatpush3.bf16.msra.mxu0 %v3577_v44  ;;  %v2878_v43 = vld [vmem:[%s4751_s8] ss:$0 sm:$0xff] }
 0x11b   : > { %3178 = vmatprep.subr.bf16.mxu1 %v4107_v0  ;;  %3158 = vmatprep.subr.bf16.mxu0 %v4107_v0 }
 0x11e   : > { %3179 = vmatpush3.bf16.msra.mxu1 %v3578_v45  ;;  %3159 = vmatpush3.bf16.msra.mxu0 %v3579_v46 }
 0x11f   : > { %3204 = vmatprep.subr.bf16.mxu1 %v4107_v0  ;;  %3184 = vmatprep.subr.bf16.mxu0 %v4107_v0 }
 0x1c1   : > { %v1094_v47 = vpop.f32.mrf.mxu0  ;;  %v1183_v48 = vpop.f32.mrf.mxu1 }
 0x1c2   : > { %v1184_v50 = vadd.f32 %v1183_v48, %v1094_v47 }
 0x1c3   : > { %v3122_v51 = vpop.f32.mrf.mxu0  ;;  %v3142_v52 = vpop.f32.mrf.mxu1 }
 0x1c4   : > { %v1197_v53 = vadd.f32 %v2857_v49, %v1184_v50 }
 0x1c5   : > { %v1097_v54 = vpop.f32.mrf.mxu0  ;;  %v1186_v55 = vpop.f32.mrf.mxu1 }
 0x1c6   : > { %v1187_v56 = vadd.f32 %v1186_v55, %v1097_v54  ;;  %v1199_v59 = vmax.f32 %v1197_v53, 0.0 }
 0x1c7   : > { %v3123_v57 = vpop.f32.mrf.mxu0  ;;  %v3143_v58 = vpop.f32.mrf.mxu1 }
 0x1c8   : > { %v1198_v60 = vadd.f32 %v2857_v49, %v1187_v56  ;;  %v1218_v62 = vrot.slane %v1199_v59, 7  ;;  %v3604_v57 = vld [vmem:[#allocation17 + $0x38] sm:$0xff]  }
 0x1ca   : > { %v1200_v61 = vmax.f32 %v1198_v60, 0.0 }
 0x1cc   : > { %v1201_v63 = vpack.c.bf16 %v1200_v61, %v1199_v59  ;;  %v1219_v1 = vrot.slane %v1200_v61, 7 }
 0x1ce   : > { %v1220_v2 = vsel %vm990_vm3, %v1218_v62, %v1219_v1  ;;  %v1221_v3 = vsel %vm990_vm3, %v1219_v1, %v1218_v62  ;;  %3181 = vmatmul.mubr.bf16.vlgmr.msra.gmra.mxu1 %v1201_v63  ;;  %v3605_v1 = vld [vmem:[#allocation16 + $0x38] sm:$0xff]  }
 0x1cf   : > { %v2867_v5 = vpack.c.bf16 %v1220_v2, %v1221_v3  ;;  %3220 = vmatprep.mubr.msk.bf16.mxu1 %vm4108_vm0, %v4107_v0  ;;  %3205 = vmatpush3.bf16.msra.mxu1 %v3589_v15  ;;  %v3606_v3 = vld [vmem:[#allocation17 + $0x30] sm:$0xff]   ;;  %v3617_v15 = vld [vmem:[#allocation16 + $0x8] sm:$0xff]  }
 0x1d0   : > { %3206 = vmatprep.subr.bf16.mxu1 %v4107_v0 }
 0x1d1   : > { %3161 = vmatmul.mubr.msk.bf16.vlgmr.msra.gmra.mxu0 %vm4497_vm5, %v2867_v5  ;;  %v3608_v5 = vld [vmem:[#allocation17 + $0x28] sm:$0xff]  }
 0x1d2   : > { %3185 = vmatpush3.bf16.msra.mxu0 %v3580_v4  ;;  %3200 = vmatprep.mubr.msk.bf16.mxu0 %vm4108_vm0, %v4107_v0  ;;  %v3607_v4 = vld [vmem:[#allocation16 + $0x30] sm:$0xff]  }
 0x1d3   : > { %3186 = vmatprep.subr.bf16.mxu0 %v4107_v0  ;;  %3207 = vmatpush3.bf16.msra.mxu1 %v3591_v18  ;;  %v3619_v18 = vld [vmem:[#allocation16] sm:$0xff]  }
 0x1d4   : > { %3208 = vmatprep.subr.bf16.mxu1 %v4107_v0 }
 0x1d6   : > { %3187 = vmatpush3.bf16.msra.mxu0 %v3581_v6  ;;  %v3609_v6 = vld [vmem:[#allocation16 + $0x28] sm:$0xff]  }
 0x1d7   : > { %3188 = vmatprep.subr.bf16.mxu0 %v4107_v0  ;;  %3209 = vmatpush3.bf16.msra.mxu1 %v3593_v20 }
 0x1d8   : > { %3210 = vmatprep.subr.bf16.mxu1 %v4107_v0 }
 0x1da   : > { %3189 = vmatpush3.bf16.msra.mxu0 %v3582_v7  ;;  %v3610_v7 = vld [vmem:[#allocation17 + $0x20] sm:$0xff]  }
 0x1db   : > { %3190 = vmatprep.subr.bf16.mxu0 %v4107_v0  ;;  %3211 = vmatpush3.bf16.msra.mxu1 %v3595_v22  ;;  %v2906_v22 = vld [vmem:[#allocation14] ss:$0 sm:$0xff] }
 0x1dc   : > { %3212 = vmatprep.subr.bf16.mxu1 %v4107_v0 }
 0x1de   : > { %3191 = vmatpush3.bf16.msra.mxu0 %v3583_v8  ;;  %v3611_v8 = vld [vmem:[#allocation16 + $0x20] sm:$0xff]  }
 0x1df   : > { %3192 = vmatprep.subr.bf16.mxu0 %v4107_v0  ;;  %3213 = vmatpush3.bf16.msra.mxu1 %v3597_v24 }
 0x1e0   : > { %3214 = vmatprep.subr.bf16.mxu1 %v4107_v0 }
 0x1e2   : > { %3193 = vmatpush3.bf16.msra.mxu0 %v3584_v9  ;;  %v3612_v9 = vld [vmem:[#allocation17 + $0x18] sm:$0xff]  }
 0x1e3   : > { %3194 = vmatprep.subr.bf16.mxu0 %v4107_v0  ;;  %3215 = vmatpush3.bf16.msra.mxu1 %v3599_v26 }
 0x1e4   : > { %3216 = vmatprep.subr.bf16.mxu1 %v4107_v0 }
 0x1e6   : > { %3195 = vmatpush3.bf16.msra.mxu0 %v3585_v10  ;;  %v3613_v10 = vld [vmem:[#allocation16 + $0x18] sm:$0xff]  }
 0x1e7   : > { %3196 = vmatprep.subr.bf16.mxu0 %v4107_v0  ;;  %3217 = vmatpush3.bf16.msra.mxu1 %v3601_v28 }
 0x1e8   : > { %3218 = vmatprep.subr.bf16.mxu1 %v4107_v0 }
 0x1ea   : > { %3197 = vmatpush3.bf16.msra.mxu0 %v3586_v12  ;;  %v3614_v12 = vld [vmem:[#allocation17 + $0x10] sm:$0xff]  }
 0x1eb   : > { %3198 = vmatprep.subr.bf16.mxu0 %v4107_v0  ;;  %3219 = vmatpush3.bf16.msra.mxu1 %v3603_v30 }
 0x1ec   : > { %3244 = vmatprep.subr.bf16.mxu1 %v4107_v0 }
 0x1ee   : > { %3199 = vmatpush3.bf16.msra.mxu0 %v3587_v13  ;;  %v3615_v13 = vld [vmem:[#allocation16 + $0x10] sm:$0xff]  }
 0x1ef   : > { %3224 = vmatprep.subr.bf16.mxu0 %v4107_v0 }
 0x1f1   : > { %3201 = vmatmul.mubr.bf16.vlgmr.msra.gmra.mxu0 %v4507_v32 }
 0x1f2   : > { %3240 = vmatprep.mubr.msk.bf16.mxu0 %vm4108_vm0, %v4107_v0  ;;  %3225 = vmatpush3.bf16.msra.mxu0 %v3588_v14  ;;  %v3616_v14 = vld [vmem:[#allocation17 + $0x8] sm:$0xff]  }
 0x1f3   : > { %3226 = vmatprep.subr.bf16.mxu0 %v4107_v0 }
 0x1f6   : > { %3227 = vmatpush3.bf16.msra.mxu0 %v3590_v17  ;;  %v3618_v17 = vld [vmem:[#allocation17] sm:$0xff]  }
 0x1f7   : > { %3228 = vmatprep.subr.bf16.mxu0 %v4107_v0 }
 0x1fa   : > { %3229 = vmatpush3.bf16.msra.mxu0 %v3592_v19 }
 0x1fb   : > { %3230 = vmatprep.subr.bf16.mxu0 %v4107_v0 }
 0x1fe   : > { %3231 = vmatpush3.bf16.msra.mxu0 %v3594_v21 }
 0x1ff   : > { %3232 = vmatprep.subr.bf16.mxu0 %v4107_v0 }
 0x202   : > { %3233 = vmatpush3.bf16.msra.mxu0 %v3596_v23 }
 0x203   : > { %3234 = vmatprep.subr.bf16.mxu0 %v4107_v0 }
 0x206   : > { %3235 = vmatpush3.bf16.msra.mxu0 %v3598_v25 }
 0x207   : > { %3236 = vmatprep.subr.bf16.mxu0 %v4107_v0 }
 0x20a   : > { %3237 = vmatpush3.bf16.msra.mxu0 %v3600_v27 }
 0x20b   : > { %3238 = vmatprep.subr.bf16.mxu0 %v4107_v0 }
 0x20e   : > { %3239 = vmatpush3.bf16.msra.mxu0 %v3602_v29 }
 0x20f   : > { %3264 = vmatprep.subr.bf16.mxu0 %v4107_v0 }
 0x28e   : > { %v1412_v31 = vpop.f32.mrf.mxu1 }
 0x290   : > { %v3182_v32 = vpop.f32.mrf.mxu1 }
 0x291   : > { %v1323_v33 = vpop.f32.mrf.mxu0 }
 0x292   : > { %v1415_v34 = vpop.f32.mrf.mxu1  ;;  %v1413_v39 = vadd.f32 %v1412_v31, %v1323_v33 }
 0x293   : > { %v3162_v35 = vpop.f32.mrf.mxu0 }
 0x294   : > { %v3183_v36 = vpop.f32.mrf.mxu1  ;;  %v1426_v41 = vadd.f32 %v2877_v40, %v1413_v39 }
 0x295   : > { %v1326_v37 = vpop.f32.mrf.mxu0 }
 0x296   : > { %v1416_v42 = vadd.f32 %v1415_v34, %v1326_v37  ;;  %v1428_v45 = vmax.f32 %v1426_v41, 0.0  ;;  %v3620_v34 = vld [vmem:[#allocation20 + $0x38] sm:$0xff]  }
 0x297   : > { %v3163_v38 = vpop.f32.mrf.mxu0 }
 0x298   : > { %v1427_v46 = vadd.f32 %v2877_v40, %v1416_v42  ;;  %v3621_v40 = vld [vmem:[%s4758_s15 + $0x38] sm:$0xff]   ;;  %v3622_v42 = vld [vmem:[#allocation20 + $0x30] sm:$0xff]  }
 0x29a   : > { %v1429_v51 = vmax.f32 %v1427_v46, 0.0  ;;  %v3626_v46 = vld [vmem:[#allocation20 + $0x20] sm:$0xff]  }
 0x2b1   : > { %v1535_v44 = vpop.f32.mrf.mxu0 }
 0x2b2   : > { %v1536_v47 = vadd.f32 %v2878_v43, %v1535_v44  ;;  %v3624_v44 = vld [vmem:[#allocation20 + $0x28] sm:$0xff]  }
 0x2b3   : > { %v3202_v48 = vpop.f32.mrf.mxu0 }
 0x2b4   : > { %v1542_v49 = vadd.f32 %v1536_v47, %v1428_v45  ;;  %v3625_v45 = vld [vmem:[%s4758_s15 + $0x28] sm:$0xff]   ;;  %v3627_v47 = vld [vmem:[%s4758_s15 + $0x20] sm:$0xff]  }
 0x2b5   : > { %v1538_v50 = vpop.f32.mrf.mxu0  ;;  %v3628_v48 = vld [vmem:[#allocation20 + $0x18] sm:$0xff]  }
 0x2b6   : > { %v1539_v52 = vadd.f32 %v2878_v43, %v1538_v50  ;;  %v4580_v54 = vmax.f32 %v1542_v49, 0.0  ;;  %v3623_v43 = vld [vmem:[%s4758_s15 + $0x30] sm:$0xff]   ;;  %v3629_v49 = vld [vmem:[%s4758_s15 + $0x18] sm:$0xff]   ;;  %v3630_v50 = vld [vmem:[#allocation20 + $0x10] sm:$0xff]  }
 0x2b7   : > { %v3203_v53 = vpop.f32.mrf.mxu0 }
 0x2b8   : > { %v1543_v55 = vadd.f32 %v1539_v52, %v1429_v51  ;;  %v1569_v58 = vrot.slane %v4580_v54, 6  ;;  %v3631_v51 = vld [vmem:[%s4758_s15 + $0x10] sm:$0xff]   ;;  %v3632_v52 = vld [vmem:[#allocation20 + $0x8] sm:$0xff]   ;;  %v3633_v53 = vld [vmem:[%s4758_s15 + $0x8] sm:$0xff]  }
 0x2ba   : > { %v4582_v56 = vmax.f32 %v1543_v55, 0.0  ;;  %v3634_v55 = vld [vmem:[#allocation20] sm:$0xff]  }
 0x2bc   : > { %v1570_v59 = vrot.slane %v4582_v56, 6  ;;  %v1546_v60 = vpack.c.bf16 %v4582_v56, %v4580_v54 }
 0x2be   : > { %v1572_v61 = vsel %vm1571_vm6, %v1569_v58, %v1570_v59  ;;  %v1573_v62 = vsel %vm1571_vm6, %v1570_v59, %v1569_v58  ;;  %3241 = vmatmul.mubr.bf16.vlgmr.msra.gmra.mxu0 %v1546_v60 }
 0x2bf   : > { %v2896_v2 = vpack.c.bf16 %v1572_v61, %v1573_v62  ;;  %3265 = vmatpush3.bf16.msra.mxu0 %v3604_v57  ;;  %3280 = vmatprep.mubr.msk.bf16.mxu0 %vm4108_vm0, %v4107_v0  ;;  %v3635_v57 = vld [vmem:[%s4758_s15] sm:$0xff]   ;;  %v2926_v61 = vld [vmem:[#allocation19] ss:$0 sm:$0xff] }
 0x2c0   : > { %3266 = vmatprep.subr.bf16.mxu0 %v4107_v0 }
 0x2c1   : > { %3221 = vmatmul.mubr.msk.bf16.vlgmr.msra.gmra.mxu1 %vm4595_vm8, %v2896_v2 }
 0x2c2   : > { %3245 = vmatpush3.bf16.msra.mxu1 %v3605_v1  ;;  %3260 = vmatprep.mubr.msk.bf16.mxu1 %vm4108_vm0, %v4107_v0 }
 0x2c3   : > { %3267 = vmatpush3.bf16.msra.mxu0 %v3606_v3  ;;  %3246 = vmatprep.subr.bf16.mxu1 %v4107_v0 }
 0x2c4   : > { %3268 = vmatprep.subr.bf16.mxu0 %v4107_v0 }
 0x2c6   : > { %3247 = vmatpush3.bf16.msra.mxu1 %v3607_v4 }
 0x2c7   : > { %3269 = vmatpush3.bf16.msra.mxu0 %v3608_v5  ;;  %3248 = vmatprep.subr.bf16.mxu1 %v4107_v0 }
 0x2c8   : > { %3270 = vmatprep.subr.bf16.mxu0 %v4107_v0 }
 0x2ca   : > { %3249 = vmatpush3.bf16.msra.mxu1 %v3609_v6 }
 0x2cb   : > { %3271 = vmatpush3.bf16.msra.mxu0 %v3610_v7  ;;  %3250 = vmatprep.subr.bf16.mxu1 %v4107_v0 }
 0x2cc   : > { %3272 = vmatprep.subr.bf16.mxu0 %v4107_v0 }
 0x2ce   : > { %3251 = vmatpush3.bf16.msra.mxu1 %v3611_v8 }
 0x2cf   : > { %3273 = vmatpush3.bf16.msra.mxu0 %v3612_v9  ;;  %3252 = vmatprep.subr.bf16.mxu1 %v4107_v0 }
 0x2d0   : > { %3274 = vmatprep.subr.bf16.mxu0 %v4107_v0 }
 0x2d2   : > { %3253 = vmatpush3.bf16.msra.mxu1 %v3613_v10 }
 0x2d3   : > { %3275 = vmatpush3.bf16.msra.mxu0 %v3614_v12  ;;  %3254 = vmatprep.subr.bf16.mxu1 %v4107_v0 }
 0x2d4   : > { %3276 = vmatprep.subr.bf16.mxu0 %v4107_v0 }
 0x2d6   : > { %3255 = vmatpush3.bf16.msra.mxu1 %v3615_v13 }
 0x2d7   : > { %3277 = vmatpush3.bf16.msra.mxu0 %v3616_v14  ;;  %3256 = vmatprep.subr.bf16.mxu1 %v4107_v0 }
 0x2d8   : > { %3278 = vmatprep.subr.bf16.mxu0 %v4107_v0 }
 0x2da   : > { %3257 = vmatpush3.bf16.msra.mxu1 %v3617_v15  ;;  %v3636_v15 = vld [vmem:[#allocation23 + $0x38] sm:$0xff]  }
 0x2db   : > { %3279 = vmatpush3.bf16.msra.mxu0 %v3618_v17  ;;  %3258 = vmatprep.subr.bf16.mxu1 %v4107_v0 }
 0x2dc   : > { %3304 = vmatprep.subr.bf16.mxu0 %v4107_v0 }
 0x2de   : > { %3259 = vmatpush3.bf16.msra.mxu1 %v3619_v18 }
 0x2df   : > { %3284 = vmatprep.subr.bf16.mxu1 %v4107_v0 }
 0x37e   : > { %v1764_v19 = vpop.f32.mrf.mxu0 }
 0x380   : > { %v3242_v20 = vpop.f32.mrf.mxu0 }
 0x381   : > { %v1675_v21 = vpop.f32.mrf.mxu1 }
 0x382   : > { %v1765_v23 = vadd.f32 %v1764_v19, %v1675_v21  ;;  %v1767_v24 = vpop.f32.mrf.mxu0  ;;  %v3637_v21 = vld [vmem:[#allocation22 + $0x38] sm:$0xff]  }
 0x383   : > { %v3222_v25 = vpop.f32.mrf.mxu1 }
 0x384   : > { %v1778_v26 = vadd.f32 %v2906_v22, %v1765_v23  ;;  %v3243_v27 = vpop.f32.mrf.mxu0  ;;  %v3639_v23 = vld [vmem:[#allocation22 + $0x30] sm:$0xff]   ;;  %v3641_v25 = vld [vmem:[#allocation22 + $0x28] sm:$0xff]  }
 0x385   : > { %v1678_v28 = vpop.f32.mrf.mxu1  ;;  %v3643_v27 = vld [vmem:[#allocation22 + $0x20] sm:$0xff]  }
 0x386   : > { %v1768_v29 = vadd.f32 %v1767_v24, %v1678_v28  ;;  %v1780_v31 = vmax.f32 %v1778_v26, 0.0  ;;  %v3640_v24 = vld [vmem:[#allocation23 + $0x28] sm:$0xff]   ;;  %v3642_v26 = vld [vmem:[#allocation23 + $0x20] sm:$0xff]   ;;  %v3644_v28 = vld [vmem:[#allocation23 + $0x18] sm:$0xff]  }
 0x387   : > { %v3223_v30 = vpop.f32.mrf.mxu1 }
 0x388   : > { %v1779_v32 = vadd.f32 %v2906_v22, %v1768_v29  ;;  %v1799_v35 = vrot.slane %v1780_v31, 6  ;;  %v3638_v22 = vld [vmem:[#allocation23 + $0x30] sm:$0xff]   ;;  %v3645_v29 = vld [vmem:[#allocation22 + $0x18] sm:$0xff]  }
 0x389   : > { %v3646_v30 = vld [vmem:[#allocation23 + $0x10] sm:$0xff]  }
 0x38a   : > { %v1781_v33 = vmax.f32 %v1779_v32, 0.0  ;;  %v3648_v32 = vld [vmem:[#allocation23 + $0x8] sm:$0xff]  }
 0x38c   : > { %v1782_v36 = vpack.c.bf16 %v1781_v33, %v1780_v31  ;;  %v1800_v37 = vrot.slane %v1781_v33, 6  ;;  %v3647_v31 = vld [vmem:[#allocation22 + $0x10] sm:$0xff]   ;;  %v3649_v33 = vld [vmem:[#allocation22 + $0x8] sm:$0xff]  }
 0x38e   : > { %v1801_v38 = vsel %vm1571_vm6, %v1799_v35, %v1800_v37  ;;  %v1802_v39 = vsel %vm1571_vm6, %v1800_v37, %v1799_v35  ;;  %3281 = vmatmul.mubr.bf16.vlgmr.msra.gmra.mxu0 %v1782_v36  ;;  %v3651_v35 = vld [vmem:[#allocation22] sm:$0xff]  }
 0x38f   : > { %v2916_v41 = vpack.c.bf16 %v1801_v38, %v1802_v39  ;;  %3305 = vmatpush3.bf16.msra.mxu0 %v3620_v34  ;;  %3320 = vmatprep.mubr.msk.bf16.mxu0 %vm4108_vm0, %v4107_v0  ;;  %v3650_v34 = vld [vmem:[#allocation23] sm:$0xff]   ;;  %v2946_v39 = vld [vmem:[%s4760_s17] ss:$0 sm:$0xff] }
 0x390   : > { %3306 = vmatprep.subr.bf16.mxu0 %v4107_v0 }
 0x391   : > { %3261 = vmatmul.mubr.msk.bf16.vlgmr.msra.gmra.mxu1 %vm4595_vm8, %v2916_v41 }
 0x392   : > { %3285 = vmatpush3.bf16.msra.mxu1 %v3621_v40  ;;  %3300 = vmatprep.mubr.msk.bf16.mxu1 %vm4108_vm0, %v4107_v0 }
 0x393   : > { %3307 = vmatpush3.bf16.msra.mxu0 %v3622_v42  ;;  %3286 = vmatprep.subr.bf16.mxu1 %v4107_v0 }
 0x394   : > { %3308 = vmatprep.subr.bf16.mxu0 %v4107_v0 }
 0x396   : > { %3287 = vmatpush3.bf16.msra.mxu1 %v3623_v43 }
 0x397   : > { %3309 = vmatpush3.bf16.msra.mxu0 %v3624_v44  ;;  %3288 = vmatprep.subr.bf16.mxu1 %v4107_v0 }
 0x398   : > { %3310 = vmatprep.subr.bf16.mxu0 %v4107_v0 }
 0x39a   : > { %3289 = vmatpush3.bf16.msra.mxu1 %v3625_v45 }
 0x39b   : > { %3311 = vmatpush3.bf16.msra.mxu0 %v3626_v46  ;;  %3290 = vmatprep.subr.bf16.mxu1 %v4107_v0 }
 0x39c   : > { %3312 = vmatprep.subr.bf16.mxu0 %v4107_v0 }
 0x39e   : > { %3291 = vmatpush3.bf16.msra.mxu1 %v3627_v47 }
 0x39f   : > { %3313 = vmatpush3.bf16.msra.mxu0 %v3628_v48  ;;  %3292 = vmatprep.subr.bf16.mxu1 %v4107_v0 }
 0x3a0   : > { %3314 = vmatprep.subr.bf16.mxu0 %v4107_v0 }
 0x3a2   : > { %3293 = vmatpush3.bf16.msra.mxu1 %v3629_v49 }
 0x3a3   : > { %3315 = vmatpush3.bf16.msra.mxu0 %v3630_v50  ;;  %3294 = vmatprep.subr.bf16.mxu1 %v4107_v0 }
 0x3a4   : > { %3316 = vmatprep.subr.bf16.mxu0 %v4107_v0 }
 0x3a6   : > { %3295 = vmatpush3.bf16.msra.mxu1 %v3631_v51 }
 0x3a7   : > { %3317 = vmatpush3.bf16.msra.mxu0 %v3632_v52  ;;  %3296 = vmatprep.subr.bf16.mxu1 %v4107_v0 }
 0x3a8   : > { %3318 = vmatprep.subr.bf16.mxu0 %v4107_v0 }
 0x3aa   : > { %3297 = vmatpush3.bf16.msra.mxu1 %v3633_v53 }
 0x3ab   : > { %3319 = vmatpush3.bf16.msra.mxu0 %v3634_v55  ;;  %3298 = vmatprep.subr.bf16.mxu1 %v4107_v0 }
 0x3ac   : > { %3344 = vmatprep.subr.bf16.mxu0 %v4107_v0 }
 0x3ae   : > { %3299 = vmatpush3.bf16.msra.mxu1 %v3635_v57 }
 0x3af   : > { %3324 = vmatprep.subr.bf16.mxu1 %v4107_v0 }
 0x44e   : > { %v1993_v58 = vpop.f32.mrf.mxu0 }
 0x450   : > { %v3282_v59 = vpop.f32.mrf.mxu0 }
 0x451   : > { %v1904_v60 = vpop.f32.mrf.mxu1 }
 0x452   : > { %v1994_v62 = vadd.f32 %v1993_v58, %v1904_v60  ;;  %v1996_v63 = vpop.f32.mrf.mxu0  ;;  %v3652_v58 = vld [vmem:[#allocation25 + $0x38] sm:$0xff]   ;;  %v3653_v60 = vld [vmem:[#allocation25 + $0x30] sm:$0xff]  }
 0x453   : > { %v3262_v1 = vpop.f32.mrf.mxu1 }
 0x454   : > { %v2007_v2 = vadd.f32 %v2926_v61, %v1994_v62  ;;  %v3283_v3 = vpop.f32.mrf.mxu0  ;;  %v3656_v62 = vld [vmem:[#allocation25 + $0x18] sm:$0xff]   ;;  %v3658_v1 = vld [vmem:[#allocation25 + $0x8] sm:$0xff]  }
 0x455   : > { %v1907_v4 = vpop.f32.mrf.mxu1 }
 0x456   : > { %v2009_v5 = vmax.f32 %v2007_v2, 0.0  ;;  %v1997_v6 = vadd.f32 %v1996_v63, %v1907_v4  ;;  %v3657_v63 = vld [vmem:[#allocation25 + $0x10] sm:$0xff]   ;;  %v3659_v2 = vld [vmem:[#allocation25] sm:$0xff]  }
 0x457   : > { %v3263_v7 = vpop.f32.mrf.mxu1 }
 0x458   : > { %v2011_v8 = vadd.f32 %v2009_v5, %v4580_v54  ;;  %v2008_v9 = vadd.f32 %v2926_v61, %v1997_v6  ;;  %v3654_v61 = vld [vmem:[#allocation25 + $0x28] sm:$0xff]  }
 0x45a   : > { %v2010_v10 = vmax.f32 %v2008_v9, 0.0  ;;  %v2013_v12 = vmax.f32 %v2011_v8, 0.0 }
 0x45c   : > { %v2012_v13 = vadd.f32 %v2010_v10, %v4582_v56  ;;  %v2038_v17 = vrot.slane %v2013_v12, 4 }
 0x45e   : > { %v2014_v14 = vmax.f32 %v2012_v13, 0.0  ;;  %v2966_v13 = vld [vmem:[%s4763_s20] ss:$0 sm:$0xff] }
 0x460   : > { %v2039_v18 = vrot.slane %v2014_v14, 4  ;;  %v4675_v19 = vpack.c.bf16 %v2014_v14, %v2013_v12 }
 0x462   : > { %v2041_v20 = vsel %vm2040_vm9, %v2038_v17, %v2039_v18  ;;  %v2042_v54 = vsel %vm2040_vm9, %v2039_v18, %v2038_v17  ;;  %3321 = vmatmul.mubr.bf16.vlgmr.msra.gmra.mxu0 %v4675_v19 }
 0x463   : > { %v2936_v16 = vpack.c.bf16 %v2041_v20, %v2042_v54  ;;  %3345 = vmatpush3.bf16.msra.mxu0 %v3636_v15  ;;  %3360 = vmatprep.mubr.msk.bf16.mxu0 %vm4108_vm0, %v4107_v0 }
 0x464   : > { %3346 = vmatprep.subr.bf16.mxu0 %v4107_v0 }
 0x465   : > { %3301 = vmatmul.mubr.msk.bf16.vlgmr.msra.gmra.mxu1 %vm4683_vm11, %v2936_v16 }
 0x466   : > { %3325 = vmatpush3.bf16.msra.mxu1 %v3637_v21  ;;  %3340 = vmatprep.mubr.msk.bf16.mxu1 %vm4108_vm0, %v4107_v0 }
 0x467   : > { %3347 = vmatpush3.bf16.msra.mxu0 %v3638_v22  ;;  %3326 = vmatprep.subr.bf16.mxu1 %v4107_v0 }
 0x468   : > { %3348 = vmatprep.subr.bf16.mxu0 %v4107_v0 }
 0x46a   : > { %3327 = vmatpush3.bf16.msra.mxu1 %v3639_v23 }
 0x46b   : > { %3349 = vmatpush3.bf16.msra.mxu0 %v3640_v24  ;;  %3328 = vmatprep.subr.bf16.mxu1 %v4107_v0 }
 0x46c   : > { %3350 = vmatprep.subr.bf16.mxu0 %v4107_v0 }
 0x46e   : > { %3329 = vmatpush3.bf16.msra.mxu1 %v3641_v25 }
 0x46f   : > { %3351 = vmatpush3.bf16.msra.mxu0 %v3642_v26  ;;  %3330 = vmatprep.subr.bf16.mxu1 %v4107_v0 }
 0x470   : > { %3352 = vmatprep.subr.bf16.mxu0 %v4107_v0 }
 0x472   : > { %3331 = vmatpush3.bf16.msra.mxu1 %v3643_v27 }
 0x473   : > { %3332 = vmatprep.subr.bf16.mxu1 %v4107_v0  ;;  %3353 = vmatpush3.bf16.msra.mxu0 %v3644_v28 }
 0x474   : > { %3354 = vmatprep.subr.bf16.mxu0 %v4107_v0 }
 0x476   : > { %3333 = vmatpush3.bf16.msra.mxu1 %v3645_v29 }
 0x477   : > { %3334 = vmatprep.subr.bf16.mxu1 %v4107_v0  ;;  %3355 = vmatpush3.bf16.msra.mxu0 %v3646_v30 }
 0x478   : > { %3356 = vmatprep.subr.bf16.mxu0 %v4107_v0 }
 0x47a   : > { %3335 = vmatpush3.bf16.msra.mxu1 %v3647_v31 }
 0x47b   : > { %3336 = vmatprep.subr.bf16.mxu1 %v4107_v0  ;;  %3357 = vmatpush3.bf16.msra.mxu0 %v3648_v32 }
 0x47c   : > { %3358 = vmatprep.subr.bf16.mxu0 %v4107_v0 }
 0x47e   : > { %3337 = vmatpush3.bf16.msra.mxu1 %v3649_v33 }
 0x47f   : > { %3338 = vmatprep.subr.bf16.mxu1 %v4107_v0  ;;  %3359 = vmatpush3.bf16.msra.mxu0 %v3650_v34 }
 0x482   : > { %3339 = vmatpush3.bf16.msra.mxu1 %v3651_v35 }
 0x483   : > { %3364 = vmatprep.subr.bf16.mxu1 %v4107_v0 }
 0x522   : > { %v2233_v36 = vpop.f32.mrf.mxu0 }
 0x524   : > { %v3322_v37 = vpop.f32.mrf.mxu0 }
 0x525   : > { %v2144_v38 = vpop.f32.mrf.mxu1 }
 0x526   : > { %v2234_v40 = vadd.f32 %v2233_v36, %v2144_v38  ;;  %v2236_v41 = vpop.f32.mrf.mxu0 }
 0x527   : > { %v3302_v42 = vpop.f32.mrf.mxu1 }
 0x528   : > { %v2247_v43 = vadd.f32 %v2946_v39, %v2234_v40  ;;  %v3323_v44 = vpop.f32.mrf.mxu0 }
 0x529   : > { %v2147_v45 = vpop.f32.mrf.mxu1 }
 0x52a   : > { %v2237_v46 = vadd.f32 %v2236_v41, %v2147_v45  ;;  %v2249_v48 = vmax.f32 %v2247_v43, 0.0 }
 0x52b   : > { %v3303_v47 = vpop.f32.mrf.mxu1 }
 0x52c   : > { %v2248_v49 = vadd.f32 %v2946_v39, %v2237_v46  ;;  %v2268_v51 = vrot.slane %v2249_v48, 4 }
 0x52e   : > { %v2250_v50 = vmax.f32 %v2248_v49, 0.0 }
 0x530   : > { %v2251_v52 = vpack.c.bf16 %v2250_v50, %v2249_v48  ;;  %v2269_v53 = vrot.slane %v2250_v50, 4 }
 0x532   : > { %v2270_v55 = vsel %vm2040_vm9, %v2268_v51, %v2269_v53  ;;  %v2271_v57 = vsel %vm2040_vm9, %v2269_v53, %v2268_v51  ;;  %3361 = vmatmul.mubr.bf16.vlgmr.msra.gmra.mxu0 %v2251_v52 }
 0x533   : > { %v2956_v59 = vpack.c.bf16 %v2270_v55, %v2271_v57 }
 0x535   : > { %3341 = vmatmul.mubr.msk.bf16.vlgmr.msra.gmra.mxu1 %vm4683_vm11, %v2956_v59 }
 0x536   : > { %3365 = vmatpush3.bf16.msra.mxu1 %v3652_v58  ;;  %3380 = vmatprep.mubr.msk.bf16.mxu1 %vm4108_vm0, %v4107_v0 }
 0x537   : > { %3366 = vmatprep.subr.bf16.mxu1 %v4107_v0 }
 0x53a   : > { %3367 = vmatpush3.bf16.msra.mxu1 %v3653_v60 }
 0x53b   : > { %3368 = vmatprep.subr.bf16.mxu1 %v4107_v0 }
 0x53e   : > { %3369 = vmatpush3.bf16.msra.mxu1 %v3654_v61 }
 0x53f   : > { %3370 = vmatprep.subr.bf16.mxu1 %v4107_v0 }
 0x542   : > { %3371 = vmatpush3.bf16.msra.mxu1 %v3655_v11 }
 0x543   : > { %3372 = vmatprep.subr.bf16.mxu1 %v4107_v0 }
 0x546   : > { %3373 = vmatpush3.bf16.msra.mxu1 %v3656_v62 }
 0x547   : > { %3374 = vmatprep.subr.bf16.mxu1 %v4107_v0 }
 0x54a   : > { %3375 = vmatpush3.bf16.msra.mxu1 %v3657_v63 }
 0x54b   : > { %3376 = vmatprep.subr.bf16.mxu1 %v4107_v0 }
 0x54e   : > { %3377 = vmatpush3.bf16.msra.mxu1 %v3658_v1 }
 0x54f   : > { %3378 = vmatprep.subr.bf16.mxu1 %v4107_v0  ;;  %v2967_v0 = vld [vmem:[%s4765_s22] ss:$0 sm:$0xff] }
 0x552   : > { %3379 = vmatpush3.bf16.msra.mxu1 %v3659_v2 }
 0x555   : > { %3381 = vmatmul.mubr.bf16.vlgmr.msra.gmra.mxu1 %v4675_v19 }
 0x5f2   : > { %v2462_v3 = vpop.f32.mrf.mxu0 }
 0x5f4   : > { %v3362_v4 = vpop.f32.mrf.mxu0 }
 0x5f5   : > { %v2373_v5 = vpop.f32.mrf.mxu1 }
 0x5f6   : > { %v2465_v6 = vpop.f32.mrf.mxu0  ;;  %v2463_v12 = vadd.f32 %v2462_v3, %v2373_v5 }
 0x5f7   : > { %v3342_v7 = vpop.f32.mrf.mxu1 }
 0x5f8   : > { %v3363_v8 = vpop.f32.mrf.mxu0  ;;  %v2476_v14 = vadd.f32 %v2966_v13, %v2463_v12 }
 0x5f9   : > { %v2376_v9 = vpop.f32.mrf.mxu1 }
 0x5fa   : > { %v2466_v15 = vadd.f32 %v2465_v6, %v2376_v9  ;;  %v2478_v18 = vmax.f32 %v2476_v14, 0.0 }
 0x5fb   : > { %v3343_v10 = vpop.f32.mrf.mxu1 }
 0x5fc   : > { %v2477_v19 = vadd.f32 %v2966_v13, %v2466_v15 }
 0x5fe   : > { %v2479_v16 = vmax.f32 %v2477_v19, 0.0 }
 0x615   : > { %v2585_v17 = vpop.f32.mrf.mxu1 }
 0x616   : > { %v2586_v20 = vadd.f32 %v2967_v0, %v2585_v17 }
 0x617   : > { %v3382_v54 = vpop.f32.mrf.mxu1 }
 0x618   : > { %v2592_v56 = vadd.f32 %v2586_v20, %v2478_v18 }
 0x619   : > { %v2588_v21 = vpop.f32.mrf.mxu1 }
 0x61a   : > { %v2594_v22 = vmax.f32 %v2592_v56, 0.0  ;;  %v2589_v23 = vadd.f32 %v2967_v0, %v2588_v21 }
 0x61b   : > { %v3383_v24 = vpop.f32.mrf.mxu1 }
 0x61c   : > { %2596 = vst.msk [vmem:[%s926_s29] sm:$0xff] %vm933_vm1, %v2594_v22  ;;  %v2593_v25 = vadd.f32 %v2589_v23, %v2479_v16 }
 0x61e   : > { %v2595_v26 = vmax.f32 %v2593_v25, 0.0 }
 0x620   : > { %2597 = vst.msk [vmem:[%s926_s29 + $0x8] sm:$0xff] %vm933_vm1, %v2595_v26 }
 0x621 PF: > { %s41_s4 = sadd.s32 1, %s4088_s4  }
 0x622   : > { %p38_p9 = scmp.ge.s32.totalorder %s41_s4, 4  }
 0x624   :  { %40 = sbr.rel (!%p38_p9) target bundleno = 19 (0x13), region = 203 }
 0x629   :  { %2620 = vsyncpa [#allocation4], 1 }
 0x62a   :  { %2622 = vsyncpa [#allocation4 + $0x1], 1 }
 0x62b   :  { %2623 = vsyncpa [#allocation6], 1 }
 0x62c   :  { %2624 = vsyncpa [#allocation9], 1 }
 0x62d   :  { %2625 = vsyncpa [#allocation12], 1 }
 0x62e   :  { %2626 = vsyncpa [#allocation15], 1 }
 0x62f   :  { %2627 = vsyncpa [#allocation18], 1 }
 0x630   :  { %2628 = vsyncpa [#allocation21], 1 }
 0x631   :  { %2629 = vsyncpa [#allocation24], 1 }

// kernel: tpu_custom_call.1
= control target key start
LH: loop header
LB: loop body
LE: loop exit
PB: predicated region body
PF: predicated region fallthrough
CT: control target
= control target key end

     0   :  { %s4743_s0 = inlined_call_operand.vmem [shape: f32[32,8], index: 0, kind: input, shape index: {}]   ;;  %s4744_s1 = inlined_call_operand.hbm [shape: bf16[128,128], index: 1, kind: input, shape index: {}]   ;;  %s4745_s2 = inlined_call_operand.hbm [shape: bf16[128,128], index: 2, kind: input, shape index: {}]   ;;  %s4746_s3 = inlined_call_operand.vmem [shape: f32[1,128], index: 3, kind: input, shape index: {}]   ;;  %s4747_s4 = inlined_call_operand.hbm [shape: bf16[128,128], index: 4, kind: input, shape index: {}]   ;;  %s4748_s5 = inlined_call_operand.hbm [shape: bf16[128,128], index: 5, kind: input, shape index: {}]   ;;  %s4749_s6 = inlined_call_operand.vmem [shape: f32[1,128], index: 6, kind: input, shape index: {}]   ;;  %s4750_s7 = inlined_call_operand.hbm [shape: bf16[128,128], index: 7, kind: input, shape index: {}]   ;;  %s4751_s8 = inlined_call_operand.vmem [shape: f32[1,128], index: 8, kind: input, shape index: {}]   ;;  %s4752_s9 = inlined_call_operand.hbm [shape: bf16[128,128], index: 9, kind: input, shape index: {}]   ;;  %s4753_s10 = inlined_call_operand.hbm [shape: bf16[128,128], index: 10, kind: input, shape index: {}]   ;;  %s4754_s11 = inlined_call_operand.hbm [shape: f32[1,128], index: 11, kind: input, shape index: {}]   ;;  %s4755_s12 = inlined_call_operand.hbm [shape: bf16[128,128], index: 12, kind: input, shape index: {}]   ;;  %s4756_s13 = inlined_call_operand.hbm [shape: bf16[128,128], index: 13, kind: input, shape index: {}]   ;;  %s4757_s14 = inlined_call_operand.hbm [shape: f32[1,128], index: 14, kind: input, shape index: {}]   ;;  %s4758_s15 = inlined_call_operand.vmem [shape: bf16[128,128], index: 15, kind: input, shape index: {}]   ;;  %s4759_s16 = inlined_call_operand.hbm [shape: bf16[128,128], index: 16, kind: input, shape index: {}]   ;;  %s4760_s17 = inlined_call_operand.vmem [shape: f32[1,128], index: 17, kind: input, shape index: {}]   ;;  %s4761_s18 = inlined_call_operand.hbm [shape: bf16[128,128], index: 18, kind: input, shape index: {}]   ;;  %s4762_s19 = inlined_call_operand.hbm [shape: bf16[128,128], index: 19, kind: input, shape index: {}]   ;;  %s4763_s20 = inlined_call_operand.vmem [shape: f32[1,128], index: 20, kind: input, shape index: {}]   ;;  %s4764_s21 = inlined_call_operand.hbm [shape: bf16[128,128], index: 21, kind: input, shape index: {}]   ;;  %s4765_s22 = inlined_call_operand.vmem [shape: f32[1,128], index: 22, kind: input, shape index: {}]   ;;  %s4766_s23 = inlined_call_operand.vmem [shape: f32[32,8], index: 23, kind: output, shape index: {}]  }
   0x1   :  { %4773 = sst [smem:[#allocation34_spill]] %s4743_s0 }
   0x2   :  { %4774 = sst [smem:[#allocation35_spill]] %s4744_s1 }
   0x3   :  { %4775 = sst [smem:[#allocation36_spill]] %s4745_s2 }
   0x4   :  { %4776 = sst [smem:[#allocation37_spill]] %s4746_s3 }
   0x5   :  { %4777 = sst [smem:[#allocation38_spill]] %s4747_s4 }
   0x6   :  { %4778 = sst [smem:[#allocation39_spill]] %s4748_s5 }
   0x7   :  { %4779 = sst [smem:[#allocation40_spill]] %s4749_s6 }
   0x8   :  { %4780 = sst [smem:[#allocation41_spill]] %s4750_s7 }
   0x9   :  { %4781 = sst [smem:[#allocation42_spill]] %s4752_s9 }
   0xa   :  { %4782 = sst [smem:[#allocation43_spill]] %s4766_s23 }
   0xb   :  { %28 = vsyncpa [#allocation4], 0 }
   0xc   :  { %29 = vsyncpa [#allocation6], 0 }
   0xd   :  { %30 = vsyncpa [#allocation9], 0 }
   0xe   :  { %31 = vsyncpa [#allocation12], 0 }
   0xf   :  { %32 = vsyncpa [#allocation15], 0 }
  0x10   :  { %33 = vsyncpa [#allocation18], 0 }
  0x11   :  { %34 = vsyncpa [#allocation21], 0 }
  0x12   :  { %35 = vsyncpa [#allocation24], 0  ;;  %s4230_s4 = smov 0  }
  0x13 LB: > { %s4767_s30 = sadd.s32 4294967295, %s4088_s4   ;;  %p2801_p0 = scmp.ge.s32.totalorder %s4088_s4, 1  ;;  %s4088_s4 = sphi %s4230_s4, %s41_s4  }
  0x14   : > { %p560_p1 = scmp.lt.s32.totalorder %s4088_s4, 3  ;;  %p4240_p2 = scmp.eq.s32.totalorder %s4767_s30, 0 }
  0x15   : > { %s4090_s5 = smov [#allocation5]   ;;  %s4091_s26 = smov [#allocation8]  }
  0x16   : > { %s4783_s24 = scalar_select %p4240_p2, 1, 0 }
  0x17   : > { %p4244_p3 = pnand %p2801_p0, %p560_p1  ;;  %s585_s1 = sshll.u32 %s4090_s5, 4  ;;  %s586_s1 = int_to_ptr.vmem [resolvable:$true] %s585_s1 }
  0x18   : > { %s614_s2 = sshll.u32 %s4091_s26, 4  ;;  %s4092_s27 = smov [#allocation11]   ;;  %s4250_s2 = int_to_ptr.vmem [resolvable:$true] %s614_s2 }
  0x19   : > { %s4784_s25 = scalar_select %p4244_p3, 1, 0 }
  0x1a   : > { %p3444_p4 = pneg %p4244_p3  ;;  %s646_s7 = sshll.u32 %s4092_s27, 4  ;;  %s4258_s7 = int_to_ptr.vmem [resolvable:$true] %s646_s7 }
  0x1b   : > { %s4093_s28 = smov [#allocation14]   ;;  %s3671_s0 = scalar_lea.vmem %s586_s1, 1024 }
  0x1c   : > { %p4254_p5 = pnand %p4240_p2, %p3444_p4  ;;  %s4260_s29 = sshll.u32 %s4093_s28, 4  ;;  %s674_s29 = int_to_ptr.vmem [resolvable:$true] %s4260_s29 }
  0x1d   : > { %p3672_p7 = scmp.ne.s32.totalorder %s586_s1, %s3671_s0  ;;  %p3679_p10 = scmp.lt.s32.totalorder %s586_s1, %s586_s1 }
  0x1e   : > { %p4264_p6 = pneg %p4254_p5  ;;  %p3680_p11 = scmp.lt.s32.totalorder %s3671_s0, %s3671_s0 }
  0x20   : > { %p3674_p8 = pnand %p3672_p7, %p4264_p6  ;;  %p3681_p12 = por %p3680_p11, %p3679_p10 }
  0x22   : > { %p3675_p9 = pneg %p3674_p8 }
  0x24   : > { %p3682_p13 = pnand %p3681_p12, %p3675_p9 }
  0x26   : > { %3685 = shalt.err (!%p3682_p13)
}
  0x27   : > { %s4768_s5 = smov 64   ;;  %s4095_s26 = smov 4  }
  0x28   : > { %s4787_s30 = sld [smem:[#allocation36_spill]]  ;;  %s3697_s23 = scalar_lea.vmem %s4250_s2, 1024 }
  0x29   : > { %p3698_p0 = scmp.ne.s32.totalorder %s4250_s2, %s3697_s23  ;;  %p3705_p7 = scmp.lt.s32.totalorder %s4250_s2, %s4250_s2 }
  0x2a   : > { %p3706_p8 = scmp.lt.s32.totalorder %s3697_s23, %s3697_s23 }
  0x2b   : > { %p3700_p1 = pnand %p3698_p0, %p4264_p6 }
  0x2c   : > { %p3707_p9 = por %p3706_p8, %p3705_p7 }
  0x2d   : > { %p3701_p4 = pneg %p3700_p1 }
  0x2e   : > { %3450 = dma.hbm_to_vmem [thread:$0]  (!%p4254_p5), %s4787_s30, 1024, %s586_s1, [#allocation6], %s4768_s5, %s4768_s5, %s4095_s26  }
  0x2f   : > { %p3708_p10 = pnand %p3707_p9, %p3701_p4 }
  0x31   : > { %3711 = shalt.err (!%p3708_p10)
}
  0x32   : > { %s4788_s30 = sld [smem:[#allocation39_spill]]  ;;  %s3723_s1 = scalar_lea.vmem %s4258_s7, 1024 }
  0x33   : > { %p3724_p11 = scmp.ne.s32.totalorder %s4258_s7, %s3723_s1  ;;  %p3731_p0 = scmp.lt.s32.totalorder %s4258_s7, %s4258_s7 }
  0x34   : > { %p3732_p1 = scmp.lt.s32.totalorder %s3723_s1, %s3723_s1 }
  0x35   : > { %p3726_p12 = pnand %p3724_p11, %p4264_p6 }
  0x36   : > { %p3733_p4 = por %p3732_p1, %p3731_p0 }
  0x37   : > { %p3727_p13 = pneg %p3726_p12 }
  0x38   : > { %3456 = dma.hbm_to_vmem [thread:$0]  (!%p4254_p5), %s4788_s30, 1024, %s4250_s2, [#allocation9], %s4768_s5, %s4768_s5, %s4095_s26  }
  0x39   : > { %p3734_p7 = pnand %p3733_p4, %p3727_p13 }
  0x3b   : > { %3737 = shalt.err (!%p3734_p7)
}
  0x3c   : > { %s4789_s9 = sld [smem:[#allocation42_spill]]  ;;  %s3749_s2 = scalar_lea.vmem %s674_s29, 16 }
  0x3d   : > { %p3750_p8 = scmp.ne.s32.totalorder %s674_s29, %s3749_s2  ;;  %s3756_s0 = scalar_lea.vmem %s674_s29, 32 }
  0x3e   : > { %p3757_p11 = scmp.lt.s32.totalorder %s674_s29, %s674_s29  ;;  %p3758_p12 = scmp.lt.s32.totalorder %s3756_s0, %s3749_s2 }
  0x3f   : > { %p3752_p9 = pnand %p3750_p8, %p4264_p6 }
  0x40   : > { %p3759_p13 = por %p3758_p12, %p3757_p11 }
  0x41   : > { %p3753_p10 = pneg %p3752_p9 }
  0x42   : > { %3462 = dma.hbm_to_vmem [thread:$0]  (!%p4254_p5), %s4789_s9, 1024, %s4258_s7, [#allocation12], %s4768_s5, %s4768_s5, %s4095_s26  }
  0x43   : > { %p3760_p0 = pnand %p3759_p13, %p3753_p10 }
  0x45   : > { %3763 = shalt.err (!%p3760_p0)
}
  0x46   : > { %3468 = dma.hbm_to_vmem [thread:$0]  (!%p4254_p5), %s4754_s11, 16, %s674_s29, [#allocation15]  }
  0x47   : > { %s4096_s7 = smov [#allocation17]   ;;  %s4097_s23 = smov [#allocation20]  }
  0x48   : > { %s696_s1 = sshll.u32 %s4096_s7, 4  ;;  %s723_s28 = sshll.u32 %s4097_s23, 4  ;;  %s697_s1 = int_to_ptr.vmem [resolvable:$true] %s696_s1  ;;  %s724_s28 = int_to_ptr.vmem [resolvable:$true] %s723_s28 }
  0x49   : > { %s3775_s5 = scalar_lea.vmem %s697_s1, 1024  ;;  %p3783_p8 = scmp.lt.s32.totalorder %s697_s1, %s697_s1 }
  0x4a   : > { %p3776_p1 = scmp.ne.s32.totalorder %s697_s1, %s3775_s5  ;;  %p3784_p9 = scmp.lt.s32.totalorder %s3775_s5, %s3775_s5 }
  0x4c   : > { %p3778_p4 = pnand %p3776_p1, %p4264_p6  ;;  %p3785_p10 = por %p3784_p9, %p3783_p8 }
  0x4e   : > { %p3779_p7 = pneg %p3778_p4 }
  0x50   : > { %p3786_p11 = pnand %p3785_p10, %p3779_p7 }
  0x52   : > { %3789 = shalt.err (!%p3786_p11)
}
  0x53   : > { %s4790_s2 = smov 64   ;;  %s3801_s27 = scalar_lea.vmem %s724_s28, 1024 }
  0x54   : > { %3474 = dma.hbm_to_vmem [thread:$0]  (!%p4254_p5), %s4756_s13, 1024, %s697_s1, [#allocation18], %s4790_s2, %s4790_s2, %s4095_s26  }
  0x55   : > { %p3802_p12 = scmp.ne.s32.totalorder %s724_s28, %s3801_s27  ;;  %p3809_p1 = scmp.lt.s32.totalorder %s724_s28, %s724_s28 }
  0x56   : > { %p3810_p4 = scmp.lt.s32.totalorder %s3801_s27, %s3801_s27 }
  0x57   : > { %p3804_p13 = pnand %p3802_p12, %p4264_p6 }
  0x58   : > { %p3811_p7 = por %p3810_p4, %p3809_p1 }
  0x59   : > { %p3805_p0 = pneg %p3804_p13 }
  0x5b   : > { %p3812_p8 = pnand %p3811_p7, %p3805_p0 }
  0x5d   : > { %3815 = shalt.err (!%p3812_p8)
}
  0x5e   : > { %3480 = dma.hbm_to_vmem [thread:$0]  (!%p4254_p5), %s4759_s16, 1024, %s724_s28, [#allocation21], %s4790_s2, %s4790_s2, %s4095_s26  }
  0x5f   : > { %s4098_s7 = smov [#allocation23]   ;;  %s4099_s23 = smov [#allocation3]  }
  0x60   : > { %s752_s1 = sshll.u32 %s4098_s7, 4  ;;  %s572_s29 = sshll.u32 %s4099_s23, 4  ;;  %s753_s1 = int_to_ptr.vmem [resolvable:$true] %s752_s1  ;;  %s573_s29 = int_to_ptr.vmem [resolvable:$true] %s572_s29 }
  0x61   : > { %s3827_s0 = scalar_lea.vmem %s753_s1, 1024  ;;  %p3835_p12 = scmp.lt.s32.totalorder %s753_s1, %s753_s1 }
  0x62   : > { %p3828_p9 = scmp.ne.s32.totalorder %s753_s1, %s3827_s0  ;;  %p3836_p13 = scmp.lt.s32.totalorder %s3827_s0, %s3827_s0 }
  0x64   : > { %p3830_p10 = pnand %p3828_p9, %p4264_p6  ;;  %p3837_p0 = por %p3836_p13, %p3835_p12 }
  0x66   : > { %p3831_p11 = pneg %p3830_p10 }
  0x68   : > { %p3838_p1 = pnand %p3837_p0, %p3831_p11 }
  0x6a   : > { %3841 = shalt.err (!%p3838_p1)
}
  0x6b   : > { %3486 = dma.hbm_to_vmem [thread:$0]  (!%p4254_p5), %s4762_s19, 1024, %s753_s1, [#allocation24], %s4790_s2, %s4790_s2, %s4095_s26  }
  0x6c   : > { %s3853_s5 = scalar_lea.vmem %s573_s29, 1024  ;;  %p3861_p9 = scmp.lt.s32.totalorder %s573_s29, %s573_s29 }
  0x6d   : > { %p3854_p4 = scmp.ne.s32.totalorder %s573_s29, %s3853_s5  ;;  %p3862_p10 = scmp.lt.s32.totalorder %s3853_s5, %s3853_s5 }
  0x6f   : > { %p3856_p7 = pnand %p3854_p4, %p4264_p6  ;;  %p3863_p11 = por %p3862_p10, %p3861_p9 }
  0x71   : > { %p3857_p8 = pneg %p3856_p7 }
  0x73   : > { %p3864_p12 = pnand %p3863_p11, %p3857_p8 }
  0x75   : > { %3867 = shalt.err (!%p3864_p12)
}
  0x76   : > { %s4791_s23 = sld [smem:[#allocation35_spill]]  ;;  %s4100_s1 = smov [#allocation7]  }
  0x77   : > { %s601_s0 = sshll.u32 %s4100_s1, 4  ;;  %s4101_s28 = smov [#allocation10]   ;;  %s602_s0 = int_to_ptr.vmem [resolvable:$true] %s601_s0 }
  0x78   : > { %s630_s27 = sshll.u32 %s4101_s28, 4  ;;  %s3879_s9 = scalar_lea.vmem %s602_s0, 1024  ;;  %s631_s27 = int_to_ptr.vmem [resolvable:$true] %s630_s27 }
  0x79   : > { %p3880_p13 = scmp.ne.s32.totalorder %s602_s0, %s3879_s9  ;;  %p3887_p4 = scmp.lt.s32.totalorder %s602_s0, %s602_s0 }
  0x7a   : > { %p3888_p7 = scmp.lt.s32.totalorder %s3879_s9, %s3879_s9 }
  0x7b   : > { %p3882_p0 = pnand %p3880_p13, %p4264_p6 }
  0x7c   : > { %3447 = dma.hbm_to_vmem [thread:$0]  (!%p4254_p5), %s4791_s23, 1024, %s573_s29, [#allocation4], %s4790_s2, %s4790_s2, %s4095_s26  }
  0x7d   : > { %p3883_p1 = pneg %p3882_p0  ;;  %p3889_p8 = por %p3888_p7, %p3887_p4 }
  0x7f   : > { %p3890_p9 = pnand %p3889_p8, %p3883_p1 }
  0x81   : > { %3893 = shalt.err (!%p3890_p9)
}
  0x82   : > { %s4792_s30 = sld [smem:[#allocation38_spill]]  ;;  %s3905_s7 = scalar_lea.vmem %s631_s27, 1024 }
  0x83   : > { %p3906_p10 = scmp.ne.s32.totalorder %s631_s27, %s3905_s7  ;;  %p3913_p13 = scmp.lt.s32.totalorder %s631_s27, %s631_s27 }
  0x84   : > { %p3914_p0 = scmp.lt.s32.totalorder %s3905_s7, %s3905_s7 }
  0x85   : > { %p3908_p11 = pnand %p3906_p10, %p4264_p6 }
  0x86   : > { %p3915_p1 = por %p3914_p0, %p3913_p13 }
  0x87   : > { %p3909_p12 = pneg %p3908_p11 }
  0x88   : > { %3453 = dma.hbm_to_vmem [thread:$0]  (!%p4254_p5), %s4792_s30, 1024, %s602_s0, [#allocation6], %s4790_s2, %s4790_s2, %s4095_s26  }
  0x89   : > { %p3916_p4 = pnand %p3915_p1, %p3909_p12 }
  0x8b   : > { %3919 = shalt.err (!%p3916_p4)
}
  0x8c   : > { %s4793_s1 = sld [smem:[#allocation41_spill]]  ;;  %s4102_s0 = smov [#allocation13]  }
  0x8d   : > { %s659_s28 = sshll.u32 %s4102_s0, 4  ;;  %s4103_s29 = smov [#allocation16]   ;;  %s660_s28 = int_to_ptr.vmem [resolvable:$true] %s659_s28 }
  0x8e   : > { %s683_s5 = sshll.u32 %s4103_s29, 4  ;;  %s3931_s30 = scalar_lea.vmem %s660_s28, 1024  ;;  %s684_s5 = int_to_ptr.vmem [resolvable:$true] %s683_s5 }
  0x8f   : > { %p3932_p7 = scmp.ne.s32.totalorder %s660_s28, %s3931_s30  ;;  %p3939_p10 = scmp.lt.s32.totalorder %s660_s28, %s660_s28 }
  0x90   : > { %p3940_p11 = scmp.lt.s32.totalorder %s3931_s30, %s3931_s30 }
  0x91   : > { %p3934_p8 = pnand %p3932_p7, %p4264_p6 }
  0x92   : > { %3459 = dma.hbm_to_vmem [thread:$0]  (!%p4254_p5), %s4793_s1, 1024, %s631_s27, [#allocation9], %s4790_s2, %s4790_s2, %s4095_s26  }
  0x93   : > { %p3935_p9 = pneg %p3934_p8  ;;  %p3941_p12 = por %p3940_p11, %p3939_p10 }
  0x95   : > { %p3942_p13 = pnand %p3941_p12, %p3935_p9 }
  0x97   : > { %3945 = shalt.err (!%p3942_p13)
}
  0x98   : > { %3465 = dma.hbm_to_vmem [thread:$0]  (!%p4254_p5), %s4753_s10, 1024, %s660_s28, [#allocation12], %s4790_s2, %s4790_s2, %s4095_s26  }
  0x99   : > { %s3957_s9 = scalar_lea.vmem %s684_s5, 1024  ;;  %p3965_p7 = scmp.lt.s32.totalorder %s684_s5, %s684_s5 }
  0x9a   : > { %p3958_p0 = scmp.ne.s32.totalorder %s684_s5, %s3957_s9  ;;  %p3966_p8 = scmp.lt.s32.totalorder %s3957_s9, %s3957_s9 }
  0x9c   : > { %p3960_p1 = pnand %p3958_p0, %p4264_p6  ;;  %p3967_p9 = por %p3966_p8, %p3965_p7 }
  0x9e   : > { %p3961_p4 = pneg %p3960_p1 }
  0xa0   : > { %p3968_p10 = pnand %p3967_p9, %p3961_p4 }
  0xa2   : > { %3971 = shalt.err (!%p3968_p10)
}
  0xa3   : > { %3471 = dma.hbm_to_vmem [thread:$0]  (!%p4254_p5), %s4755_s12, 1024, %s684_s5, [#allocation15], %s4790_s2, %s4790_s2, %s4095_s26  }
  0xa4   : > { %s4104_s0 = smov [#allocation19]   ;;  %s4105_s29 = smov [#allocation22]  }
  0xa5   : > { %s710_s28 = sshll.u32 %s4104_s0, 4  ;;  %s739_s30 = sshll.u32 %s4105_s29, 4  ;;  %s711_s28 = int_to_ptr.vmem [resolvable:$true] %s710_s28  ;;  %s740_s30 = int_to_ptr.vmem [resolvable:$true] %s739_s30 }
  0xa6   : > { %s3983_s27 = scalar_lea.vmem %s711_s28, 16  ;;  %s3990_s7 = scalar_lea.vmem %s711_s28, 32 }
  0xa7   : > { %p3984_p11 = scmp.ne.s32.totalorder %s711_s28, %s3983_s27  ;;  %p3991_p0 = scmp.lt.s32.totalorder %s711_s28, %s711_s28 }
  0xa8   : > { %p3992_p1 = scmp.lt.s32.totalorder %s3990_s7, %s3983_s27 }
  0xa9   : > { %p3986_p12 = pnand %p3984_p11, %p4264_p6 }
  0xaa   : > { %p3993_p4 = por %p3992_p1, %p3991_p0 }
  0xab   : > { %p3987_p13 = pneg %p3986_p12 }
  0xad   : > { %p3994_p7 = pnand %p3993_p4, %p3987_p13 }
  0xaf   : > { %3997 = shalt.err (!%p3994_p7)
}
  0xb0   : > { %3477 = dma.hbm_to_vmem [thread:$0]  (!%p4254_p5), %s4757_s14, 16, %s711_s28, [#allocation18]  }
  0xb1   : > { %s4009_s23 = scalar_lea.vmem %s740_s30, 1024  ;;  %p4017_p11 = scmp.lt.s32.totalorder %s740_s30, %s740_s30 }
  0xb2   : > { %p4010_p8 = scmp.ne.s32.totalorder %s740_s30, %s4009_s23  ;;  %p4018_p12 = scmp.lt.s32.totalorder %s4009_s23, %s4009_s23 }
  0xb4   : > { %p4012_p9 = pnand %p4010_p8, %p4264_p6  ;;  %p4019_p2 = por %p4018_p12, %p4017_p11 }
  0xb6   : > { %p4013_p10 = pneg %p4012_p9 }
  0xb8   : > { %p4020_p3 = pnand %p4019_p2, %p4013_p10 }
  0xba   : > { %4023 = shalt.err (!%p4020_p3)
}
  0xbb   : > { %3483 = dma.hbm_to_vmem [thread:$0]  (!%p4254_p5), %s4761_s18, 1024, %s740_s30, [#allocation21], %s4790_s2, %s4790_s2, %s4095_s26  }
  0xbc   : > { %s4106_s28 = smov [#allocation25]  }
  0xbd   : > { %s768_s29 = sshll.u32 %s4106_s28, 4  ;;  %s769_s29 = int_to_ptr.vmem [resolvable:$true] %s768_s29 }
  0xbe   : > { %s4035_s27 = scalar_lea.vmem %s769_s29, 1024  ;;  %p4043_p2 = scmp.lt.s32.totalorder %s769_s29, %s769_s29 }
  0xbf   : > { %p4036_p13 = scmp.ne.s32.totalorder %s769_s29, %s4035_s27  ;;  %p4044_p3 = scmp.lt.s32.totalorder %s4035_s27, %s4035_s27 }
  0xc1   : > { %p4038_p0 = pnand %p4036_p13, %p4264_p6  ;;  %p4045_p4 = por %p4044_p3, %p4043_p2 }
  0xc3   : > { %p4039_p1 = pneg %p4038_p0 }
  0xc5   : > { %p4046_p7 = pnand %p4045_p4, %p4039_p1 }
  0xc7   : > { %4049 = shalt.err (!%p4046_p7)
}
  0xc8   : > { %3489 = dma.hbm_to_vmem [thread:$0]  (!%p4254_p5), %s4764_s21, 1024, %s769_s29, [#allocation24], %s4790_s2, %s4790_s2, %s4095_s26  }
  0xc9   : > { %p4794_p8 = scmp.ne.s32.totalorder %s4784_s25, 0 }
  0xca   : > { %p4795_p6 = scmp.ne.s32.totalorder (!%p4794_p8), %s4783_s24, 0 }
  0xcb   : > { %796 = sbr.rel (%p4794_p8) target bundleno = 1569 (0x621), region = 112 }
  0xd0   : > { %4055 = dma.done.wait (%p4795_p6), [#allocation4], 1024  }
  0xd1   : > { %4057 = vsyncadd (%p4795_p6), [#allocation4], 4294966272 }
  0xd2   : > { %4059 = dma.done.wait (%p4795_p6), [#allocation6], 2048  }
  0xd3   : > { %4061 = vsyncadd (%p4795_p6), [#allocation6], 4294965248 }
  0xd4   : > { %4063 = dma.done.wait (%p4795_p6), [#allocation9], 2048  }
  0xd5   : > { %4065 = vsyncadd (%p4795_p6), [#allocation9], 4294965248 }
  0xd6   : > { %4067 = dma.done.wait (%p4795_p6), [#allocation12], 2048  }
  0xd7   : > { %4069 = vsyncadd (%p4795_p6), [#allocation12], 4294965248 }
  0xd8   : > { %4071 = dma.done.wait (%p4795_p6), [#allocation15], 1040  }
  0xd9   : > { %4073 = vsyncadd (%p4795_p6), [#allocation15], 4294966256 }
  0xda   : > { %4075 = dma.done.wait (%p4795_p6), [#allocation18], 1040  }
  0xdb   : > { %4077 = vsyncadd (%p4795_p6), [#allocation18], 4294966256 }
  0xdc   : > { %4079 = dma.done.wait (%p4795_p6), [#allocation21], 2048  }
  0xdd   : > { %4081 = vsyncadd (%p4795_p6), [#allocation21], 4294965248 }
  0xde   : > { %4083 = dma.done.wait (%p4795_p6), [#allocation24], 2048  }
  0xdf   : > { %4085 = vsyncadd (%p4795_p6), [#allocation24], 4294965248  ;;  %v4107_v0 = vmov 0.0   ;;  %vm4108_vm0 = vmmov 0   ;;  %s4796_s25 = sadd.s32 4294967295, %s4088_s4   ;;  %v3548_v1 = vld [vmem:[#allocation3 + $0x38] sm:$0xff]   ;;  %v938_v8 = vlaneseq }
  0xe0   : > { %3104 = vmatprep.subr.bf16.mxu0 %v4107_v0  ;;  %929 = vst [vmem:[#allocation2] sm:$0xff] %v4107_v0  ;;  %930 = vst [vmem:[#allocation2 + $0x8] sm:$0xff] %v4107_v0  ;;  %3124 = vmatprep.subr.bf16.mxu1 %v4107_v0  ;;  %s2834_s24 = sshll.u32 %s4796_s25, 1  ;;  %v3549_v2 = vld [vmem:[#allocation5 + $0x38] sm:$0xff]   ;;  %v3550_v3 = vld [vmem:[#allocation3 + $0x30] sm:$0xff]   ;;  %s4797_s2 = sld [smem:[#allocation34_spill]] }
  0xe1   : > { %3120 = vmatprep.mubr.msk.bf16.mxu0 %vm4108_vm0, %v4107_v0  ;;  %3140 = vmatprep.mubr.msk.bf16.mxu1 %vm4108_vm0, %v4107_v0  ;;  %p917_p5 = scmp.lt.s32.totalorder %s2834_s24, 3  ;;  %v3551_v4 = vld [vmem:[#allocation5 + $0x30] sm:$0xff]   ;;  %v3552_v5 = vld [vmem:[#allocation3 + $0x28] sm:$0xff]   ;;  %v3554_v7 = vld [vmem:[#allocation3 + $0x20] sm:$0xff]   ;;  %vm933_vm1 = vcmask 64512   ;;  %v4481_v11 = vshrl.u32 %v938_v8, 7 }
  0xe2   : > { %3105 = vmatpush3.bf16.msra.mxu0 %v3548_v1  ;;  %3125 = vmatpush3.bf16.msra.mxu1 %v3549_v2  ;;  %v3553_v6 = vld [vmem:[#allocation5 + $0x28] sm:$0xff]   ;;  %v3555_v9 = vld [vmem:[#allocation5 + $0x20] sm:$0xff]   ;;  %v3556_v10 = vld [vmem:[#allocation3 + $0x18] sm:$0xff]   ;;  %vm4109_vm4 = vmmov 1   ;;  %s4800_s1 = sld [smem:[#allocation37_spill]] }
  0xe3   : > { %3106 = vmatprep.subr.bf16.mxu0 %v4107_v0  ;;  %3126 = vmatprep.subr.bf16.mxu1 %v4107_v0  ;;  %s4808_s24 = smov (!%p917_p5, %s2834_s24), 3  ;;  %v3557_v12 = vld [vmem:[#allocation5 + $0x18] sm:$0xff]   ;;  %v3558_v15 = vld [vmem:[#allocation3 + $0x10] sm:$0xff]   ;;  %v4488_v16 = vand.u32 15, %v4481_v11  ;;  %v3560_v18 = vld [vmem:[#allocation3 + $0x8] sm:$0xff]   ;;  %vm990_vm3 = vcmp.lt.s32.totalorder %v4481_v11, 1 }
  0xe4   : > { %s2835_s6 = sshll.u32 %s4808_s24, 3  ;;  %v3559_v17 = vld [vmem:[#allocation5 + $0x10] sm:$0xff]   ;;  %v3561_v19 = vld [vmem:[#allocation5 + $0x8] sm:$0xff]   ;;  %v3562_v20 = vld [vmem:[#allocation3] sm:$0xff]   ;;  %s4801_s29 = sld [smem:[#allocation40_spill]]  ;;  %vm1571_vm6 = vcmp.lt.s32.totalorder %v4481_v11, 2 }
  0xe5   : > { %vm966_vm2 = vcmp.ge.s32.totalorder %v4488_v16, 1  ;;  %v3563_v23 = vld [vmem:[#allocation5] sm:$0xff]   ;;  %v3565_v29 = vld [vmem:[#allocation7 + $0x38] sm:$0xff]   ;;  %v3567_v33 = vld [vmem:[#allocation7 + $0x30] sm:$0xff]   ;;  %vm1547_vm7 = vcmp.ge.s32.totalorder %v4488_v16, 2  ;;  %vm2040_vm9 = vcmp.lt.s32.totalorder %v4481_v11, 4 }
  0xe6   : > { %3107 = vmatpush3.bf16.msra.mxu0 %v3550_v3  ;;  %3127 = vmatpush3.bf16.msra.mxu1 %v3551_v4  ;;  %s920_s9 = scalar_lea.vmem %s4797_s2, %s2835_s6  ;;  %vm4497_vm5 = vmpackc.low %vm4109_vm4, %vm966_vm2  ;;  %v3564_v31 = vld [vmem:[#allocation8 + $0x38] sm:$0xff]   ;;  %v3566_v34 = vld [vmem:[#allocation8 + $0x30] sm:$0xff]   ;;  %vm2016_vm10 = vcmp.ge.s32.totalorder %v4488_v16, 4  ;;  %s4806_s28 = sld [smem:[#allocation43_spill]] }
  0xe7   : > { %3108 = vmatprep.subr.bf16.mxu0 %v4107_v0  ;;  %3128 = vmatprep.subr.bf16.mxu1 %v4107_v0  ;;  %v931_v13 = vld [vmem:[%s920_s9] sm:$0xff]  ;;  %v932_v14 = vld [vmem:[%s920_s9 + $0x8] sm:$0xff]  ;;  %v3569_v35 = vld [vmem:[#allocation7 + $0x28] sm:$0xff]  }
  0xe8   : > { %934 = vst.msk [vmem:[#allocation2] sm:$0xff] %vm933_vm1, %v931_v13  ;;  %935 = vst.msk [vmem:[#allocation2 + $0x8] sm:$0xff] %vm933_vm1, %v932_v14  ;;  %v3568_v36 = vld [vmem:[#allocation8 + $0x28] sm:$0xff]   ;;  %v3571_v37 = vld [vmem:[#allocation7 + $0x20] sm:$0xff]  }
  0xe9   : > { %v3570_v38 = vld [vmem:[#allocation8 + $0x20] sm:$0xff]   ;;  %v3572_v39 = vld [vmem:[#allocation8 + $0x18] sm:$0xff]   ;;  %v3574_v41 = vld [vmem:[#allocation8 + $0x10] sm:$0xff]  }
  0xea   : > { %3109 = vmatpush3.bf16.msra.mxu0 %v3552_v5  ;;  %3129 = vmatpush3.bf16.msra.mxu1 %v3553_v6  ;;  %v3573_v40 = vld [vmem:[#allocation7 + $0x18] sm:$0xff]   ;;  %v3575_v42 = vld [vmem:[#allocation7 + $0x10] sm:$0xff]   ;;  %v3576_v43 = vld [vmem:[#allocation8 + $0x8] sm:$0xff]  }
  0xeb   : > { %3110 = vmatprep.subr.bf16.mxu0 %v4107_v0  ;;  %3130 = vmatprep.subr.bf16.mxu1 %v4107_v0  ;;  %v3577_v44 = vld [vmem:[#allocation7 + $0x8] sm:$0xff]   ;;  %v3578_v45 = vld [vmem:[#allocation8] sm:$0xff]   ;;  %v2857_v49 = vld [vmem:[%s4800_s1] ss:$0 sm:$0xff] }
  0xec   : > { %v3579_v46 = vld [vmem:[#allocation7] sm:$0xff]   ;;  %v3580_v4 = vld [vmem:[#allocation10 + $0x38] sm:$0xff]   ;;  %v3581_v6 = vld [vmem:[#allocation10 + $0x30] sm:$0xff]  }
  0xed   : > { %v3583_v8 = vld [vmem:[#allocation10 + $0x20] sm:$0xff]   ;;  %v3588_v14 = vld [vmem:[#allocation13 + $0x38] sm:$0xff]   ;;  %v3599_v26 = vld [vmem:[#allocation11 + $0x10] sm:$0xff]  }
  0xee   : > { %3111 = vmatpush3.bf16.msra.mxu0 %v3554_v7  ;;  %3131 = vmatpush3.bf16.msra.mxu1 %v3555_v9  ;;  %v3582_v7 = vld [vmem:[#allocation10 + $0x28] sm:$0xff]   ;;  %v3584_v9 = vld [vmem:[#allocation10 + $0x18] sm:$0xff]   ;;  %v3587_v13 = vld [vmem:[#allocation10] sm:$0xff]  }
  0xef   : > { %3112 = vmatprep.subr.bf16.mxu0 %v4107_v0  ;;  %3132 = vmatprep.subr.bf16.mxu1 %v4107_v0  ;;  %v936_v21 = vld [vmem:[#allocation2] sm:$0xff]  ;;  %v937_v22 = vld [vmem:[#allocation2 + $0x8] sm:$0xff]  ;;  %vm4595_vm8 = vmpackc.low %vm4109_vm4, %vm1547_vm7 }
  0xf0   : > { %v988_v24 = vrot.slane %v936_v21, 7  ;;  %v989_v25 = vrot.slane %v937_v22, 7  ;;  %v4507_v32 = vpack.c.bf16 %v937_v22, %v936_v21  ;;  %v3594_v21 = vld [vmem:[#allocation13 + $0x20] sm:$0xff]   ;;  %vm4683_vm11 = vmpackc.low %vm4109_vm4, %vm2016_vm10 }
  0xf1   : > { %v3595_v22 = vld [vmem:[#allocation11 + $0x20] sm:$0xff]  }
  0xf2   : > { %3113 = vmatpush3.bf16.msra.mxu0 %v3556_v10  ;;  %3133 = vmatpush3.bf16.msra.mxu1 %v3557_v12  ;;  %v991_v27 = vsel %vm990_vm3, %v988_v24, %v989_v25  ;;  %v992_v28 = vsel %vm990_vm3, %v989_v25, %v988_v24  ;;  %v3585_v10 = vld [vmem:[#allocation10 + $0x10] sm:$0xff]   ;;  %v3586_v12 = vld [vmem:[#allocation10 + $0x8] sm:$0xff]   ;;  %v3597_v24 = vld [vmem:[#allocation11 + $0x18] sm:$0xff]  }
  0xf3   : > { %3114 = vmatprep.subr.bf16.mxu0 %v4107_v0  ;;  %3134 = vmatprep.subr.bf16.mxu1 %v4107_v0  ;;  %v2847_v30 = vpack.c.bf16 %v991_v27, %v992_v28  ;;  %v3598_v25 = vld [vmem:[#allocation13 + $0x10] sm:$0xff]   ;;  %v3600_v27 = vld [vmem:[#allocation13 + $0x8] sm:$0xff]  }
  0xf4   : > { %v3601_v28 = vld [vmem:[#allocation11 + $0x8] sm:$0xff]  }
  0xf5   : > { %v3655_v11 = vld [vmem:[#allocation25 + $0x20] sm:$0xff]  }
  0xf6   : > { %3115 = vmatpush3.bf16.msra.mxu0 %v3558_v15  ;;  %3135 = vmatpush3.bf16.msra.mxu1 %v3559_v17  ;;  %v3589_v15 = vld [vmem:[#allocation11 + $0x38] sm:$0xff]   ;;  %v3590_v17 = vld [vmem:[#allocation13 + $0x30] sm:$0xff]  }
  0xf7   : > { %3116 = vmatprep.subr.bf16.mxu0 %v4107_v0  ;;  %3136 = vmatprep.subr.bf16.mxu1 %v4107_v0 }
  0xfa   : > { %3117 = vmatpush3.bf16.msra.mxu0 %v3560_v18  ;;  %3137 = vmatpush3.bf16.msra.mxu1 %v3561_v19  ;;  %v3591_v18 = vld [vmem:[#allocation11 + $0x30] sm:$0xff]   ;;  %v3592_v19 = vld [vmem:[#allocation13 + $0x28] sm:$0xff]  }
  0xfb   : > { %3118 = vmatprep.subr.bf16.mxu0 %v4107_v0  ;;  %3138 = vmatprep.subr.bf16.mxu1 %v4107_v0 }
  0xfe   : > { %3119 = vmatpush3.bf16.msra.mxu0 %v3562_v20  ;;  %3139 = vmatpush3.bf16.msra.mxu1 %v3563_v23  ;;  %v3593_v20 = vld [vmem:[#allocation11 + $0x28] sm:$0xff]   ;;  %v3596_v23 = vld [vmem:[#allocation13 + $0x18] sm:$0xff]  }
  0xff   : > { %3144 = vmatprep.subr.bf16.mxu0 %v4107_v0  ;;  %3164 = vmatprep.subr.bf16.mxu1 %v4107_v0 }
 0x101   : > { %3121 = vmatmul.mubr.msk.bf16.vlgmr.msra.gmra.mxu0 %vm4497_vm5, %v2847_v30  ;;  %3141 = vmatmul.mubr.bf16.vlgmr.msra.gmra.mxu1 %v4507_v32  ;;  %v3603_v30 = vld [vmem:[#allocation11] sm:$0xff]  }
 0x102   : > { %3145 = vmatpush3.bf16.msra.mxu0 %v3565_v29  ;;  %3165 = vmatpush3.bf16.msra.mxu1 %v3564_v31  ;;  %v3602_v29 = vld [vmem:[#allocation13] sm:$0xff]  }
 0x103   : > { %3146 = vmatprep.subr.bf16.mxu0 %v4107_v0  ;;  %3166 = vmatprep.subr.bf16.mxu1 %v4107_v0 }
 0x104   : > { %3180 = vmatprep.mubr.msk.bf16.mxu1 %vm4108_vm0, %v4107_v0  ;;  %3160 = vmatprep.mubr.msk.bf16.mxu0 %vm4108_vm0, %v4107_v0 }
 0x106   : > { %3147 = vmatpush3.bf16.msra.mxu0 %v3567_v33  ;;  %3167 = vmatpush3.bf16.msra.mxu1 %v3566_v34 }
 0x107   : > { %3148 = vmatprep.subr.bf16.mxu0 %v4107_v0  ;;  %3168 = vmatprep.subr.bf16.mxu1 %v4107_v0 }
 0x10a   : > { %3149 = vmatpush3.bf16.msra.mxu0 %v3569_v35  ;;  %3169 = vmatpush3.bf16.msra.mxu1 %v3568_v36 }
 0x10b   : > { %3150 = vmatprep.subr.bf16.mxu0 %v4107_v0  ;;  %3170 = vmatprep.subr.bf16.mxu1 %v4107_v0 }
 0x10e   : > { %3151 = vmatpush3.bf16.msra.mxu0 %v3571_v37  ;;  %3171 = vmatpush3.bf16.msra.mxu1 %v3570_v38 }
 0x10f   : > { %3152 = vmatprep.subr.bf16.mxu0 %v4107_v0  ;;  %3172 = vmatprep.subr.bf16.mxu1 %v4107_v0 }
 0x112   : > { %3173 = vmatpush3.bf16.msra.mxu1 %v3572_v39  ;;  %3153 = vmatpush3.bf16.msra.mxu0 %v3573_v40  ;;  %v2877_v40 = vld [vmem:[%s4801_s29] ss:$0 sm:$0xff]  ;;  %s926_s29 = scalar_lea.vmem %s4806_s28, %s2835_s6 }
 0x113   : > { %3174 = vmatprep.subr.bf16.mxu1 %v4107_v0  ;;  %3154 = vmatprep.subr.bf16.mxu0 %v4107_v0 }
 0x116   : > { %3175 = vmatpush3.bf16.msra.mxu1 %v3574_v41  ;;  %3155 = vmatpush3.bf16.msra.mxu0 %v3575_v42 }
 0x117   : > { %3176 = vmatprep.subr.bf16.mxu1 %v4107_v0  ;;  %3156 = vmatprep.subr.bf16.mxu0 %v4107_v0 }
 0x11a   : > { %3177 = vmatpush3.bf16.msra.mxu1 %v3576_v43  ;;  %3157 = vmatpush3.bf16.msra.mxu0 %v3577_v44  ;;  %v2878_v43 = vld [vmem:[%s4751_s8] ss:$0 sm:$0xff] }
 0x11b   : > { %3178 = vmatprep.subr.bf16.mxu1 %v4107_v0  ;;  %3158 = vmatprep.subr.bf16.mxu0 %v4107_v0 }
 0x11e   : > { %3179 = vmatpush3.bf16.msra.mxu1 %v3578_v45  ;;  %3159 = vmatpush3.bf16.msra.mxu0 %v3579_v46 }
 0x11f   : > { %3204 = vmatprep.subr.bf16.mxu1 %v4107_v0  ;;  %3184 = vmatprep.subr.bf16.mxu0 %v4107_v0 }
 0x1c1   : > { %v1094_v47 = vpop.f32.mrf.mxu0  ;;  %v1183_v48 = vpop.f32.mrf.mxu1 }
 0x1c2   : > { %v1184_v50 = vadd.f32 %v1183_v48, %v1094_v47 }
 0x1c3   : > { %v3122_v51 = vpop.f32.mrf.mxu0  ;;  %v3142_v52 = vpop.f32.mrf.mxu1 }
 0x1c4   : > { %v1197_v53 = vadd.f32 %v2857_v49, %v1184_v50 }
 0x1c5   : > { %v1097_v54 = vpop.f32.mrf.mxu0  ;;  %v1186_v55 = vpop.f32.mrf.mxu1 }
 0x1c6   : > { %v1187_v56 = vadd.f32 %v1186_v55, %v1097_v54  ;;  %v1199_v59 = vmax.f32 %v1197_v53, 0.0 }
 0x1c7   : > { %v3123_v57 = vpop.f32.mrf.mxu0  ;;  %v3143_v58 = vpop.f32.mrf.mxu1 }
 0x1c8   : > { %v1198_v60 = vadd.f32 %v2857_v49, %v1187_v56  ;;  %v1218_v62 = vrot.slane %v1199_v59, 7  ;;  %v3604_v57 = vld [vmem:[#allocation17 + $0x38] sm:$0xff]  }
 0x1ca   : > { %v1200_v61 = vmax.f32 %v1198_v60, 0.0 }
 0x1cc   : > { %v1201_v63 = vpack.c.bf16 %v1200_v61, %v1199_v59  ;;  %v1219_v1 = vrot.slane %v1200_v61, 7 }
 0x1ce   : > { %v1220_v2 = vsel %vm990_vm3, %v1218_v62, %v1219_v1  ;;  %v1221_v3 = vsel %vm990_vm3, %v1219_v1, %v1218_v62  ;;  %3181 = vmatmul.mubr.bf16.vlgmr.msra.gmra.mxu1 %v1201_v63  ;;  %v3605_v1 = vld [vmem:[#allocation16 + $0x38] sm:$0xff]  }
 0x1cf   : > { %v2867_v5 = vpack.c.bf16 %v1220_v2, %v1221_v3  ;;  %3220 = vmatprep.mubr.msk.bf16.mxu1 %vm4108_vm0, %v4107_v0  ;;  %3205 = vmatpush3.bf16.msra.mxu1 %v3589_v15  ;;  %v3606_v3 = vld [vmem:[#allocation17 + $0x30] sm:$0xff]   ;;  %v3617_v15 = vld [vmem:[#allocation16 + $0x8] sm:$0xff]  }
 0x1d0   : > { %3206 = vmatprep.subr.bf16.mxu1 %v4107_v0 }
 0x1d1   : > { %3161 = vmatmul.mubr.msk.bf16.vlgmr.msra.gmra.mxu0 %vm4497_vm5, %v2867_v5  ;;  %v3608_v5 = vld [vmem:[#allocation17 + $0x28] sm:$0xff]  }
 0x1d2   : > { %3185 = vmatpush3.bf16.msra.mxu0 %v3580_v4  ;;  %3200 = vmatprep.mubr.msk.bf16.mxu0 %vm4108_vm0, %v4107_v0  ;;  %v3607_v4 = vld [vmem:[#allocation16 + $0x30] sm:$0xff]  }
 0x1d3   : > { %3186 = vmatprep.subr.bf16.mxu0 %v4107_v0  ;;  %3207 = vmatpush3.bf16.msra.mxu1 %v3591_v18  ;;  %v3619_v18 = vld [vmem:[#allocation16] sm:$0xff]  }
 0x1d4   : > { %3208 = vmatprep.subr.bf16.mxu1 %v4107_v0 }
 0x1d6   : > { %3187 = vmatpush3.bf16.msra.mxu0 %v3581_v6  ;;  %v3609_v6 = vld [vmem:[#allocation16 + $0x28] sm:$0xff]  }
 0x1d7   : > { %3188 = vmatprep.subr.bf16.mxu0 %v4107_v0  ;;  %3209 = vmatpush3.bf16.msra.mxu1 %v3593_v20 }
 0x1d8   : > { %3210 = vmatprep.subr.bf16.mxu1 %v4107_v0 }
 0x1da   : > { %3189 = vmatpush3.bf16.msra.mxu0 %v3582_v7  ;;  %v3610_v7 = vld [vmem:[#allocation17 + $0x20] sm:$0xff]  }
 0x1db   : > { %3190 = vmatprep.subr.bf16.mxu0 %v4107_v0  ;;  %3211 = vmatpush3.bf16.msra.mxu1 %v3595_v22  ;;  %v2906_v22 = vld [vmem:[#allocation14] ss:$0 sm:$0xff] }
 0x1dc   : > { %3212 = vmatprep.subr.bf16.mxu1 %v4107_v0 }
 0x1de   : > { %3191 = vmatpush3.bf16.msra.mxu0 %v3583_v8  ;;  %v3611_v8 = vld [vmem:[#allocation16 + $0x20] sm:$0xff]  }
 0x1df   : > { %3192 = vmatprep.subr.bf16.mxu0 %v4107_v0  ;;  %3213 = vmatpush3.bf16.msra.mxu1 %v3597_v24 }
 0x1e0   : > { %3214 = vmatprep.subr.bf16.mxu1 %v4107_v0 }
 0x1e2   : > { %3193 = vmatpush3.bf16.msra.mxu0 %v3584_v9  ;;  %v3612_v9 = vld [vmem:[#allocation17 + $0x18] sm:$0xff]  }
 0x1e3   : > { %3194 = vmatprep.subr.bf16.mxu0 %v4107_v0  ;;  %3215 = vmatpush3.bf16.msra.mxu1 %v3599_v26 }
 0x1e4   : > { %3216 = vmatprep.subr.bf16.mxu1 %v4107_v0 }
 0x1e6   : > { %3195 = vmatpush3.bf16.msra.mxu0 %v3585_v10  ;;  %v3613_v10 = vld [vmem:[#allocation16 + $0x18] sm:$0xff]  }
 0x1e7   : > { %3196 = vmatprep.subr.bf16.mxu0 %v4107_v0  ;;  %3217 = vmatpush3.bf16.msra.mxu1 %v3601_v28 }
 0x1e8   : > { %3218 = vmatprep.subr.bf16.mxu1 %v4107_v0 }
 0x1ea   : > { %3197 = vmatpush3.bf16.msra.mxu0 %v3586_v12  ;;  %v3614_v12 = vld [vmem:[#allocation17 + $0x10] sm:$0xff]  }
 0x1eb   : > { %3198 = vmatprep.subr.bf16.mxu0 %v4107_v0  ;;  %3219 = vmatpush3.bf16.msra.mxu1 %v3603_v30 }
 0x1ec   : > { %3244 = vmatprep.subr.bf16.mxu1 %v4107_v0 }
 0x1ee   : > { %3199 = vmatpush3.bf16.msra.mxu0 %v3587_v13  ;;  %v3615_v13 = vld [vmem:[#allocation16 + $0x10] sm:$0xff]  }
 0x1ef   : > { %3224 = vmatprep.subr.bf16.mxu0 %v4107_v0 }
 0x1f1   : > { %3201 = vmatmul.mubr.bf16.vlgmr.msra.gmra.mxu0 %v4507_v32 }
 0x1f2   : > { %3240 = vmatprep.mubr.msk.bf16.mxu0 %vm4108_vm0, %v4107_v0  ;;  %3225 = vmatpush3.bf16.msra.mxu0 %v3588_v14  ;;  %v3616_v14 = vld [vmem:[#allocation17 + $0x8] sm:$0xff]  }
 0x1f3   : > { %3226 = vmatprep.subr.bf16.mxu0 %v4107_v0 }
 0x1f6   : > { %3227 = vmatpush3.bf16.msra.mxu0 %v3590_v17  ;;  %v3618_v17 = vld [vmem:[#allocation17] sm:$0xff]  }
 0x1f7   : > { %3228 = vmatprep.subr.bf16.mxu0 %v4107_v0 }
 0x1fa   : > { %3229 = vmatpush3.bf16.msra.mxu0 %v3592_v19 }
 0x1fb   : > { %3230 = vmatprep.subr.bf16.mxu0 %v4107_v0 }
 0x1fe   : > { %3231 = vmatpush3.bf16.msra.mxu0 %v3594_v21 }
 0x1ff   : > { %3232 = vmatprep.subr.bf16.mxu0 %v4107_v0 }
 0x202   : > { %3233 = vmatpush3.bf16.msra.mxu0 %v3596_v23 }
 0x203   : > { %3234 = vmatprep.subr.bf16.mxu0 %v4107_v0 }
 0x206   : > { %3235 = vmatpush3.bf16.msra.mxu0 %v3598_v25 }
 0x207   : > { %3236 = vmatprep.subr.bf16.mxu0 %v4107_v0 }
 0x20a   : > { %3237 = vmatpush3.bf16.msra.mxu0 %v3600_v27 }
 0x20b   : > { %3238 = vmatprep.subr.bf16.mxu0 %v4107_v0 }
 0x20e   : > { %3239 = vmatpush3.bf16.msra.mxu0 %v3602_v29 }
 0x20f   : > { %3264 = vmatprep.subr.bf16.mxu0 %v4107_v0 }
 0x28e   : > { %v1412_v31 = vpop.f32.mrf.mxu1 }
 0x290   : > { %v3182_v32 = vpop.f32.mrf.mxu1 }
 0x291   : > { %v1323_v33 = vpop.f32.mrf.mxu0 }
 0x292   : > { %v1415_v34 = vpop.f32.mrf.mxu1  ;;  %v1413_v39 = vadd.f32 %v1412_v31, %v1323_v33 }
 0x293   : > { %v3162_v35 = vpop.f32.mrf.mxu0 }
 0x294   : > { %v3183_v36 = vpop.f32.mrf.mxu1  ;;  %v1426_v41 = vadd.f32 %v2877_v40, %v1413_v39 }
 0x295   : > { %v1326_v37 = vpop.f32.mrf.mxu0 }
 0x296   : > { %v1416_v42 = vadd.f32 %v1415_v34, %v1326_v37  ;;  %v1428_v45 = vmax.f32 %v1426_v41, 0.0  ;;  %v3620_v34 = vld [vmem:[#allocation20 + $0x38] sm:$0xff]  }
 0x297   : > { %v3163_v38 = vpop.f32.mrf.mxu0 }
 0x298   : > { %v1427_v46 = vadd.f32 %v2877_v40, %v1416_v42  ;;  %v3621_v40 = vld [vmem:[%s4758_s15 + $0x38] sm:$0xff]   ;;  %v3622_v42 = vld [vmem:[#allocation20 + $0x30] sm:$0xff]  }
 0x29a   : > { %v1429_v51 = vmax.f32 %v1427_v46, 0.0  ;;  %v3626_v46 = vld [vmem:[#allocation20 + $0x20] sm:$0xff]  }
 0x2b1   : > { %v1535_v44 = vpop.f32.mrf.mxu0 }
 0x2b2   : > { %v1536_v47 = vadd.f32 %v2878_v43, %v1535_v44  ;;  %v3624_v44 = vld [vmem:[#allocation20 + $0x28] sm:$0xff]  }
 0x2b3   : > { %v3202_v48 = vpop.f32.mrf.mxu0 }
 0x2b4   : > { %v1542_v49 = vadd.f32 %v1536_v47, %v1428_v45  ;;  %v3625_v45 = vld [vmem:[%s4758_s15 + $0x28] sm:$0xff]   ;;  %v3627_v47 = vld [vmem:[%s4758_s15 + $0x20] sm:$0xff]  }
 0x2b5   : > { %v1538_v50 = vpop.f32.mrf.mxu0  ;;  %v3628_v48 = vld [vmem:[#allocation20 + $0x18] sm:$0xff]  }
 0x2b6   : > { %v1539_v52 = vadd.f32 %v2878_v43, %v1538_v50  ;;  %v4580_v54 = vmax.f32 %v1542_v49, 0.0  ;;  %v3623_v43 = vld [vmem:[%s4758_s15 + $0x30] sm:$0xff]   ;;  %v3629_v49 = vld [vmem:[%s4758_s15 + $0x18] sm:$0xff]   ;;  %v3630_v50 = vld [vmem:[#allocation20 + $0x10] sm:$0xff]  }
 0x2b7   : > { %v3203_v53 = vpop.f32.mrf.mxu0 }
 0x2b8   : > { %v1543_v55 = vadd.f32 %v1539_v52, %v1429_v51  ;;  %v1569_v58 = vrot.slane %v4580_v54, 6  ;;  %v3631_v51 = vld [vmem:[%s4758_s15 + $0x10] sm:$0xff]   ;;  %v3632_v52 = vld [vmem:[#allocation20 + $0x8] sm:$0xff]   ;;  %v3633_v53 = vld [vmem:[%s4758_s15 + $0x8] sm:$0xff]  }
 0x2ba   : > { %v4582_v56 = vmax.f32 %v1543_v55, 0.0  ;;  %v3634_v55 = vld [vmem:[#allocation20] sm:$0xff]  }
 0x2bc   : > { %v1570_v59 = vrot.slane %v4582_v56, 6  ;;  %v1546_v60 = vpack.c.bf16 %v4582_v56, %v4580_v54 }
 0x2be   : > { %v1572_v61 = vsel %vm1571_vm6, %v1569_v58, %v1570_v59  ;;  %v1573_v62 = vsel %vm1571_vm6, %v1570_v59, %v1569_v58  ;;  %3241 = vmatmul.mubr.bf16.vlgmr.msra.gmra.mxu0 %v1546_v60 }
 0x2bf   : > { %v2896_v2 = vpack.c.bf16 %v1572_v61, %v1573_v62  ;;  %3265 = vmatpush3.bf16.msra.mxu0 %v3604_v57  ;;  %3280 = vmatprep.mubr.msk.bf16.mxu0 %vm4108_vm0, %v4107_v0  ;;  %v3635_v57 = vld [vmem:[%s4758_s15] sm:$0xff]   ;;  %v2926_v61 = vld [vmem:[#allocation19] ss:$0 sm:$0xff] }
 0x2c0   : > { %3266 = vmatprep.subr.bf16.mxu0 %v4107_v0 }
 0x2c1   : > { %3221 = vmatmul.mubr.msk.bf16.vlgmr.msra.gmra.mxu1 %vm4595_vm8, %v2896_v2 }
 0x2c2   : > { %3245 = vmatpush3.bf16.msra.mxu1 %v3605_v1  ;;  %3260 = vmatprep.mubr.msk.bf16.mxu1 %vm4108_vm0, %v4107_v0 }
 0x2c3   : > { %3267 = vmatpush3.bf16.msra.mxu0 %v3606_v3  ;;  %3246 = vmatprep.subr.bf16.mxu1 %v4107_v0 }
 0x2c4   : > { %3268 = vmatprep.subr.bf16.mxu0 %v4107_v0 }
 0x2c6   : > { %3247 = vmatpush3.bf16.msra.mxu1 %v3607_v4 }
 0x2c7   : > { %3269 = vmatpush3.bf16.msra.mxu0 %v3608_v5  ;;  %3248 = vmatprep.subr.bf16.mxu1 %v4107_v0 }
 0x2c8   : > { %3270 = vmatprep.subr.bf16.mxu0 %v4107_v0 }
 0x2ca   : > { %3249 = vmatpush3.bf16.msra.mxu1 %v3609_v6 }
 0x2cb   : > { %3271 = vmatpush3.bf16.msra.mxu0 %v3610_v7  ;;  %3250 = vmatprep.subr.bf16.mxu1 %v4107_v0 }
 0x2cc   : > { %3272 = vmatprep.subr.bf16.mxu0 %v4107_v0 }
 0x2ce   : > { %3251 = vmatpush3.bf16.msra.mxu1 %v3611_v8 }
 0x2cf   : > { %3273 = vmatpush3.bf16.msra.mxu0 %v3612_v9  ;;  %3252 = vmatprep.subr.bf16.mxu1 %v4107_v0 }
 0x2d0   : > { %3274 = vmatprep.subr.bf16.mxu0 %v4107_v0 }
 0x2d2   : > { %3253 = vmatpush3.bf16.msra.mxu1 %v3613_v10 }
 0x2d3   : > { %3275 = vmatpush3.bf16.msra.mxu0 %v3614_v12  ;;  %3254 = vmatprep.subr.bf16.mxu1 %v4107_v0 }
 0x2d4   : > { %3276 = vmatprep.subr.bf16.mxu0 %v4107_v0 }
 0x2d6   : > { %3255 = vmatpush3.bf16.msra.mxu1 %v3615_v13 }
 0x2d7   : > { %3277 = vmatpush3.bf16.msra.mxu0 %v3616_v14  ;;  %3256 = vmatprep.subr.bf16.mxu1 %v4107_v0 }
 0x2d8   : > { %3278 = vmatprep.subr.bf16.mxu0 %v4107_v0 }
 0x2da   : > { %3257 = vmatpush3.bf16.msra.mxu1 %v3617_v15  ;;  %v3636_v15 = vld [vmem:[#allocation23 + $0x38] sm:$0xff]  }
 0x2db   : > { %3279 = vmatpush3.bf16.msra.mxu0 %v3618_v17  ;;  %3258 = vmatprep.subr.bf16.mxu1 %v4107_v0 }
 0x2dc   : > { %3304 = vmatprep.subr.bf16.mxu0 %v4107_v0 }
 0x2de   : > { %3259 = vmatpush3.bf16.msra.mxu1 %v3619_v18 }
 0x2df   : > { %3284 = vmatprep.subr.bf16.mxu1 %v4107_v0 }
 0x37e   : > { %v1764_v19 = vpop.f32.mrf.mxu0 }
 0x380   : > { %v3242_v20 = vpop.f32.mrf.mxu0 }
 0x381   : > { %v1675_v21 = vpop.f32.mrf.mxu1 }
 0x382   : > { %v1765_v23 = vadd.f32 %v1764_v19, %v1675_v21  ;;  %v1767_v24 = vpop.f32.mrf.mxu0  ;;  %v3637_v21 = vld [vmem:[#allocation22 + $0x38] sm:$0xff]  }
 0x383   : > { %v3222_v25 = vpop.f32.mrf.mxu1 }
 0x384   : > { %v1778_v26 = vadd.f32 %v2906_v22, %v1765_v23  ;;  %v3243_v27 = vpop.f32.mrf.mxu0  ;;  %v3639_v23 = vld [vmem:[#allocation22 + $0x30] sm:$0xff]   ;;  %v3641_v25 = vld [vmem:[#allocation22 + $0x28] sm:$0xff]  }
 0x385   : > { %v1678_v28 = vpop.f32.mrf.mxu1  ;;  %v3643_v27 = vld [vmem:[#allocation22 + $0x20] sm:$0xff]  }
 0x386   : > { %v1768_v29 = vadd.f32 %v1767_v24, %v1678_v28  ;;  %v1780_v31 = vmax.f32 %v1778_v26, 0.0  ;;  %v3640_v24 = vld [vmem:[#allocation23 + $0x28] sm:$0xff]   ;;  %v3642_v26 = vld [vmem:[#allocation23 + $0x20] sm:$0xff]   ;;  %v3644_v28 = vld [vmem:[#allocation23 + $0x18] sm:$0xff]  }
 0x387   : > { %v3223_v30 = vpop.f32.mrf.mxu1 }
 0x388   : > { %v1779_v32 = vadd.f32 %v2906_v22, %v1768_v29  ;;  %v1799_v35 = vrot.slane %v1780_v31, 6  ;;  %v3638_v22 = vld [vmem:[#allocation23 + $0x30] sm:$0xff]   ;;  %v3645_v29 = vld [vmem:[#allocation22 + $0x18] sm:$0xff]  }
 0x389   : > { %v3646_v30 = vld [vmem:[#allocation23 + $0x10] sm:$0xff]  }
 0x38a   : > { %v1781_v33 = vmax.f32 %v1779_v32, 0.0  ;;  %v3648_v32 = vld [vmem:[#allocation23 + $0x8] sm:$0xff]  }
 0x38c   : > { %v1782_v36 = vpack.c.bf16 %v1781_v33, %v1780_v31  ;;  %v1800_v37 = vrot.slane %v1781_v33, 6  ;;  %v3647_v31 = vld [vmem:[#allocation22 + $0x10] sm:$0xff]   ;;  %v3649_v33 = vld [vmem:[#allocation22 + $0x8] sm:$0xff]  }
 0x38e   : > { %v1801_v38 = vsel %vm1571_vm6, %v1799_v35, %v1800_v37  ;;  %v1802_v39 = vsel %vm1571_vm6, %v1800_v37, %v1799_v35  ;;  %3281 = vmatmul.mubr.bf16.vlgmr.msra.gmra.mxu0 %v1782_v36  ;;  %v3651_v35 = vld [vmem:[#allocation22] sm:$0xff]  }
 0x38f   : > { %v2916_v41 = vpack.c.bf16 %v1801_v38, %v1802_v39  ;;  %3305 = vmatpush3.bf16.msra.mxu0 %v3620_v34  ;;  %3320 = vmatprep.mubr.msk.bf16.mxu0 %vm4108_vm0, %v4107_v0  ;;  %v3650_v34 = vld [vmem:[#allocation23] sm:$0xff]   ;;  %v2946_v39 = vld [vmem:[%s4760_s17] ss:$0 sm:$0xff] }
 0x390   : > { %3306 = vmatprep.subr.bf16.mxu0 %v4107_v0 }
 0x391   : > { %3261 = vmatmul.mubr.msk.bf16.vlgmr.msra.gmra.mxu1 %vm4595_vm8, %v2916_v41 }
 0x392   : > { %3285 = vmatpush3.bf16.msra.mxu1 %v3621_v40  ;;  %3300 = vmatprep.mubr.msk.bf16.mxu1 %vm4108_vm0, %v4107_v0 }
 0x393   : > { %3307 = vmatpush3.bf16.msra.mxu0 %v3622_v42  ;;  %3286 = vmatprep.subr.bf16.mxu1 %v4107_v0 }
 0x394   : > { %3308 = vmatprep.subr.bf16.mxu0 %v4107_v0 }
 0x396   : > { %3287 = vmatpush3.bf16.msra.mxu1 %v3623_v43 }
 0x397   : > { %3309 = vmatpush3.bf16.msra.mxu0 %v3624_v44  ;;  %3288 = vmatprep.subr.bf16.mxu1 %v4107_v0 }
 0x398   : > { %3310 = vmatprep.subr.bf16.mxu0 %v4107_v0 }
 0x39a   : > { %3289 = vmatpush3.bf16.msra.mxu1 %v3625_v45 }
 0x39b   : > { %3311 = vmatpush3.bf16.msra.mxu0 %v3626_v46  ;;  %3290 = vmatprep.subr.bf16.mxu1 %v4107_v0 }
 0x39c   : > { %3312 = vmatprep.subr.bf16.mxu0 %v4107_v0 }
 0x39e   : > { %3291 = vmatpush3.bf16.msra.mxu1 %v3627_v47 }
 0x39f   : > { %3313 = vmatpush3.bf16.msra.mxu0 %v3628_v48  ;;  %3292 = vmatprep.subr.bf16.mxu1 %v4107_v0 }
 0x3a0   : > { %3314 = vmatprep.subr.bf16.mxu0 %v4107_v0 }
 0x3a2   : > { %3293 = vmatpush3.bf16.msra.mxu1 %v3629_v49 }
 0x3a3   : > { %3315 = vmatpush3.bf16.msra.mxu0 %v3630_v50  ;;  %3294 = vmatprep.subr.bf16.mxu1 %v4107_v0 }
 0x3a4   : > { %3316 = vmatprep.subr.bf16.mxu0 %v4107_v0 }
 0x3a6   : > { %3295 = vmatpush3.bf16.msra.mxu1 %v3631_v51 }
 0x3a7   : > { %3317 = vmatpush3.bf16.msra.mxu0 %v3632_v52  ;;  %3296 = vmatprep.subr.bf16.mxu1 %v4107_v0 }
 0x3a8   : > { %3318 = vmatprep.subr.bf16.mxu0 %v4107_v0 }
 0x3aa   : > { %3297 = vmatpush3.bf16.msra.mxu1 %v3633_v53 }
 0x3ab   : > { %3319 = vmatpush3.bf16.msra.mxu0 %v3634_v55  ;;  %3298 = vmatprep.subr.bf16.mxu1 %v4107_v0 }
 0x3ac   : > { %3344 = vmatprep.subr.bf16.mxu0 %v4107_v0 }
 0x3ae   : > { %3299 = vmatpush3.bf16.msra.mxu1 %v3635_v57 }
 0x3af   : > { %3324 = vmatprep.subr.bf16.mxu1 %v4107_v0 }
 0x44e   : > { %v1993_v58 = vpop.f32.mrf.mxu0 }
 0x450   : > { %v3282_v59 = vpop.f32.mrf.mxu0 }
 0x451   : > { %v1904_v60 = vpop.f32.mrf.mxu1 }
 0x452   : > { %v1994_v62 = vadd.f32 %v1993_v58, %v1904_v60  ;;  %v1996_v63 = vpop.f32.mrf.mxu0  ;;  %v3652_v58 = vld [vmem:[#allocation25 + $0x38] sm:$0xff]   ;;  %v3653_v60 = vld [vmem:[#allocation25 + $0x30] sm:$0xff]  }
 0x453   : > { %v3262_v1 = vpop.f32.mrf.mxu1 }
 0x454   : > { %v2007_v2 = vadd.f32 %v2926_v61, %v1994_v62  ;;  %v3283_v3 = vpop.f32.mrf.mxu0  ;;  %v3656_v62 = vld [vmem:[#allocation25 + $0x18] sm:$0xff]   ;;  %v3658_v1 = vld [vmem:[#allocation25 + $0x8] sm:$0xff]  }
 0x455   : > { %v1907_v4 = vpop.f32.mrf.mxu1 }
 0x456   : > { %v2009_v5 = vmax.f32 %v2007_v2, 0.0  ;;  %v1997_v6 = vadd.f32 %v1996_v63, %v1907_v4  ;;  %v3657_v63 = vld [vmem:[#allocation25 + $0x10] sm:$0xff]   ;;  %v3659_v2 = vld [vmem:[#allocation25] sm:$0xff]  }
 0x457   : > { %v3263_v7 = vpop.f32.mrf.mxu1 }
 0x458   : > { %v2011_v8 = vadd.f32 %v2009_v5, %v4580_v54  ;;  %v2008_v9 = vadd.f32 %v2926_v61, %v1997_v6  ;;  %v3654_v61 = vld [vmem:[#allocation25 + $0x28] sm:$0xff]  }
 0x45a   : > { %v2010_v10 = vmax.f32 %v2008_v9, 0.0  ;;  %v2013_v12 = vmax.f32 %v2011_v8, 0.0 }
 0x45c   : > { %v2012_v13 = vadd.f32 %v2010_v10, %v4582_v56  ;;  %v2038_v17 = vrot.slane %v2013_v12, 4 }
 0x45e   : > { %v2014_v14 = vmax.f32 %v2012_v13, 0.0  ;;  %v2966_v13 = vld [vmem:[%s4763_s20] ss:$0 sm:$0xff] }
 0x460   : > { %v2039_v18 = vrot.slane %v2014_v14, 4  ;;  %v4675_v19 = vpack.c.bf16 %v2014_v14, %v2013_v12 }
 0x462   : > { %v2041_v20 = vsel %vm2040_vm9, %v2038_v17, %v2039_v18  ;;  %v2042_v54 = vsel %vm2040_vm9, %v2039_v18, %v2038_v17  ;;  %3321 = vmatmul.mubr.bf16.vlgmr.msra.gmra.mxu0 %v4675_v19 }
 0x463   : > { %v2936_v16 = vpack.c.bf16 %v2041_v20, %v2042_v54  ;;  %3345 = vmatpush3.bf16.msra.mxu0 %v3636_v15  ;;  %3360 = vmatprep.mubr.msk.bf16.mxu0 %vm4108_vm0, %v4107_v0 }
 0x464   : > { %3346 = vmatprep.subr.bf16.mxu0 %v4107_v0 }
 0x465   : > { %3301 = vmatmul.mubr.msk.bf16.vlgmr.msra.gmra.mxu1 %vm4683_vm11, %v2936_v16 }
 0x466   : > { %3325 = vmatpush3.bf16.msra.mxu1 %v3637_v21  ;;  %3340 = vmatprep.mubr.msk.bf16.mxu1 %vm4108_vm0, %v4107_v0 }
 0x467   : > { %3347 = vmatpush3.bf16.msra.mxu0 %v3638_v22  ;;  %3326 = vmatprep.subr.bf16.mxu1 %v4107_v0 }
 0x468   : > { %3348 = vmatprep.subr.bf16.mxu0 %v4107_v0 }
 0x46a   : > { %3327 = vmatpush3.bf16.msra.mxu1 %v3639_v23 }
 0x46b   : > { %3349 = vmatpush3.bf16.msra.mxu0 %v3640_v24  ;;  %3328 = vmatprep.subr.bf16.mxu1 %v4107_v0 }
 0x46c   : > { %3350 = vmatprep.subr.bf16.mxu0 %v4107_v0 }
 0x46e   : > { %3329 = vmatpush3.bf16.msra.mxu1 %v3641_v25 }
 0x46f   : > { %3351 = vmatpush3.bf16.msra.mxu0 %v3642_v26  ;;  %3330 = vmatprep.subr.bf16.mxu1 %v4107_v0 }
 0x470   : > { %3352 = vmatprep.subr.bf16.mxu0 %v4107_v0 }
 0x472   : > { %3331 = vmatpush3.bf16.msra.mxu1 %v3643_v27 }
 0x473   : > { %3332 = vmatprep.subr.bf16.mxu1 %v4107_v0  ;;  %3353 = vmatpush3.bf16.msra.mxu0 %v3644_v28 }
 0x474   : > { %3354 = vmatprep.subr.bf16.mxu0 %v4107_v0 }
 0x476   : > { %3333 = vmatpush3.bf16.msra.mxu1 %v3645_v29 }
 0x477   : > { %3334 = vmatprep.subr.bf16.mxu1 %v4107_v0  ;;  %3355 = vmatpush3.bf16.msra.mxu0 %v3646_v30 }
 0x478   : > { %3356 = vmatprep.subr.bf16.mxu0 %v4107_v0 }
 0x47a   : > { %3335 = vmatpush3.bf16.msra.mxu1 %v3647_v31 }
 0x47b   : > { %3336 = vmatprep.subr.bf16.mxu1 %v4107_v0  ;;  %3357 = vmatpush3.bf16.msra.mxu0 %v3648_v32 }
 0x47c   : > { %3358 = vmatprep.subr.bf16.mxu0 %v4107_v0 }
 0x47e   : > { %3337 = vmatpush3.bf16.msra.mxu1 %v3649_v33 }
 0x47f   : > { %3338 = vmatprep.subr.bf16.mxu1 %v4107_v0  ;;  %3359 = vmatpush3.bf16.msra.mxu0 %v3650_v34 }
 0x482   : > { %3339 = vmatpush3.bf16.msra.mxu1 %v3651_v35 }
 0x483   : > { %3364 = vmatprep.subr.bf16.mxu1 %v4107_v0 }
 0x522   : > { %v2233_v36 = vpop.f32.mrf.mxu0 }
 0x524   : > { %v3322_v37 = vpop.f32.mrf.mxu0 }
 0x525   : > { %v2144_v38 = vpop.f32.mrf.mxu1 }
 0x526   : > { %v2234_v40 = vadd.f32 %v2233_v36, %v2144_v38  ;;  %v2236_v41 = vpop.f32.mrf.mxu0 }
 0x527   : > { %v3302_v42 = vpop.f32.mrf.mxu1 }
 0x528   : > { %v2247_v43 = vadd.f32 %v2946_v39, %v2234_v40  ;;  %v3323_v44 = vpop.f32.mrf.mxu0 }
 0x529   : > { %v2147_v45 = vpop.f32.mrf.mxu1 }
 0x52a   : > { %v2237_v46 = vadd.f32 %v2236_v41, %v2147_v45  ;;  %v2249_v48 = vmax.f32 %v2247_v43, 0.0 }
 0x52b   : > { %v3303_v47 = vpop.f32.mrf.mxu1 }
 0x52c   : > { %v2248_v49 = vadd.f32 %v2946_v39, %v2237_v46  ;;  %v2268_v51 = vrot.slane %v2249_v48, 4 }
 0x52e   : > { %v2250_v50 = vmax.f32 %v2248_v49, 0.0 }
 0x530   : > { %v2251_v52 = vpack.c.bf16 %v2250_v50, %v2249_v48  ;;  %v2269_v53 = vrot.slane %v2250_v50, 4 }
 0x532   : > { %v2270_v55 = vsel %vm2040_vm9, %v2268_v51, %v2269_v53  ;;  %v2271_v57 = vsel %vm2040_vm9, %v2269_v53, %v2268_v51  ;;  %3361 = vmatmul.mubr.bf16.vlgmr.msra.gmra.mxu0 %v2251_v52 }
 0x533   : > { %v2956_v59 = vpack.c.bf16 %v2270_v55, %v2271_v57 }
 0x535   : > { %3341 = vmatmul.mubr.msk.bf16.vlgmr.msra.gmra.mxu1 %vm4683_vm11, %v2956_v59 }
 0x536   : > { %3365 = vmatpush3.bf16.msra.mxu1 %v3652_v58  ;;  %3380 = vmatprep.mubr.msk.bf16.mxu1 %vm4108_vm0, %v4107_v0 }
 0x537   : > { %3366 = vmatprep.subr.bf16.mxu1 %v4107_v0 }
 0x53a   : > { %3367 = vmatpush3.bf16.msra.mxu1 %v3653_v60 }
 0x53b   : > { %3368 = vmatprep.subr.bf16.mxu1 %v4107_v0 }
 0x53e   : > { %3369 = vmatpush3.bf16.msra.mxu1 %v3654_v61 }
 0x53f   : > { %3370 = vmatprep.subr.bf16.mxu1 %v4107_v0 }
 0x542   : > { %3371 = vmatpush3.bf16.msra.mxu1 %v3655_v11 }
 0x543   : > { %3372 = vmatprep.subr.bf16.mxu1 %v4107_v0 }
 0x546   : > { %3373 = vmatpush3.bf16.msra.mxu1 %v3656_v62 }
 0x547   : > { %3374 = vmatprep.subr.bf16.mxu1 %v4107_v0 }
 0x54a   : > { %3375 = vmatpush3.bf16.msra.mxu1 %v3657_v63 }
 0x54b   : > { %3376 = vmatprep.subr.bf16.mxu1 %v4107_v0 }
 0x54e   : > { %3377 = vmatpush3.bf16.msra.mxu1 %v3658_v1 }
 0x54f   : > { %3378 = vmatprep.subr.bf16.mxu1 %v4107_v0  ;;  %v2967_v0 = vld [vmem:[%s4765_s22] ss:$0 sm:$0xff] }
 0x552   : > { %3379 = vmatpush3.bf16.msra.mxu1 %v3659_v2 }
 0x555   : > { %3381 = vmatmul.mubr.bf16.vlgmr.msra.gmra.mxu1 %v4675_v19 }
 0x5f2   : > { %v2462_v3 = vpop.f32.mrf.mxu0 }
 0x5f4   : > { %v3362_v4 = vpop.f32.mrf.mxu0 }
 0x5f5   : > { %v2373_v5 = vpop.f32.mrf.mxu1 }
 0x5f6   : > { %v2465_v6 = vpop.f32.mrf.mxu0  ;;  %v2463_v12 = vadd.f32 %v2462_v3, %v2373_v5 }
 0x5f7   : > { %v3342_v7 = vpop.f32.mrf.mxu1 }
 0x5f8   : > { %v3363_v8 = vpop.f32.mrf.mxu0  ;;  %v2476_v14 = vadd.f32 %v2966_v13, %v2463_v12 }
 0x5f9   : > { %v2376_v9 = vpop.f32.mrf.mxu1 }
 0x5fa   : > { %v2466_v15 = vadd.f32 %v2465_v6, %v2376_v9  ;;  %v2478_v18 = vmax.f32 %v2476_v14, 0.0 }
 0x5fb   : > { %v3343_v10 = vpop.f32.mrf.mxu1 }
 0x5fc   : > { %v2477_v19 = vadd.f32 %v2966_v13, %v2466_v15 }
 0x5fe   : > { %v2479_v16 = vmax.f32 %v2477_v19, 0.0 }
 0x615   : > { %v2585_v17 = vpop.f32.mrf.mxu1 }
 0x616   : > { %v2586_v20 = vadd.f32 %v2967_v0, %v2585_v17 }
 0x617   : > { %v3382_v54 = vpop.f32.mrf.mxu1 }
 0x618   : > { %v2592_v56 = vadd.f32 %v2586_v20, %v2478_v18 }
 0x619   : > { %v2588_v21 = vpop.f32.mrf.mxu1 }
 0x61a   : > { %v2594_v22 = vmax.f32 %v2592_v56, 0.0  ;;  %v2589_v23 = vadd.f32 %v2967_v0, %v2588_v21 }
 0x61b   : > { %v3383_v24 = vpop.f32.mrf.mxu1 }
 0x61c   : > { %2596 = vst.msk [vmem:[%s926_s29] sm:$0xff] %vm933_vm1, %v2594_v22  ;;  %v2593_v25 = vadd.f32 %v2589_v23, %v2479_v16 }
 0x61e   : > { %v2595_v26 = vmax.f32 %v2593_v25, 0.0 }
 0x620   : > { %2597 = vst.msk [vmem:[%s926_s29 + $0x8] sm:$0xff] %vm933_vm1, %v2595_v26 }
 0x621 PF: > { %s41_s4 = sadd.s32 1, %s4088_s4  }
 0x622   : > { %p38_p9 = scmp.ge.s32.totalorder %s41_s4, 4  }
 0x624   :  { %40 = sbr.rel (!%p38_p9) target bundleno = 19 (0x13), region = 203 }
 0x629   :  { %2620 = vsyncpa [#allocation4], 1 }
 0x62a   :  { %2622 = vsyncpa [#allocation4 + $0x1], 1 }
 0x62b   :  { %2623 = vsyncpa [#allocation6], 1 }
 0x62c   :  { %2624 = vsyncpa [#allocation9], 1 }
 0x62d   :  { %2625 = vsyncpa [#allocation12], 1 }
 0x62e   :  { %2626 = vsyncpa [#allocation15], 1 }
 0x62f   :  { %2627 = vsyncpa [#allocation18], 1 }
 0x630   :  { %2628 = vsyncpa [#allocation21], 1 }
 0x631   :  { %2629 = vsyncpa [#allocation24], 1 }

</bundles_post_ra>
